<compile_context>
chip_gen: v7x
topology: tpu7x:2x2x1
jax: 0.10.0
libtpu: 0.0.40
codegen_flags: <defaults>
</compile_context>

<pallas_src>
from functools import partial

import jax
import jax.numpy as jnp
from jax import lax
from jax.experimental import pallas as pl
from jax.experimental.pallas import tpu as pltpu

OUT_PAD = 128   # lane-dense padded output width (classes live in lanes [:num_classes])


def _emotion_kernel(T, B, H,
                    xb_ref, len_ref,
                    w0_ref, b0_ref, whh0_ref,
                    w1_ref, b1_ref, whh1_ref,
                    fc1w_ref, fc1b_ref, fc2w_ref, fc2b_ref, fc3w_ref, fc3b_ref,
                    out_ref,
                    xg0, xg1, h0seq, mseq):
    f32 = jnp.float32
    G4 = 4 * H            # gate width per direction
    B2 = 2 * B            # fwd rows stacked above bwd rows in every per-step block

    # ---- one-time: per-step validity masks (shared by both LSTM layers) -----
    len_b = jnp.broadcast_to(len_ref[...], (B2, H))                   # (2B, H) int32
    rows_fwd = lax.broadcasted_iota(jnp.int32, (B2, H), 0) < B        # (2B, H) bool
    for s in range(T):
        t_of = jnp.where(rows_fwd, s, T - 1 - s)                      # per-row timestep
        mseq[s * B2:(s + 1) * B2, :] = (t_of < len_b).astype(f32)

    # ---- one-time: bulk layer-0 input projection, already blocked -----------
    # xb rows of block s: [x[s] | 0] (fwd rows) ; [0 | x[T-1-s]] (bwd rows); the
    # block-diagonal (2I, 4H) weight therefore applies W_ih^fwd / W_ih^bwd per row
    # group in a single matmul, so no per-step slicing/concat remains in the loops.
    bulk0 = jnp.dot(xb_ref[...], w0_ref[...], preferred_element_type=f32)
    b0 = b0_ref[...]                                                  # (2B, 4H) blocked bias
    for s in range(T):
        xg0[s * B2:(s + 1) * B2, :] = bulk0[s * B2:(s + 1) * B2, :] + b0

    whh0 = whh0_ref[...]                                              # (H, 8H) [fwd | bwd]
    whh1 = whh1_ref[...]                                              # (H, 8H)
    row_fwd_g = lax.broadcasted_iota(jnp.int32, (B2, G4), 0) < B      # (2B, 4H) bool

    def cell_step(pre, m, h, c, whh):
        # pre/m: (2B, 4H)/(2B, H); rows [:B] = fwd @ t=s, rows [B:] = bwd @ t=T-1-s.
        full = jnp.dot(h, whh, preferred_element_type=f32)            # (2B, 8H)
        gates = pre + jnp.where(row_fwd_g, full[:, :G4], full[:, G4:])
        sig = jax.nn.sigmoid(gates)          # one EUP pass covers i, f and o
        i = sig[:, 0 * H:1 * H]
        f = sig[:, 1 * H:2 * H]
        o = sig[:, 3 * H:4 * H]
        g = jnp.tanh(gates[:, 2 * H:3 * H])
        c_new = f * c + i * g
        h_new = o * jnp.tanh(c_new)
        keep = m > 0.0                        # freeze state past each sample's length
        return jnp.where(keep, h_new, h), jnp.where(keep, c_new, c)

    zeros = jnp.zeros((B2, H), f32)

    # ---- layer 0: fused fwd+bwd recurrence (fully unrolled; T is small) ------
    h, c = zeros, zeros
    for s in range(T):
        blk = slice(s * B2, (s + 1) * B2)
        h, c = cell_step(xg0[blk, :], mseq[blk, :], h, c, whh0)
        h0seq[blk, :] = h                      # one aligned (2B, H) store per step

    # ---- one-time: layer-1 bulk projection + reorder into blocked layout -----
    parts = []
    for t in range(T):
        hf = h0seq[t * B2:t * B2 + B, :]                       # h0_fwd[t]
        hb = h0seq[(T - 1 - t) * B2 + B:(T - t) * B2, :]       # h0_bwd[t]
        parts.append(jnp.concatenate([hf, hb], axis=1))        # (B, 2H)
    h01 = jnp.concatenate(parts, axis=0)                       # (T*B, 2H), time order
    bulk1 = jnp.dot(h01, w1_ref[...], preferred_element_type=f32)   # (T*B, 8H)
    b1 = b1_ref[...]
    for s in range(T):
        xg1[s * B2:(s + 1) * B2, :] = b1 + jnp.concatenate(
            [bulk1[s * B:(s + 1) * B, :G4],
             bulk1[(T - 1 - s) * B:(T - s) * B, G4:]], axis=0)

    # ---- layer 1: fused fwd+bwd recurrence -----------------------------------
    h, c = zeros, zeros
    for s in range(T):
        blk = slice(s * B2, (s + 1) * B2)
        h, c = cell_step(xg1[blk, :], mseq[blk, :], h, c, whh1)

    # h rows [:B] = hn[-2] (fwd final), rows [B:] = hn[-1] (bwd final).
    hh = jnp.concatenate([h, jnp.concatenate([h[B:, :], h[:B, :]], axis=0)], axis=1)

    # ---- head: fc1 -> ReLU -> fc2 -> ReLU -> fc3 (BatchNorms pre-folded) -----
    z = jnp.dot(hh, fc1w_ref[...], preferred_element_type=f32) + fc1b_ref[...]
    z = jnp.maximum(z, 0.0)
    z = jnp.dot(z, fc2w_ref[...], preferred_element_type=f32) + fc2b_ref[...]
    z = jnp.maximum(z, 0.0)
    out_ref[...] = jnp.dot(z, fc3w_ref[...], preferred_element_type=f32) + fc3b_ref[...]


def init_params(key, input_size, hidden_size, num_classes):
    H = hidden_size
    keys = iter(jax.random.split(key, 32))

    def u(shape, bound):
        return jax.random.uniform(next(keys), shape, jnp.float32, -bound, bound)

    kH = 1.0 / (H ** 0.5)
    p = {}
    # LSTM weights pre-transposed: W_ih^T: (in, 4H), W_hh^T: (H, 4H); bias = b_ih + b_hh.
    for name, in_dim in (("0f", input_size), ("0b", input_size),
                         ("1f", 2 * H), ("1b", 2 * H)):
        p["wih" + name] = u((in_dim, 4 * H), kH)
        p["whh" + name] = u((H, 4 * H), kH)
        p["b" + name] = u((1, 4 * H), kH) + u((1, 4 * H), kH)

    def bn(n):
        gamma = jnp.ones((1, n), jnp.float32)
        beta = jnp.zeros((1, n), jnp.float32)
        running_mean = jnp.zeros((1, n), jnp.float32)
        running_var = jnp.ones((1, n), jnp.float32)
        eps = 1e-5
        scale = gamma / jnp.sqrt(running_var + eps)
        shift = beta - running_mean * scale
        return scale, shift

    def linear(nin, nout):
        bound = 1.0 / (nin ** 0.5)
        return u((nin, nout), bound), u((1, nout), bound)

    p["bn1s"], p["bn1b"] = bn(2 * H)
    p["fc1w"], p["fc1b"] = linear(2 * H, 128)
    p["bn2s"], p["bn2b"] = bn(128)
    p["fc2w"], p["fc2b"] = linear(128, 64)
    p["bn3s"], p["bn3b"] = bn(64)
    p["fc3w"], p["fc3b"] = linear(64, num_classes)
    return p


def emotion_classifier_forward(x, lengths, params, hidden_size, num_classes):
    B, T, I = x.shape
    H = hidden_size
    assert num_classes <= OUT_PAD

    # Blocked, zero-interleaved input (fwd rows: [x_t | 0]; bwd rows: [0 | x_{T-1-t}])
    # so one block-diagonal matmul yields both directions' preactivations per step.
    x_tm = jnp.transpose(x, (1, 0, 2)).astype(jnp.float32)             # (T, B, I)
    zeros = jnp.zeros_like(x_tm)
    xb = jnp.concatenate(
        [jnp.concatenate([x_tm, zeros], axis=-1),
         jnp.concatenate([zeros, x_tm[::-1]], axis=-1)], axis=1
    ).reshape(T * 2 * B, 2 * I)

    len_blk = jnp.concatenate([lengths, lengths], axis=0).astype(jnp.int32).reshape(2 * B, 1)

    # LSTM weight packing (pre-transposed in init_params).
    w0 = jnp.concatenate([params["wih0f"], params["wih0b"]], axis=0)    # (2I, 4H) block-diag
    b0 = jnp.concatenate([jnp.tile(params["b0f"], (B, 1)),
                          jnp.tile(params["b0b"], (B, 1))], axis=0)     # (2B, 4H)
    whh0 = jnp.concatenate([params["whh0f"], params["whh0b"]], axis=1)  # (H, 8H)
    w1 = jnp.concatenate([params["wih1f"], params["wih1b"]], axis=1)    # (2H, 8H)
    b1 = jnp.concatenate([jnp.tile(params["b1f"], (B, 1)),
                          jnp.tile(params["b1b"], (B, 1))], axis=0)     # (2B, 4H)
    whh1 = jnp.concatenate([params["whh1f"], params["whh1b"]], axis=1)  # (H, 8H)

    # Fold eval-mode BatchNorms into the adjacent Linear layers (numerically exact).
    fc1w = params["fc1w"] * params["bn1s"].reshape(-1, 1)
    fc1b = params["bn1b"] @ params["fc1w"] + params["fc1b"]
    fc2w = params["fc2w"] * params["bn2s"].reshape(-1, 1)
    fc2b = params["bn2b"] @ params["fc2w"] + params["fc2b"]
    fc3w = params["fc3w"] * params["bn3s"].reshape(-1, 1)
    fc3b = params["bn3b"] @ params["fc3w"] + params["fc3b"]
    fc3w = jnp.pad(fc3w, ((0, 0), (0, OUT_PAD - num_classes)))          # lane-dense output
    fc3b = jnp.pad(fc3b, ((0, 0), (0, OUT_PAD - num_classes)))

    args = [xb, len_blk, w0, b0, whh0, w1, b1, whh1,
            fc1w, fc1b, fc2w, fc2b, fc3w, fc3b]

    vmem = pl.BlockSpec(memory_space=pltpu.MemorySpace.VMEM)
    out = pl.pallas_call(
        partial(_emotion_kernel, T, B, H),
        out_shape=jax.ShapeDtypeStruct((2 * B, OUT_PAD), jnp.float32),
        in_specs=[vmem] * len(args),
        out_specs=vmem,
        scratch_shapes=[pltpu.VMEM((T * 2 * B, 4 * H), jnp.float32),    # layer-0 preacts
                        pltpu.VMEM((T * 2 * B, 4 * H), jnp.float32),    # layer-1 preacts
                        pltpu.VMEM((T * 2 * B, H), jnp.float32),        # layer-0 outputs
                        pltpu.VMEM((T * 2 * B, H), jnp.float32)],       # step masks
    )(*args)
    return out[:B, :num_classes]


def _reference_forward(x, lengths, p, H):
    """Pure-JAX reference with identical packed-sequence semantics."""
    B, T, _ = x.shape
    x_tm = jnp.transpose(x, (1, 0, 2)).astype(jnp.float32)                  # (T, B, I)
    mask = (jnp.arange(T)[:, None] < lengths[None, :]).astype(jnp.float32)  # (T, B)

    def run_dir(inputs, wih, whh, b, reverse):
        h = jnp.zeros((B, H), jnp.float32)
        c = jnp.zeros((B, H), jnp.float32)
        outs = [None] * T
        order = range(T - 1, -1, -1) if reverse else range(T)
        for t in order:
            gates = inputs[t] @ wih + h @ whh + b
            i = jax.nn.sigmoid(gates[:, :H])
            f = jax.nn.sigmoid(gates[:, H:2 * H])
            g = jnp.tanh(gates[:, 2 * H:3 * H])
            o = jax.nn.sigmoid(gates[:, 3 * H:])
            cn = f * c + i * g
            hn = o * jnp.tanh(cn)
            m = mask[t][:, None]
            h = m * hn + (1.0 - m) * h
            c = m * cn + (1.0 - m) * c
            outs[t] = h
        return jnp.stack(outs, 0), h

    o0f, _ = run_dir(x_tm, p["wih0f"], p["whh0f"], p["b0f"], False)
    o0b, _ = run_dir(x_tm, p["wih0b"], p["whh0b"], p["b0b"], True)
    x1 = jnp.concatenate([o0f, o0b], axis=-1)
    _, h1f = run_dir(x1, p["wih1f"], p["whh1f"], p["b1f"], False)
    _, h1b = run_dir(x1, p["wih1b"], p["whh1b"], p["b1b"], True)
    hn = jnp.concatenate([h1f, h1b], axis=1)
    z = hn * p["bn1s"] + p["bn1b"]
    z = jnp.maximum(z @ p["fc1w"] + p["fc1b"], 0.0)
    z = z * p["bn2s"] + p["bn2b"]
    z = jnp.maximum(z @ p["fc2w"] + p["fc2b"], 0.0)
    z = z * p["bn3s"] + p["bn3b"]
    return z @ p["fc3w"] + p["fc3b"]


if __name__ == "__main__":
    INPUT_SIZE, HIDDEN_SIZE, NUM_CLASSES = 16, 32, 6
    B, T = 4, 8

    key = jax.random.PRNGKey(0)
    kx, kp = jax.random.split(key)
    x = jax.random.normal(kx, (B, T, INPUT_SIZE), jnp.float32)
    lengths = jnp.array([8, 5, 3, 6], jnp.int32)   # variable-length sequences (padded to T)

    params = init_params(kp, INPUT_SIZE, HIDDEN_SIZE, NUM_CLASSES)
    out = emotion_classifier_forward(x, lengths, params, HIDDEN_SIZE, NUM_CLASSES)
    out = jax.block_until_ready(out)
    assert out.shape == (B, NUM_CLASSES) and out.dtype == jnp.float32

    ref = jax.block_until_ready(_reference_forward(x, lengths, params, HIDDEN_SIZE))
    assert bool(jnp.all(jnp.isfinite(out)))
    assert bool(jnp.allclose(out, ref, atol=1e-2, rtol=1e-2))
    print("KERNEL_OK")
</pallas_src>

<mosaic_0001>
module attributes {stable_mosaic.version = 11 : i64} {
  func.func @_emotion_kernel(%arg0: memref<64x32xf32, #tpu.memory_space<vmem>>, %arg1: memref<8x1xi32, #tpu.memory_space<vmem>>, %arg2: memref<32x128xf32, #tpu.memory_space<vmem>>, %arg3: memref<8x128xf32, #tpu.memory_space<vmem>>, %arg4: memref<32x256xf32, #tpu.memory_space<vmem>>, %arg5: memref<64x256xf32, #tpu.memory_space<vmem>>, %arg6: memref<8x128xf32, #tpu.memory_space<vmem>>, %arg7: memref<32x256xf32, #tpu.memory_space<vmem>>, %arg8: memref<64x128xf32, #tpu.memory_space<vmem>>, %arg9: memref<1x128xf32, #tpu.memory_space<vmem>>, %arg10: memref<128x64xf32, #tpu.memory_space<vmem>>, %arg11: memref<1x64xf32, #tpu.memory_space<vmem>>, %arg12: memref<64x128xf32, #tpu.memory_space<vmem>>, %arg13: memref<1x128xf32, #tpu.memory_space<vmem>>, %arg14: memref<8x128xf32, #tpu.memory_space<vmem>>, %arg15: memref<64x128xf32, #tpu.memory_space<vmem>>, %arg16: memref<64x128xf32, #tpu.memory_space<vmem>>, %arg17: memref<64x32xf32, #tpu.memory_space<vmem>>, %arg18: memref<64x32xf32, #tpu.memory_space<vmem>>) attributes {dimension_semantics = [], scalar_prefetch = 0 : i64, scratch_operands = 4 : i64, tpu.core_type = #tpu.core_type<tc>} {
    %c0 = arith.constant 0 : index
    %c0_0 = arith.constant 0 : index
    %0 = vector.load %arg1[%c0, %c0_0] : memref<8x1xi32, #tpu.memory_space<vmem>>, vector<8x1xi32>
    %1 = vector.shape_cast %0 : vector<8x1xi32> to vector<8x1xi32>
    %2 = vector.broadcast %1 : vector<8x1xi32> to vector<8x32xi32>
    %3 = tpu.iota {dimensions = array<i32: 0>} : vector<8x32xi32>
    %c4_i32 = arith.constant 4 : i32
    %4 = vector.broadcast %c4_i32 : i32 to vector<8x32xi32>
    %5 = arith.cmpi slt, %3, %4 : vector<8x32xi32>
    %c0_i32 = arith.constant 0 : i32
    %c7_i32 = arith.constant 7 : i32
    %6 = vector.broadcast %c0_i32 : i32 to vector<8x32xi32>
    %7 = vector.broadcast %c7_i32 : i32 to vector<8x32xi32>
    %8 = arith.select %5, %6, %7 : vector<8x32xi1>, vector<8x32xi32>
    %9 = arith.cmpi slt, %8, %2 : vector<8x32xi32>
    %10 = arith.extui %9 : vector<8x32xi1> to vector<8x32xi32>
    %11 = arith.sitofp %10 : vector<8x32xi32> to vector<8x32xf32>
    %c0_1 = arith.constant 0 : index
    %c0_2 = arith.constant 0 : index
    %12 = vector.load %arg18[%c0_1, %c0_2] : memref<64x32xf32, #tpu.memory_space<vmem>>, vector<8x32xf32>
    tpu.vector_store %arg18[%c0_1, %c0_2], %11 {strides = array<i32>} : memref<64x32xf32, #tpu.memory_space<vmem>>, vector<8x32xf32>,
    %c1_i32 = arith.constant 1 : i32
    %c6_i32 = arith.constant 6 : i32
    %13 = vector.broadcast %c1_i32 : i32 to vector<8x32xi32>
    %14 = vector.broadcast %c6_i32 : i32 to vector<8x32xi32>
    %15 = arith.select %5, %13, %14 : vector<8x32xi1>, vector<8x32xi32>
    %16 = arith.cmpi slt, %15, %2 : vector<8x32xi32>
    %17 = arith.extui %16 : vector<8x32xi1> to vector<8x32xi32>
    %18 = arith.sitofp %17 : vector<8x32xi32> to vector<8x32xf32>
    %c8 = arith.constant 8 : index
    %c0_3 = arith.constant 0 : index
    %19 = vector.load %arg18[%c8, %c0_3] : memref<64x32xf32, #tpu.memory_space<vmem>>, vector<8x32xf32>
    tpu.vector_store %arg18[%c8, %c0_3], %18 {strides = array<i32>} : memref<64x32xf32, #tpu.memory_space<vmem>>, vector<8x32xf32>,
    %c2_i32 = arith.constant 2 : i32
    %c5_i32 = arith.constant 5 : i32
    %20 = vector.broadcast %c2_i32 : i32 to vector<8x32xi32>
    %21 = vector.broadcast %c5_i32 : i32 to vector<8x32xi32>
    %22 = arith.select %5, %20, %21 : vector<8x32xi1>, vector<8x32xi32>
    %23 = arith.cmpi slt, %22, %2 : vector<8x32xi32>
    %24 = arith.extui %23 : vector<8x32xi1> to vector<8x32xi32>
    %25 = arith.sitofp %24 : vector<8x32xi32> to vector<8x32xf32>
    %c16 = arith.constant 16 : index
    %c0_4 = arith.constant 0 : index
    %26 = vector.load %arg18[%c16, %c0_4] : memref<64x32xf32, #tpu.memory_space<vmem>>, vector<8x32xf32>
    tpu.vector_store %arg18[%c16, %c0_4], %25 {strides = array<i32>} : memref<64x32xf32, #tpu.memory_space<vmem>>, vector<8x32xf32>,
    %c3_i32 = arith.constant 3 : i32
    %c4_i32_5 = arith.constant 4 : i32
    %27 = vector.broadcast %c3_i32 : i32 to vector<8x32xi32>
    %28 = vector.broadcast %c4_i32_5 : i32 to vector<8x32xi32>
    %29 = arith.select %5, %27, %28 : vector<8x32xi1>, vector<8x32xi32>
    %30 = arith.cmpi slt, %29, %2 : vector<8x32xi32>
    %31 = arith.extui %30 : vector<8x32xi1> to vector<8x32xi32>
    %32 = arith.sitofp %31 : vector<8x32xi32> to vector<8x32xf32>
    %c24 = arith.constant 24 : index
    %c0_6 = arith.constant 0 : index
    %33 = vector.load %arg18[%c24, %c0_6] : memref<64x32xf32, #tpu.memory_space<vmem>>, vector<8x32xf32>
    tpu.vector_store %arg18[%c24, %c0_6], %32 {strides = array<i32>} : memref<64x32xf32, #tpu.memory_space<vmem>>, vector<8x32xf32>,
    %c4_i32_7 = arith.constant 4 : i32
    %c3_i32_8 = arith.constant 3 : i32
    %34 = vector.broadcast %c4_i32_7 : i32 to vector<8x32xi32>
    %35 = vector.broadcast %c3_i32_8 : i32 to vector<8x32xi32>
    %36 = arith.select %5, %34, %35 : vector<8x32xi1>, vector<8x32xi32>
    %37 = arith.cmpi slt, %36, %2 : vector<8x32xi32>
    %38 = arith.extui %37 : vector<8x32xi1> to vector<8x32xi32>
    %39 = arith.sitofp %38 : vector<8x32xi32> to vector<8x32xf32>
    %c32 = arith.constant 32 : index
    %c0_9 = arith.constant 0 : index
    %40 = vector.load %arg18[%c32, %c0_9] : memref<64x32xf32, #tpu.memory_space<vmem>>, vector<8x32xf32>
    tpu.vector_store %arg18[%c32, %c0_9], %39 {strides = array<i32>} : memref<64x32xf32, #tpu.memory_space<vmem>>, vector<8x32xf32>,
    %c5_i32_10 = arith.constant 5 : i32
    %c2_i32_11 = arith.constant 2 : i32
    %41 = vector.broadcast %c5_i32_10 : i32 to vector<8x32xi32>
    %42 = vector.broadcast %c2_i32_11 : i32 to vector<8x32xi32>
    %43 = arith.select %5, %41, %42 : vector<8x32xi1>, vector<8x32xi32>
    %44 = arith.cmpi slt, %43, %2 : vector<8x32xi32>
    %45 = arith.extui %44 : vector<8x32xi1> to vector<8x32xi32>
    %46 = arith.sitofp %45 : vector<8x32xi32> to vector<8x32xf32>
    %c40 = arith.constant 40 : index
    %c0_12 = arith.constant 0 : index
    %47 = vector.load %arg18[%c40, %c0_12] : memref<64x32xf32, #tpu.memory_space<vmem>>, vector<8x32xf32>
    tpu.vector_store %arg18[%c40, %c0_12], %46 {strides = array<i32>} : memref<64x32xf32, #tpu.memory_space<vmem>>, vector<8x32xf32>,
    %c6_i32_13 = arith.constant 6 : i32
    %c1_i32_14 = arith.constant 1 : i32
    %48 = vector.broadcast %c6_i32_13 : i32 to vector<8x32xi32>
    %49 = vector.broadcast %c1_i32_14 : i32 to vector<8x32xi32>
    %50 = arith.select %5, %48, %49 : vector<8x32xi1>, vector<8x32xi32>
    %51 = arith.cmpi slt, %50, %2 : vector<8x32xi32>
    %52 = arith.extui %51 : vector<8x32xi1> to vector<8x32xi32>
    %53 = arith.sitofp %52 : vector<8x32xi32> to vector<8x32xf32>
    %c48 = arith.constant 48 : index
    %c0_15 = arith.constant 0 : index
    %54 = vector.load %arg18[%c48, %c0_15] : memref<64x32xf32, #tpu.memory_space<vmem>>, vector<8x32xf32>
    tpu.vector_store %arg18[%c48, %c0_15], %53 {strides = array<i32>} : memref<64x32xf32, #tpu.memory_space<vmem>>, vector<8x32xf32>,
    %c7_i32_16 = arith.constant 7 : i32
    %c0_i32_17 = arith.constant 0 : i32
    %55 = vector.broadcast %c7_i32_16 : i32 to vector<8x32xi32>
    %56 = vector.broadcast %c0_i32_17 : i32 to vector<8x32xi32>
    %57 = arith.select %5, %55, %56 : vector<8x32xi1>, vector<8x32xi32>
    %58 = arith.cmpi slt, %57, %2 : vector<8x32xi32>
    %59 = arith.extui %58 : vector<8x32xi1> to vector<8x32xi32>
    %60 = arith.sitofp %59 : vector<8x32xi32> to vector<8x32xf32>
    %c56 = arith.constant 56 : index
    %c0_18 = arith.constant 0 : index
    %61 = vector.load %arg18[%c56, %c0_18] : memref<64x32xf32, #tpu.memory_space<vmem>>, vector<8x32xf32>
    tpu.vector_store %arg18[%c56, %c0_18], %60 {strides = array<i32>} : memref<64x32xf32, #tpu.memory_space<vmem>>, vector<8x32xf32>,
    %c0_19 = arith.constant 0 : index
    %c0_20 = arith.constant 0 : index
    %62 = vector.load %arg0[%c0_19, %c0_20] : memref<64x32xf32, #tpu.memory_space<vmem>>, vector<64x32xf32>
    %c0_21 = arith.constant 0 : index
    %c0_22 = arith.constant 0 : index
    %63 = vector.load %arg2[%c0_21, %c0_22] : memref<32x128xf32, #tpu.memory_space<vmem>>, vector<32x128xf32>
    %cst = arith.constant dense<0.000000e+00> : vector<64x128xf32>
    %64 = tpu.matmul %62, %63, %cst {dimension_numbers = #tpu.dot_dimension_numbers<[1], [0], [0], [1], [0, 0, 1, 1], [], []>} : vector<64x32xf32>, vector<32x128xf32>, vector<64x128xf32> -> vector<64x128xf32>
    %c0_23 = arith.constant 0 : index
    %c0_24 = arith.constant 0 : index
    %65 = vector.load %arg3[%c0_23, %c0_24] : memref<8x128xf32, #tpu.memory_space<vmem>>, vector<8x128xf32>
    %66 = vector.extract_strided_slice %64 {offsets = [0, 0], sizes = [8, 128], strides = [1, 1]} : vector<64x128xf32> to vector<8x128xf32>
    %67 = arith.addf %66, %65 : vector<8x128xf32>
    %c0_25 = arith.constant 0 : index
    %c0_26 = arith.constant 0 : index
    %68 = vector.load %arg15[%c0_25, %c0_26] : memref<64x128xf32, #tpu.memory_space<vmem>>, vector<8x128xf32>
    tpu.vector_store %arg15[%c0_25, %c0_26], %67 {strides = array<i32>} : memref<64x128xf32, #tpu.memory_space<vmem>>, vector<8x128xf32>,
    %69 = vector.extract_strided_slice %64 {offsets = [8, 0], sizes = [8, 128], strides = [1, 1]} : vector<64x128xf32> to vector<8x128xf32>
    %70 = arith.addf %69, %65 : vector<8x128xf32>
    %c8_27 = arith.constant 8 : index
    %c0_28 = arith.constant 0 : index
    %71 = vector.load %arg15[%c8_27, %c0_28] : memref<64x128xf32, #tpu.memory_space<vmem>>, vector<8x128xf32>
    tpu.vector_store %arg15[%c8_27, %c0_28], %70 {strides = array<i32>} : memref<64x128xf32, #tpu.memory_space<vmem>>, vector<8x128xf32>,
    %72 = vector.extract_strided_slice %64 {offsets = [16, 0], sizes = [8, 128], strides = [1, 1]} : vector<64x128xf32> to vector<8x128xf32>
    %73 = arith.addf %72, %65 : vector<8x128xf32>
    %c16_29 = arith.constant 16 : index
    %c0_30 = arith.constant 0 : index
    %74 = vector.load %arg15[%c16_29, %c0_30] : memref<64x128xf32, #tpu.memory_space<vmem>>, vector<8x128xf32>
    tpu.vector_store %arg15[%c16_29, %c0_30], %73 {strides = array<i32>} : memref<64x128xf32, #tpu.memory_space<vmem>>, vector<8x128xf32>,
    %75 = vector.extract_strided_slice %64 {offsets = [24, 0], sizes = [8, 128], strides = [1, 1]} : vector<64x128xf32> to vector<8x128xf32>
    %76 = arith.addf %75, %65 : vector<8x128xf32>
    %c24_31 = arith.constant 24 : index
    %c0_32 = arith.constant 0 : index
    %77 = vector.load %arg15[%c24_31, %c0_32] : memref<64x128xf32, #tpu.memory_space<vmem>>, vector<8x128xf32>
    tpu.vector_store %arg15[%c24_31, %c0_32], %76 {strides = array<i32>} : memref<64x128xf32, #tpu.memory_space<vmem>>, vector<8x128xf32>,
    %78 = vector.extract_strided_slice %64 {offsets = [32, 0], sizes = [8, 128], strides = [1, 1]} : vector<64x128xf32> to vector<8x128xf32>
    %79 = arith.addf %78, %65 : vector<8x128xf32>
    %c32_33 = arith.constant 32 : index
    %c0_34 = arith.constant 0 : index
    %80 = vector.load %arg15[%c32_33, %c0_34] : memref<64x128xf32, #tpu.memory_space<vmem>>, vector<8x128xf32>
    tpu.vector_store %arg15[%c32_33, %c0_34], %79 {strides = array<i32>} : memref<64x128xf32, #tpu.memory_space<vmem>>, vector<8x128xf32>,
    %81 = vector.extract_strided_slice %64 {offsets = [40, 0], sizes = [8, 128], strides = [1, 1]} : vector<64x128xf32> to vector<8x128xf32>
    %82 = arith.addf %81, %65 : vector<8x128xf32>
    %c40_35 = arith.constant 40 : index
    %c0_36 = arith.constant 0 : index
    %83 = vector.load %arg15[%c40_35, %c0_36] : memref<64x128xf32, #tpu.memory_space<vmem>>, vector<8x128xf32>
    tpu.vector_store %arg15[%c40_35, %c0_36], %82 {strides = array<i32>} : memref<64x128xf32, #tpu.memory_space<vmem>>, vector<8x128xf32>,
    %84 = vector.extract_strided_slice %64 {offsets = [48, 0], sizes = [8, 128], strides = [1, 1]} : vector<64x128xf32> to vector<8x128xf32>
    %85 = arith.addf %84, %65 : vector<8x128xf32>
    %c48_37 = arith.constant 48 : index
    %c0_38 = arith.constant 0 : index
    %86 = vector.load %arg15[%c48_37, %c0_38] : memref<64x128xf32, #tpu.memory_space<vmem>>, vector<8x128xf32>
    tpu.vector_store %arg15[%c48_37, %c0_38], %85 {strides = array<i32>} : memref<64x128xf32, #tpu.memory_space<vmem>>, vector<8x128xf32>,
    %87 = vector.extract_strided_slice %64 {offsets = [56, 0], sizes = [8, 128], strides = [1, 1]} : vector<64x128xf32> to vector<8x128xf32>
    %88 = arith.addf %87, %65 : vector<8x128xf32>
    %c56_39 = arith.constant 56 : index
    %c0_40 = arith.constant 0 : index
    %89 = vector.load %arg15[%c56_39, %c0_40] : memref<64x128xf32, #tpu.memory_space<vmem>>, vector<8x128xf32>
    tpu.vector_store %arg15[%c56_39, %c0_40], %88 {strides = array<i32>} : memref<64x128xf32, #tpu.memory_space<vmem>>, vector<8x128xf32>,
    %c0_41 = arith.constant 0 : index
    %c0_42 = arith.constant 0 : index
    %90 = vector.load %arg4[%c0_41, %c0_42] : memref<32x256xf32, #tpu.memory_space<vmem>>, vector<32x256xf32>
    %c0_43 = arith.constant 0 : index
    %c0_44 = arith.constant 0 : index
    %91 = vector.load %arg7[%c0_43, %c0_44] : memref<32x256xf32, #tpu.memory_space<vmem>>, vector<32x256xf32>
    %92 = tpu.iota {dimensions = array<i32: 0>} : vector<8x128xi32>
    %c4_i32_45 = arith.constant 4 : i32
    %93 = vector.broadcast %c4_i32_45 : i32 to vector<8x128xi32>
    %94 = arith.cmpi slt, %92, %93 : vector<8x128xi32>
    %cst_46 = arith.constant 0.000000e+00 : f32
    %95 = vector.broadcast %cst_46 : f32 to vector<8x32xf32>
    %c0_47 = arith.constant 0 : index
    %c0_48 = arith.constant 0 : index
    %96 = vector.load %arg15[%c0_47, %c0_48] : memref<64x128xf32, #tpu.memory_space<vmem>>, vector<8x128xf32>
    %c0_49 = arith.constant 0 : index
    %c0_50 = arith.constant 0 : index
    %97 = vector.load %arg18[%c0_49, %c0_50] : memref<64x32xf32, #tpu.memory_space<vmem>>, vector<8x32xf32>
    %cst_51 = arith.constant dense<0.000000e+00> : vector<8x256xf32>
    %98 = tpu.matmul %95, %90, %cst_51 {dimension_numbers = #tpu.dot_dimension_numbers<[1], [0], [0], [1], [0, 0, 1, 1], [], []>} : vector<8x32xf32>, vector<32x256xf32>, vector<8x256xf32> -> vector<8x256xf32>
    %99 = vector.extract_strided_slice %98 {offsets = [0, 0], sizes = [8, 128], strides = [1, 1]} : vector<8x256xf32> to vector<8x128xf32>
    %100 = vector.extract_strided_slice %98 {offsets = [0, 128], sizes = [8, 128], strides = [1, 1]} : vector<8x256xf32> to vector<8x128xf32>
    %101 = arith.select %94, %99, %100 : vector<8x128xi1>, vector<8x128xf32>
    %102 = arith.addf %96, %101 : vector<8x128xf32>
    %103 = arith.negf %102 : vector<8x128xf32>
    %104 = math.exp %103 : vector<8x128xf32>
    %cst_52 = arith.constant 1.000000e+00 : f32
    %105 = vector.broadcast %cst_52 : f32 to vector<8x128xf32>
    %106 = arith.addf %105, %104 : vector<8x128xf32>
    %107 = arith.divf %105, %106 : vector<8x128xf32>
    %108 = vector.extract_strided_slice %107 {offsets = [0, 0], sizes = [8, 32], strides = [1, 1]} : vector<8x128xf32> to vector<8x32xf32>
    %109 = vector.extract_strided_slice %107 {offsets = [0, 32], sizes = [8, 32], strides = [1, 1]} : vector<8x128xf32> to vector<8x32xf32>
    %110 = vector.extract_strided_slice %107 {offsets = [0, 96], sizes = [8, 32], strides = [1, 1]} : vector<8x128xf32> to vector<8x32xf32>
    %111 = vector.extract_strided_slice %102 {offsets = [0, 64], sizes = [8, 32], strides = [1, 1]} : vector<8x128xf32> to vector<8x32xf32>
    %112 = math.tanh %111 : vector<8x32xf32>
    %113 = arith.mulf %109, %95 : vector<8x32xf32>
    %114 = arith.mulf %108, %112 : vector<8x32xf32>
    %115 = arith.addf %113, %114 : vector<8x32xf32>
    %116 = math.tanh %115 : vector<8x32xf32>
    %117 = arith.mulf %110, %116 : vector<8x32xf32>
    %cst_53 = arith.constant 0.000000e+00 : f32
    %118 = vector.broadcast %cst_53 : f32 to vector<8x32xf32>
    %119 = arith.cmpf ogt, %97, %118 : vector<8x32xf32>
    %120 = arith.select %119, %117, %95 : vector<8x32xi1>, vector<8x32xf32>
    %121 = arith.select %119, %115, %95 : vector<8x32xi1>, vector<8x32xf32>
    %c0_54 = arith.constant 0 : index
    %c0_55 = arith.constant 0 : index
    %122 = vector.load %arg17[%c0_54, %c0_55] : memref<64x32xf32, #tpu.memory_space<vmem>>, vector<8x32xf32>
    tpu.vector_store %arg17[%c0_54, %c0_55], %120 {strides = array<i32>} : memref<64x32xf32, #tpu.memory_space<vmem>>, vector<8x32xf32>,
    %c8_56 = arith.constant 8 : index
    %c0_57 = arith.constant 0 : index
    %123 = vector.load %arg15[%c8_56, %c0_57] : memref<64x128xf32, #tpu.memory_space<vmem>>, vector<8x128xf32>
    %c8_58 = arith.constant 8 : index
    %c0_59 = arith.constant 0 : index
    %124 = vector.load %arg18[%c8_58, %c0_59] : memref<64x32xf32, #tpu.memory_space<vmem>>, vector<8x32xf32>
    %cst_60 = arith.constant dense<0.000000e+00> : vector<8x256xf32>
    %125 = tpu.matmul %120, %90, %cst_60 {dimension_numbers = #tpu.dot_dimension_numbers<[1], [0], [0], [1], [0, 0, 1, 1], [], []>} : vector<8x32xf32>, vector<32x256xf32>, vector<8x256xf32> -> vector<8x256xf32>
    %126 = vector.extract_strided_slice %125 {offsets = [0, 0], sizes = [8, 128], strides = [1, 1]} : vector<8x256xf32> to vector<8x128xf32>
    %127 = vector.extract_strided_slice %125 {offsets = [0, 128], sizes = [8, 128], strides = [1, 1]} : vector<8x256xf32> to vector<8x128xf32>
    %128 = arith.select %94, %126, %127 : vector<8x128xi1>, vector<8x128xf32>
    %129 = arith.addf %123, %128 : vector<8x128xf32>
    %130 = arith.negf %129 : vector<8x128xf32>
    %131 = math.exp %130 : vector<8x128xf32>
    %cst_61 = arith.constant 1.000000e+00 : f32
    %132 = vector.broadcast %cst_61 : f32 to vector<8x128xf32>
    %133 = arith.addf %132, %131 : vector<8x128xf32>
    %134 = arith.divf %132, %133 : vector<8x128xf32>
    %135 = vector.extract_strided_slice %134 {offsets = [0, 0], sizes = [8, 32], strides = [1, 1]} : vector<8x128xf32> to vector<8x32xf32>
    %136 = vector.extract_strided_slice %134 {offsets = [0, 32], sizes = [8, 32], strides = [1, 1]} : vector<8x128xf32> to vector<8x32xf32>
    %137 = vector.extract_strided_slice %134 {offsets = [0, 96], sizes = [8, 32], strides = [1, 1]} : vector<8x128xf32> to vector<8x32xf32>
    %138 = vector.extract_strided_slice %129 {offsets = [0, 64], sizes = [8, 32], strides = [1, 1]} : vector<8x128xf32> to vector<8x32xf32>
    %139 = math.tanh %138 : vector<8x32xf32>
    %140 = arith.mulf %136, %121 : vector<8x32xf32>
    %141 = arith.mulf %135, %139 : vector<8x32xf32>
    %142 = arith.addf %140, %141 : vector<8x32xf32>
    %143 = math.tanh %142 : vector<8x32xf32>
    %144 = arith.mulf %137, %143 : vector<8x32xf32>
    %cst_62 = arith.constant 0.000000e+00 : f32
    %145 = vector.broadcast %cst_62 : f32 to vector<8x32xf32>
    %146 = arith.cmpf ogt, %124, %145 : vector<8x32xf32>
    %147 = arith.select %146, %144, %120 : vector<8x32xi1>, vector<8x32xf32>
    %148 = arith.select %146, %142, %121 : vector<8x32xi1>, vector<8x32xf32>
    %c8_63 = arith.constant 8 : index
    %c0_64 = arith.constant 0 : index
    %149 = vector.load %arg17[%c8_63, %c0_64] : memref<64x32xf32, #tpu.memory_space<vmem>>, vector<8x32xf32>
    tpu.vector_store %arg17[%c8_63, %c0_64], %147 {strides = array<i32>} : memref<64x32xf32, #tpu.memory_space<vmem>>, vector<8x32xf32>,
    %c16_65 = arith.constant 16 : index
    %c0_66 = arith.constant 0 : index
    %150 = vector.load %arg15[%c16_65, %c0_66] : memref<64x128xf32, #tpu.memory_space<vmem>>, vector<8x128xf32>
    %c16_67 = arith.constant 16 : index
    %c0_68 = arith.constant 0 : index
    %151 = vector.load %arg18[%c16_67, %c0_68] : memref<64x32xf32, #tpu.memory_space<vmem>>, vector<8x32xf32>
    %cst_69 = arith.constant dense<0.000000e+00> : vector<8x256xf32>
    %152 = tpu.matmul %147, %90, %cst_69 {dimension_numbers = #tpu.dot_dimension_numbers<[1], [0], [0], [1], [0, 0, 1, 1], [], []>} : vector<8x32xf32>, vector<32x256xf32>, vector<8x256xf32> -> vector<8x256xf32>
    %153 = vector.extract_strided_slice %152 {offsets = [0, 0], sizes = [8, 128], strides = [1, 1]} : vector<8x256xf32> to vector<8x128xf32>
    %154 = vector.extract_strided_slice %152 {offsets = [0, 128], sizes = [8, 128], strides = [1, 1]} : vector<8x256xf32> to vector<8x128xf32>
    %155 = arith.select %94, %153, %154 : vector<8x128xi1>, vector<8x128xf32>
    %156 = arith.addf %150, %155 : vector<8x128xf32>
    %157 = arith.negf %156 : vector<8x128xf32>
    %158 = math.exp %157 : vector<8x128xf32>
    %cst_70 = arith.constant 1.000000e+00 : f32
    %159 = vector.broadcast %cst_70 : f32 to vector<8x128xf32>
    %160 = arith.addf %159, %158 : vector<8x128xf32>
    %161 = arith.divf %159, %160 : vector<8x128xf32>
    %162 = vector.extract_strided_slice %161 {offsets = [0, 0], sizes = [8, 32], strides = [1, 1]} : vector<8x128xf32> to vector<8x32xf32>
    %163 = vector.extract_strided_slice %161 {offsets = [0, 32], sizes = [8, 32], strides = [1, 1]} : vector<8x128xf32> to vector<8x32xf32>
    %164 = vector.extract_strided_slice %161 {offsets = [0, 96], sizes = [8, 32], strides = [1, 1]} : vector<8x128xf32> to vector<8x32xf32>
    %165 = vector.extract_strided_slice %156 {offsets = [0, 64], sizes = [8, 32], strides = [1, 1]} : vector<8x128xf32> to vector<8x32xf32>
    %166 = math.tanh %165 : vector<8x32xf32>
    %167 = arith.mulf %163, %148 : vector<8x32xf32>
    %168 = arith.mulf %162, %166 : vector<8x32xf32>
    %169 = arith.addf %167, %168 : vector<8x32xf32>
    %170 = math.tanh %169 : vector<8x32xf32>
    %171 = arith.mulf %164, %170 : vector<8x32xf32>
    %cst_71 = arith.constant 0.000000e+00 : f32
    %172 = vector.broadcast %cst_71 : f32 to vector<8x32xf32>
    %173 = arith.cmpf ogt, %151, %172 : vector<8x32xf32>
    %174 = arith.select %173, %171, %147 : vector<8x32xi1>, vector<8x32xf32>
    %175 = arith.select %173, %169, %148 : vector<8x32xi1>, vector<8x32xf32>
    %c16_72 = arith.constant 16 : index
    %c0_73 = arith.constant 0 : index
    %176 = vector.load %arg17[%c16_72, %c0_73] : memref<64x32xf32, #tpu.memory_space<vmem>>, vector<8x32xf32>
    tpu.vector_store %arg17[%c16_72, %c0_73], %174 {strides = array<i32>} : memref<64x32xf32, #tpu.memory_space<vmem>>, vector<8x32xf32>,
    %c24_74 = arith.constant 24 : index
    %c0_75 = arith.constant 0 : index
    %177 = vector.load %arg15[%c24_74, %c0_75] : memref<64x128xf32, #tpu.memory_space<vmem>>, vector<8x128xf32>
    %c24_76 = arith.constant 24 : index
    %c0_77 = arith.constant 0 : index
    %178 = vector.load %arg18[%c24_76, %c0_77] : memref<64x32xf32, #tpu.memory_space<vmem>>, vector<8x32xf32>
    %cst_78 = arith.constant dense<0.000000e+00> : vector<8x256xf32>
    %179 = tpu.matmul %174, %90, %cst_78 {dimension_numbers = #tpu.dot_dimension_numbers<[1], [0], [0], [1], [0, 0, 1, 1], [], []>} : vector<8x32xf32>, vector<32x256xf32>, vector<8x256xf32> -> vector<8x256xf32>
    %180 = vector.extract_strided_slice %179 {offsets = [0, 0], sizes = [8, 128], strides = [1, 1]} : vector<8x256xf32> to vector<8x128xf32>
    %181 = vector.extract_strided_slice %179 {offsets = [0, 128], sizes = [8, 128], strides = [1, 1]} : vector<8x256xf32> to vector<8x128xf32>
    %182 = arith.select %94, %180, %181 : vector<8x128xi1>, vector<8x128xf32>
    %183 = arith.addf %177, %182 : vector<8x128xf32>
    %184 = arith.negf %183 : vector<8x128xf32>
    %185 = math.exp %184 : vector<8x128xf32>
    %cst_79 = arith.constant 1.000000e+00 : f32
    %186 = vector.broadcast %cst_79 : f32 to vector<8x128xf32>
    %187 = arith.addf %186, %185 : vector<8x128xf32>
    %188 = arith.divf %186, %187 : vector<8x128xf32>
    %189 = vector.extract_strided_slice %188 {offsets = [0, 0], sizes = [8, 32], strides = [1, 1]} : vector<8x128xf32> to vector<8x32xf32>
    %190 = vector.extract_strided_slice %188 {offsets = [0, 32], sizes = [8, 32], strides = [1, 1]} : vector<8x128xf32> to vector<8x32xf32>
    %191 = vector.extract_strided_slice %188 {offsets = [0, 96], sizes = [8, 32], strides = [1, 1]} : vector<8x128xf32> to vector<8x32xf32>
    %192 = vector.extract_strided_slice %183 {offsets = [0, 64], sizes = [8, 32], strides = [1, 1]} : vector<8x128xf32> to vector<8x32xf32>
    %193 = math.tanh %192 : vector<8x32xf32>
    %194 = arith.mulf %190, %175 : vector<8x32xf32>
    %195 = arith.mulf %189, %193 : vector<8x32xf32>
    %196 = arith.addf %194, %195 : vector<8x32xf32>
    %197 = math.tanh %196 : vector<8x32xf32>
    %198 = arith.mulf %191, %197 : vector<8x32xf32>
    %cst_80 = arith.constant 0.000000e+00 : f32
    %199 = vector.broadcast %cst_80 : f32 to vector<8x32xf32>
    %200 = arith.cmpf ogt, %178, %199 : vector<8x32xf32>
    %201 = arith.select %200, %198, %174 : vector<8x32xi1>, vector<8x32xf32>
    %202 = arith.select %200, %196, %175 : vector<8x32xi1>, vector<8x32xf32>
    %c24_81 = arith.constant 24 : index
    %c0_82 = arith.constant 0 : index
    %203 = vector.load %arg17[%c24_81, %c0_82] : memref<64x32xf32, #tpu.memory_space<vmem>>, vector<8x32xf32>
    tpu.vector_store %arg17[%c24_81, %c0_82], %201 {strides = array<i32>} : memref<64x32xf32, #tpu.memory_space<vmem>>, vector<8x32xf32>,
    %c32_83 = arith.constant 32 : index
    %c0_84 = arith.constant 0 : index
    %204 = vector.load %arg15[%c32_83, %c0_84] : memref<64x128xf32, #tpu.memory_space<vmem>>, vector<8x128xf32>
    %c32_85 = arith.constant 32 : index
    %c0_86 = arith.constant 0 : index
    %205 = vector.load %arg18[%c32_85, %c0_86] : memref<64x32xf32, #tpu.memory_space<vmem>>, vector<8x32xf32>
    %cst_87 = arith.constant dense<0.000000e+00> : vector<8x256xf32>
    %206 = tpu.matmul %201, %90, %cst_87 {dimension_numbers = #tpu.dot_dimension_numbers<[1], [0], [0], [1], [0, 0, 1, 1], [], []>} : vector<8x32xf32>, vector<32x256xf32>, vector<8x256xf32> -> vector<8x256xf32>
    %207 = vector.extract_strided_slice %206 {offsets = [0, 0], sizes = [8, 128], strides = [1, 1]} : vector<8x256xf32> to vector<8x128xf32>
    %208 = vector.extract_strided_slice %206 {offsets = [0, 128], sizes = [8, 128], strides = [1, 1]} : vector<8x256xf32> to vector<8x128xf32>
    %209 = arith.select %94, %207, %208 : vector<8x128xi1>, vector<8x128xf32>
    %210 = arith.addf %204, %209 : vector<8x128xf32>
    %211 = arith.negf %210 : vector<8x128xf32>
    %212 = math.exp %211 : vector<8x128xf32>
    %cst_88 = arith.constant 1.000000e+00 : f32
    %213 = vector.broadcast %cst_88 : f32 to vector<8x128xf32>
    %214 = arith.addf %213, %212 : vector<8x128xf32>
    %215 = arith.divf %213, %214 : vector<8x128xf32>
    %216 = vector.extract_strided_slice %215 {offsets = [0, 0], sizes = [8, 32], strides = [1, 1]} : vector<8x128xf32> to vector<8x32xf32>
    %217 = vector.extract_strided_slice %215 {offsets = [0, 32], sizes = [8, 32], strides = [1, 1]} : vector<8x128xf32> to vector<8x32xf32>
    %218 = vector.extract_strided_slice %215 {offsets = [0, 96], sizes = [8, 32], strides = [1, 1]} : vector<8x128xf32> to vector<8x32xf32>
    %219 = vector.extract_strided_slice %210 {offsets = [0, 64], sizes = [8, 32], strides = [1, 1]} : vector<8x128xf32> to vector<8x32xf32>
    %220 = math.tanh %219 : vector<8x32xf32>
    %221 = arith.mulf %217, %202 : vector<8x32xf32>
    %222 = arith.mulf %216, %220 : vector<8x32xf32>
    %223 = arith.addf %221, %222 : vector<8x32xf32>
    %224 = math.tanh %223 : vector<8x32xf32>
    %225 = arith.mulf %218, %224 : vector<8x32xf32>
    %cst_89 = arith.constant 0.000000e+00 : f32
    %226 = vector.broadcast %cst_89 : f32 to vector<8x32xf32>
    %227 = arith.cmpf ogt, %205, %226 : vector<8x32xf32>
    %228 = arith.select %227, %225, %201 : vector<8x32xi1>, vector<8x32xf32>
    %229 = arith.select %227, %223, %202 : vector<8x32xi1>, vector<8x32xf32>
    %c32_90 = arith.constant 32 : index
    %c0_91 = arith.constant 0 : index
    %230 = vector.load %arg17[%c32_90, %c0_91] : memref<64x32xf32, #tpu.memory_space<vmem>>, vector<8x32xf32>
    tpu.vector_store %arg17[%c32_90, %c0_91], %228 {strides = array<i32>} : memref<64x32xf32, #tpu.memory_space<vmem>>, vector<8x32xf32>,
    %c40_92 = arith.constant 40 : index
    %c0_93 = arith.constant 0 : index
    %231 = vector.load %arg15[%c40_92, %c0_93] : memref<64x128xf32, #tpu.memory_space<vmem>>, vector<8x128xf32>
    %c40_94 = arith.constant 40 : index
    %c0_95 = arith.constant 0 : index
    %232 = vector.load %arg18[%c40_94, %c0_95] : memref<64x32xf32, #tpu.memory_space<vmem>>, vector<8x32xf32>
    %cst_96 = arith.constant dense<0.000000e+00> : vector<8x256xf32>
    %233 = tpu.matmul %228, %90, %cst_96 {dimension_numbers = #tpu.dot_dimension_numbers<[1], [0], [0], [1], [0, 0, 1, 1], [], []>} : vector<8x32xf32>, vector<32x256xf32>, vector<8x256xf32> -> vector<8x256xf32>
    %234 = vector.extract_strided_slice %233 {offsets = [0, 0], sizes = [8, 128], strides = [1, 1]} : vector<8x256xf32> to vector<8x128xf32>
    %235 = vector.extract_strided_slice %233 {offsets = [0, 128], sizes = [8, 128], strides = [1, 1]} : vector<8x256xf32> to vector<8x128xf32>
    %236 = arith.select %94, %234, %235 : vector<8x128xi1>, vector<8x128xf32>
    %237 = arith.addf %231, %236 : vector<8x128xf32>
    %238 = arith.negf %237 : vector<8x128xf32>
    %239 = math.exp %238 : vector<8x128xf32>
    %cst_97 = arith.constant 1.000000e+00 : f32
    %240 = vector.broadcast %cst_97 : f32 to vector<8x128xf32>
    %241 = arith.addf %240, %239 : vector<8x128xf32>
    %242 = arith.divf %240, %241 : vector<8x128xf32>
    %243 = vector.extract_strided_slice %242 {offsets = [0, 0], sizes = [8, 32], strides = [1, 1]} : vector<8x128xf32> to vector<8x32xf32>
    %244 = vector.extract_strided_slice %242 {offsets = [0, 32], sizes = [8, 32], strides = [1, 1]} : vector<8x128xf32> to vector<8x32xf32>
    %245 = vector.extract_strided_slice %242 {offsets = [0, 96], sizes = [8, 32], strides = [1, 1]} : vector<8x128xf32> to vector<8x32xf32>
    %246 = vector.extract_strided_slice %237 {offsets = [0, 64], sizes = [8, 32], strides = [1, 1]} : vector<8x128xf32> to vector<8x32xf32>
    %247 = math.tanh %246 : vector<8x32xf32>
    %248 = arith.mulf %244, %229 : vector<8x32xf32>
    %249 = arith.mulf %243, %247 : vector<8x32xf32>
    %250 = arith.addf %248, %249 : vector<8x32xf32>
    %251 = math.tanh %250 : vector<8x32xf32>
    %252 = arith.mulf %245, %251 : vector<8x32xf32>
    %cst_98 = arith.constant 0.000000e+00 : f32
    %253 = vector.broadcast %cst_98 : f32 to vector<8x32xf32>
    %254 = arith.cmpf ogt, %232, %253 : vector<8x32xf32>
    %255 = arith.select %254, %252, %228 : vector<8x32xi1>, vector<8x32xf32>
    %256 = arith.select %254, %250, %229 : vector<8x32xi1>, vector<8x32xf32>
    %c40_99 = arith.constant 40 : index
    %c0_100 = arith.constant 0 : index
    %257 = vector.load %arg17[%c40_99, %c0_100] : memref<64x32xf32, #tpu.memory_space<vmem>>, vector<8x32xf32>
    tpu.vector_store %arg17[%c40_99, %c0_100], %255 {strides = array<i32>} : memref<64x32xf32, #tpu.memory_space<vmem>>, vector<8x32xf32>,
    %c48_101 = arith.constant 48 : index
    %c0_102 = arith.constant 0 : index
    %258 = vector.load %arg15[%c48_101, %c0_102] : memref<64x128xf32, #tpu.memory_space<vmem>>, vector<8x128xf32>
    %c48_103 = arith.constant 48 : index
    %c0_104 = arith.constant 0 : index
    %259 = vector.load %arg18[%c48_103, %c0_104] : memref<64x32xf32, #tpu.memory_space<vmem>>, vector<8x32xf32>
    %cst_105 = arith.constant dense<0.000000e+00> : vector<8x256xf32>
    %260 = tpu.matmul %255, %90, %cst_105 {dimension_numbers = #tpu.dot_dimension_numbers<[1], [0], [0], [1], [0, 0, 1, 1], [], []>} : vector<8x32xf32>, vector<32x256xf32>, vector<8x256xf32> -> vector<8x256xf32>
    %261 = vector.extract_strided_slice %260 {offsets = [0, 0], sizes = [8, 128], strides = [1, 1]} : vector<8x256xf32> to vector<8x128xf32>
    %262 = vector.extract_strided_slice %260 {offsets = [0, 128], sizes = [8, 128], strides = [1, 1]} : vector<8x256xf32> to vector<8x128xf32>
    %263 = arith.select %94, %261, %262 : vector<8x128xi1>, vector<8x128xf32>
    %264 = arith.addf %258, %263 : vector<8x128xf32>
    %265 = arith.negf %264 : vector<8x128xf32>
    %266 = math.exp %265 : vector<8x128xf32>
    %cst_106 = arith.constant 1.000000e+00 : f32
    %267 = vector.broadcast %cst_106 : f32 to vector<8x128xf32>
    %268 = arith.addf %267, %266 : vector<8x128xf32>
    %269 = arith.divf %267, %268 : vector<8x128xf32>
    %270 = vector.extract_strided_slice %269 {offsets = [0, 0], sizes = [8, 32], strides = [1, 1]} : vector<8x128xf32> to vector<8x32xf32>
    %271 = vector.extract_strided_slice %269 {offsets = [0, 32], sizes = [8, 32], strides = [1, 1]} : vector<8x128xf32> to vector<8x32xf32>
    %272 = vector.extract_strided_slice %269 {offsets = [0, 96], sizes = [8, 32], strides = [1, 1]} : vector<8x128xf32> to vector<8x32xf32>
    %273 = vector.extract_strided_slice %264 {offsets = [0, 64], sizes = [8, 32], strides = [1, 1]} : vector<8x128xf32> to vector<8x32xf32>
    %274 = math.tanh %273 : vector<8x32xf32>
    %275 = arith.mulf %271, %256 : vector<8x32xf32>
    %276 = arith.mulf %270, %274 : vector<8x32xf32>
    %277 = arith.addf %275, %276 : vector<8x32xf32>
    %278 = math.tanh %277 : vector<8x32xf32>
    %279 = arith.mulf %272, %278 : vector<8x32xf32>
    %cst_107 = arith.constant 0.000000e+00 : f32
    %280 = vector.broadcast %cst_107 : f32 to vector<8x32xf32>
    %281 = arith.cmpf ogt, %259, %280 : vector<8x32xf32>
    %282 = arith.select %281, %279, %255 : vector<8x32xi1>, vector<8x32xf32>
    %283 = arith.select %281, %277, %256 : vector<8x32xi1>, vector<8x32xf32>
    %c48_108 = arith.constant 48 : index
    %c0_109 = arith.constant 0 : index
    %284 = vector.load %arg17[%c48_108, %c0_109] : memref<64x32xf32, #tpu.memory_space<vmem>>, vector<8x32xf32>
    tpu.vector_store %arg17[%c48_108, %c0_109], %282 {strides = array<i32>} : memref<64x32xf32, #tpu.memory_space<vmem>>, vector<8x32xf32>,
    %c56_110 = arith.constant 56 : index
    %c0_111 = arith.constant 0 : index
    %285 = vector.load %arg15[%c56_110, %c0_111] : memref<64x128xf32, #tpu.memory_space<vmem>>, vector<8x128xf32>
    %c56_112 = arith.constant 56 : index
    %c0_113 = arith.constant 0 : index
    %286 = vector.load %arg18[%c56_112, %c0_113] : memref<64x32xf32, #tpu.memory_space<vmem>>, vector<8x32xf32>
    %cst_114 = arith.constant dense<0.000000e+00> : vector<8x256xf32>
    %287 = tpu.matmul %282, %90, %cst_114 {dimension_numbers = #tpu.dot_dimension_numbers<[1], [0], [0], [1], [0, 0, 1, 1], [], []>} : vector<8x32xf32>, vector<32x256xf32>, vector<8x256xf32> -> vector<8x256xf32>
    %288 = vector.extract_strided_slice %287 {offsets = [0, 0], sizes = [8, 128], strides = [1, 1]} : vector<8x256xf32> to vector<8x128xf32>
    %289 = vector.extract_strided_slice %287 {offsets = [0, 128], sizes = [8, 128], strides = [1, 1]} : vector<8x256xf32> to vector<8x128xf32>
    %290 = arith.select %94, %288, %289 : vector<8x128xi1>, vector<8x128xf32>
    %291 = arith.addf %285, %290 : vector<8x128xf32>
    %292 = arith.negf %291 : vector<8x128xf32>
    %293 = math.exp %292 : vector<8x128xf32>
    %cst_115 = arith.constant 1.000000e+00 : f32
    %294 = vector.broadcast %cst_115 : f32 to vector<8x128xf32>
    %295 = arith.addf %294, %293 : vector<8x128xf32>
    %296 = arith.divf %294, %295 : vector<8x128xf32>
    %297 = vector.extract_strided_slice %296 {offsets = [0, 0], sizes = [8, 32], strides = [1, 1]} : vector<8x128xf32> to vector<8x32xf32>
    %298 = vector.extract_strided_slice %296 {offsets = [0, 32], sizes = [8, 32], strides = [1, 1]} : vector<8x128xf32> to vector<8x32xf32>
    %299 = vector.extract_strided_slice %296 {offsets = [0, 96], sizes = [8, 32], strides = [1, 1]} : vector<8x128xf32> to vector<8x32xf32>
    %300 = vector.extract_strided_slice %291 {offsets = [0, 64], sizes = [8, 32], strides = [1, 1]} : vector<8x128xf32> to vector<8x32xf32>
    %301 = math.tanh %300 : vector<8x32xf32>
    %302 = arith.mulf %298, %283 : vector<8x32xf32>
    %303 = arith.mulf %297, %301 : vector<8x32xf32>
    %304 = arith.addf %302, %303 : vector<8x32xf32>
    %305 = math.tanh %304 : vector<8x32xf32>
    %306 = arith.mulf %299, %305 : vector<8x32xf32>
    %cst_116 = arith.constant 0.000000e+00 : f32
    %307 = vector.broadcast %cst_116 : f32 to vector<8x32xf32>
    %308 = arith.cmpf ogt, %286, %307 : vector<8x32xf32>
    %309 = arith.select %308, %306, %282 : vector<8x32xi1>, vector<8x32xf32>
    %c56_117 = arith.constant 56 : index
    %c0_118 = arith.constant 0 : index
    %310 = vector.load %arg17[%c56_117, %c0_118] : memref<64x32xf32, #tpu.memory_space<vmem>>, vector<8x32xf32>
    tpu.vector_store %arg17[%c56_117, %c0_118], %309 {strides = array<i32>} : memref<64x32xf32, #tpu.memory_space<vmem>>, vector<8x32xf32>,
    %c0_119 = arith.constant 0 : index
    %c0_120 = arith.constant 0 : index
    %311 = vector.load %arg17[%c0_119, %c0_120] : memref<64x32xf32, #tpu.memory_space<vmem>>, vector<4x32xf32>
    %c60 = arith.constant 60 : index
    %c0_121 = arith.constant 0 : index
    %312 = vector.load %arg17[%c60, %c0_121] : memref<64x32xf32, #tpu.memory_space<vmem>>, vector<4x32xf32>
    %313 = tpu.concatenate %311, %312 in 1 : vector<4x32xf32>, vector<4x32xf32> -> vector<4x64xf32>
    %c8_122 = arith.constant 8 : index
    %c0_123 = arith.constant 0 : index
    %314 = vector.load %arg17[%c8_122, %c0_123] : memref<64x32xf32, #tpu.memory_space<vmem>>, vector<4x32xf32>
    %c52 = arith.constant 52 : index
    %c0_124 = arith.constant 0 : index
    %315 = vector.load %arg17[%c52, %c0_124] : memref<64x32xf32, #tpu.memory_space<vmem>>, vector<4x32xf32>
    %316 = tpu.concatenate %314, %315 in 1 : vector<4x32xf32>, vector<4x32xf32> -> vector<4x64xf32>
    %c16_125 = arith.constant 16 : index
    %c0_126 = arith.constant 0 : index
    %317 = vector.load %arg17[%c16_125, %c0_126] : memref<64x32xf32, #tpu.memory_space<vmem>>, vector<4x32xf32>
    %c44 = arith.constant 44 : index
    %c0_127 = arith.constant 0 : index
    %318 = vector.load %arg17[%c44, %c0_127] : memref<64x32xf32, #tpu.memory_space<vmem>>, vector<4x32xf32>
    %319 = tpu.concatenate %317, %318 in 1 : vector<4x32xf32>, vector<4x32xf32> -> vector<4x64xf32>
    %c24_128 = arith.constant 24 : index
    %c0_129 = arith.constant 0 : index
    %320 = vector.load %arg17[%c24_128, %c0_129] : memref<64x32xf32, #tpu.memory_space<vmem>>, vector<4x32xf32>
    %c36 = arith.constant 36 : index
    %c0_130 = arith.constant 0 : index
    %321 = vector.load %arg17[%c36, %c0_130] : memref<64x32xf32, #tpu.memory_space<vmem>>, vector<4x32xf32>
    %322 = tpu.concatenate %320, %321 in 1 : vector<4x32xf32>, vector<4x32xf32> -> vector<4x64xf32>
    %c32_131 = arith.constant 32 : index
    %c0_132 = arith.constant 0 : index
    %323 = vector.load %arg17[%c32_131, %c0_132] : memref<64x32xf32, #tpu.memory_space<vmem>>, vector<4x32xf32>
    %c28 = arith.constant 28 : index
    %c0_133 = arith.constant 0 : index
    %324 = vector.load %arg17[%c28, %c0_133] : memref<64x32xf32, #tpu.memory_space<vmem>>, vector<4x32xf32>
    %325 = tpu.concatenate %323, %324 in 1 : vector<4x32xf32>, vector<4x32xf32> -> vector<4x64xf32>
    %c40_134 = arith.constant 40 : index
    %c0_135 = arith.constant 0 : index
    %326 = vector.load %arg17[%c40_134, %c0_135] : memref<64x32xf32, #tpu.memory_space<vmem>>, vector<4x32xf32>
    %c20 = arith.constant 20 : index
    %c0_136 = arith.constant 0 : index
    %327 = vector.load %arg17[%c20, %c0_136] : memref<64x32xf32, #tpu.memory_space<vmem>>, vector<4x32xf32>
    %328 = tpu.concatenate %326, %327 in 1 : vector<4x32xf32>, vector<4x32xf32> -> vector<4x64xf32>
    %c48_137 = arith.constant 48 : index
    %c0_138 = arith.constant 0 : index
    %329 = vector.load %arg17[%c48_137, %c0_138] : memref<64x32xf32, #tpu.memory_space<vmem>>, vector<4x32xf32>
    %c12 = arith.constant 12 : index
    %c0_139 = arith.constant 0 : index
    %330 = vector.load %arg17[%c12, %c0_139] : memref<64x32xf32, #tpu.memory_space<vmem>>, vector<4x32xf32>
    %331 = tpu.concatenate %329, %330 in 1 : vector<4x32xf32>, vector<4x32xf32> -> vector<4x64xf32>
    %c56_140 = arith.constant 56 : index
    %c0_141 = arith.constant 0 : index
    %332 = vector.load %arg17[%c56_140, %c0_141] : memref<64x32xf32, #tpu.memory_space<vmem>>, vector<4x32xf32>
    %c4 = arith.constant 4 : index
    %c0_142 = arith.constant 0 : index
    %333 = vector.load %arg17[%c4, %c0_142] : memref<64x32xf32, #tpu.memory_space<vmem>>, vector<4x32xf32>
    %334 = tpu.concatenate %332, %333 in 1 : vector<4x32xf32>, vector<4x32xf32> -> vector<4x64xf32>
    %335 = tpu.concatenate %313, %316, %319, %322, %325, %328, %331, %334 in 0 : vector<4x64xf32>, vector<4x64xf32>, vector<4x64xf32>, vector<4x64xf32>, vector<4x64xf32>, vector<4x64xf32>, vector<4x64xf32>, vector<4x64xf32> -> vector<32x64xf32>
    %c0_143 = arith.constant 0 : index
    %c0_144 = arith.constant 0 : index
    %336 = vector.load %arg5[%c0_143, %c0_144] : memref<64x256xf32, #tpu.memory_space<vmem>>, vector<64x256xf32>
    %cst_145 = arith.constant dense<0.000000e+00> : vector<32x256xf32>
    %337 = tpu.matmul %335, %336, %cst_145 {dimension_numbers = #tpu.dot_dimension_numbers<[1], [0], [0], [1], [0, 0, 1, 1], [], []>} : vector<32x64xf32>, vector<64x256xf32>, vector<32x256xf32> -> vector<32x256xf32>
    %c0_146 = arith.constant 0 : index
    %c0_147 = arith.constant 0 : index
    %338 = vector.load %arg6[%c0_146, %c0_147] : memref<8x128xf32, #tpu.memory_space<vmem>>, vector<8x128xf32>
    %339 = vector.extract_strided_slice %337 {offsets = [0, 0], sizes = [4, 128], strides = [1, 1]} : vector<32x256xf32> to vector<4x128xf32>
    %340 = vector.extract_strided_slice %337 {offsets = [28, 128], sizes = [4, 128], strides = [1, 1]} : vector<32x256xf32> to vector<4x128xf32>
    %341 = tpu.concatenate %339, %340 in 0 : vector<4x128xf32>, vector<4x128xf32> -> vector<8x128xf32>
    %342 = arith.addf %338, %341 : vector<8x128xf32>
    %c0_148 = arith.constant 0 : index
    %c0_149 = arith.constant 0 : index
    %343 = vector.load %arg16[%c0_148, %c0_149] : memref<64x128xf32, #tpu.memory_space<vmem>>, vector<8x128xf32>
    tpu.vector_store %arg16[%c0_148, %c0_149], %342 {strides = array<i32>} : memref<64x128xf32, #tpu.memory_space<vmem>>, vector<8x128xf32>,
    %344 = vector.extract_strided_slice %337 {offsets = [4, 0], sizes = [4, 128], strides = [1, 1]} : vector<32x256xf32> to vector<4x128xf32>
    %345 = vector.extract_strided_slice %337 {offsets = [24, 128], sizes = [4, 128], strides = [1, 1]} : vector<32x256xf32> to vector<4x128xf32>
    %346 = tpu.concatenate %344, %345 in 0 : vector<4x128xf32>, vector<4x128xf32> -> vector<8x128xf32>
    %347 = arith.addf %338, %346 : vector<8x128xf32>
    %c8_150 = arith.constant 8 : index
    %c0_151 = arith.constant 0 : index
    %348 = vector.load %arg16[%c8_150, %c0_151] : memref<64x128xf32, #tpu.memory_space<vmem>>, vector<8x128xf32>
    tpu.vector_store %arg16[%c8_150, %c0_151], %347 {strides = array<i32>} : memref<64x128xf32, #tpu.memory_space<vmem>>, vector<8x128xf32>,
    %349 = vector.extract_strided_slice %337 {offsets = [8, 0], sizes = [4, 128], strides = [1, 1]} : vector<32x256xf32> to vector<4x128xf32>
    %350 = vector.extract_strided_slice %337 {offsets = [20, 128], sizes = [4, 128], strides = [1, 1]} : vector<32x256xf32> to vector<4x128xf32>
    %351 = tpu.concatenate %349, %350 in 0 : vector<4x128xf32>, vector<4x128xf32> -> vector<8x128xf32>
    %352 = arith.addf %338, %351 : vector<8x128xf32>
    %c16_152 = arith.constant 16 : index
    %c0_153 = arith.constant 0 : index
    %353 = vector.load %arg16[%c16_152, %c0_153] : memref<64x128xf32, #tpu.memory_space<vmem>>, vector<8x128xf32>
    tpu.vector_store %arg16[%c16_152, %c0_153], %352 {strides = array<i32>} : memref<64x128xf32, #tpu.memory_space<vmem>>, vector<8x128xf32>,
    %354 = vector.extract_strided_slice %337 {offsets = [12, 0], sizes = [4, 128], strides = [1, 1]} : vector<32x256xf32> to vector<4x128xf32>
    %355 = vector.extract_strided_slice %337 {offsets = [16, 128], sizes = [4, 128], strides = [1, 1]} : vector<32x256xf32> to vector<4x128xf32>
    %356 = tpu.concatenate %354, %355 in 0 : vector<4x128xf32>, vector<4x128xf32> -> vector<8x128xf32>
    %357 = arith.addf %338, %356 : vector<8x128xf32>
    %c24_154 = arith.constant 24 : index
    %c0_155 = arith.constant 0 : index
    %358 = vector.load %arg16[%c24_154, %c0_155] : memref<64x128xf32, #tpu.memory_space<vmem>>, vector<8x128xf32>
    tpu.vector_store %arg16[%c24_154, %c0_155], %357 {strides = array<i32>} : memref<64x128xf32, #tpu.memory_space<vmem>>, vector<8x128xf32>,
    %359 = vector.extract_strided_slice %337 {offsets = [16, 0], sizes = [4, 128], strides = [1, 1]} : vector<32x256xf32> to vector<4x128xf32>
    %360 = vector.extract_strided_slice %337 {offsets = [12, 128], sizes = [4, 128], strides = [1, 1]} : vector<32x256xf32> to vector<4x128xf32>
    %361 = tpu.concatenate %359, %360 in 0 : vector<4x128xf32>, vector<4x128xf32> -> vector<8x128xf32>
    %362 = arith.addf %338, %361 : vector<8x128xf32>
    %c32_156 = arith.constant 32 : index
    %c0_157 = arith.constant 0 : index
    %363 = vector.load %arg16[%c32_156, %c0_157] : memref<64x128xf32, #tpu.memory_space<vmem>>, vector<8x128xf32>
    tpu.vector_store %arg16[%c32_156, %c0_157], %362 {strides = array<i32>} : memref<64x128xf32, #tpu.memory_space<vmem>>, vector<8x128xf32>,
    %364 = vector.extract_strided_slice %337 {offsets = [20, 0], sizes = [4, 128], strides = [1, 1]} : vector<32x256xf32> to vector<4x128xf32>
    %365 = vector.extract_strided_slice %337 {offsets = [8, 128], sizes = [4, 128], strides = [1, 1]} : vector<32x256xf32> to vector<4x128xf32>
    %366 = tpu.concatenate %364, %365 in 0 : vector<4x128xf32>, vector<4x128xf32> -> vector<8x128xf32>
    %367 = arith.addf %338, %366 : vector<8x128xf32>
    %c40_158 = arith.constant 40 : index
    %c0_159 = arith.constant 0 : index
    %368 = vector.load %arg16[%c40_158, %c0_159] : memref<64x128xf32, #tpu.memory_space<vmem>>, vector<8x128xf32>
    tpu.vector_store %arg16[%c40_158, %c0_159], %367 {strides = array<i32>} : memref<64x128xf32, #tpu.memory_space<vmem>>, vector<8x128xf32>,
    %369 = vector.extract_strided_slice %337 {offsets = [24, 0], sizes = [4, 128], strides = [1, 1]} : vector<32x256xf32> to vector<4x128xf32>
    %370 = vector.extract_strided_slice %337 {offsets = [4, 128], sizes = [4, 128], strides = [1, 1]} : vector<32x256xf32> to vector<4x128xf32>
    %371 = tpu.concatenate %369, %370 in 0 : vector<4x128xf32>, vector<4x128xf32> -> vector<8x128xf32>
    %372 = arith.addf %338, %371 : vector<8x128xf32>
    %c48_160 = arith.constant 48 : index
    %c0_161 = arith.constant 0 : index
    %373 = vector.load %arg16[%c48_160, %c0_161] : memref<64x128xf32, #tpu.memory_space<vmem>>, vector<8x128xf32>
    tpu.vector_store %arg16[%c48_160, %c0_161], %372 {strides = array<i32>} : memref<64x128xf32, #tpu.memory_space<vmem>>, vector<8x128xf32>,
    %374 = vector.extract_strided_slice %337 {offsets = [28, 0], sizes = [4, 128], strides = [1, 1]} : vector<32x256xf32> to vector<4x128xf32>
    %375 = vector.extract_strided_slice %337 {offsets = [0, 128], sizes = [4, 128], strides = [1, 1]} : vector<32x256xf32> to vector<4x128xf32>
    %376 = tpu.concatenate %374, %375 in 0 : vector<4x128xf32>, vector<4x128xf32> -> vector<8x128xf32>
    %377 = arith.addf %338, %376 : vector<8x128xf32>
    %c56_162 = arith.constant 56 : index
    %c0_163 = arith.constant 0 : index
    %378 = vector.load %arg16[%c56_162, %c0_163] : memref<64x128xf32, #tpu.memory_space<vmem>>, vector<8x128xf32>
    tpu.vector_store %arg16[%c56_162, %c0_163], %377 {strides = array<i32>} : memref<64x128xf32, #tpu.memory_space<vmem>>, vector<8x128xf32>,
    %c0_164 = arith.constant 0 : index
    %c0_165 = arith.constant 0 : index
    %379 = vector.load %arg16[%c0_164, %c0_165] : memref<64x128xf32, #tpu.memory_space<vmem>>, vector<8x128xf32>
    %c0_166 = arith.constant 0 : index
    %c0_167 = arith.constant 0 : index
    %380 = vector.load %arg18[%c0_166, %c0_167] : memref<64x32xf32, #tpu.memory_space<vmem>>, vector<8x32xf32>
    %cst_168 = arith.constant dense<0.000000e+00> : vector<8x256xf32>
    %381 = tpu.matmul %95, %91, %cst_168 {dimension_numbers = #tpu.dot_dimension_numbers<[1], [0], [0], [1], [0, 0, 1, 1], [], []>} : vector<8x32xf32>, vector<32x256xf32>, vector<8x256xf32> -> vector<8x256xf32>
    %382 = vector.extract_strided_slice %381 {offsets = [0, 0], sizes = [8, 128], strides = [1, 1]} : vector<8x256xf32> to vector<8x128xf32>
    %383 = vector.extract_strided_slice %381 {offsets = [0, 128], sizes = [8, 128], strides = [1, 1]} : vector<8x256xf32> to vector<8x128xf32>
    %384 = arith.select %94, %382, %383 : vector<8x128xi1>, vector<8x128xf32>
    %385 = arith.addf %379, %384 : vector<8x128xf32>
    %386 = arith.negf %385 : vector<8x128xf32>
    %387 = math.exp %386 : vector<8x128xf32>
    %cst_169 = arith.constant 1.000000e+00 : f32
    %388 = vector.broadcast %cst_169 : f32 to vector<8x128xf32>
    %389 = arith.addf %388, %387 : vector<8x128xf32>
    %390 = arith.divf %388, %389 : vector<8x128xf32>
    %391 = vector.extract_strided_slice %390 {offsets = [0, 0], sizes = [8, 32], strides = [1, 1]} : vector<8x128xf32> to vector<8x32xf32>
    %392 = vector.extract_strided_slice %390 {offsets = [0, 32], sizes = [8, 32], strides = [1, 1]} : vector<8x128xf32> to vector<8x32xf32>
    %393 = vector.extract_strided_slice %390 {offsets = [0, 96], sizes = [8, 32], strides = [1, 1]} : vector<8x128xf32> to vector<8x32xf32>
    %394 = vector.extract_strided_slice %385 {offsets = [0, 64], sizes = [8, 32], strides = [1, 1]} : vector<8x128xf32> to vector<8x32xf32>
    %395 = math.tanh %394 : vector<8x32xf32>
    %396 = arith.mulf %392, %95 : vector<8x32xf32>
    %397 = arith.mulf %391, %395 : vector<8x32xf32>
    %398 = arith.addf %396, %397 : vector<8x32xf32>
    %399 = math.tanh %398 : vector<8x32xf32>
    %400 = arith.mulf %393, %399 : vector<8x32xf32>
    %cst_170 = arith.constant 0.000000e+00 : f32
    %401 = vector.broadcast %cst_170 : f32 to vector<8x32xf32>
    %402 = arith.cmpf ogt, %380, %401 : vector<8x32xf32>
    %403 = arith.select %402, %400, %95 : vector<8x32xi1>, vector<8x32xf32>
    %404 = arith.select %402, %398, %95 : vector<8x32xi1>, vector<8x32xf32>
    %c8_171 = arith.constant 8 : index
    %c0_172 = arith.constant 0 : index
    %405 = vector.load %arg16[%c8_171, %c0_172] : memref<64x128xf32, #tpu.memory_space<vmem>>, vector<8x128xf32>
    %c8_173 = arith.constant 8 : index
    %c0_174 = arith.constant 0 : index
    %406 = vector.load %arg18[%c8_173, %c0_174] : memref<64x32xf32, #tpu.memory_space<vmem>>, vector<8x32xf32>
    %cst_175 = arith.constant dense<0.000000e+00> : vector<8x256xf32>
    %407 = tpu.matmul %403, %91, %cst_175 {dimension_numbers = #tpu.dot_dimension_numbers<[1], [0], [0], [1], [0, 0, 1, 1], [], []>} : vector<8x32xf32>, vector<32x256xf32>, vector<8x256xf32> -> vector<8x256xf32>
    %408 = vector.extract_strided_slice %407 {offsets = [0, 0], sizes = [8, 128], strides = [1, 1]} : vector<8x256xf32> to vector<8x128xf32>
    %409 = vector.extract_strided_slice %407 {offsets = [0, 128], sizes = [8, 128], strides = [1, 1]} : vector<8x256xf32> to vector<8x128xf32>
    %410 = arith.select %94, %408, %409 : vector<8x128xi1>, vector<8x128xf32>
    %411 = arith.addf %405, %410 : vector<8x128xf32>
    %412 = arith.negf %411 : vector<8x128xf32>
    %413 = math.exp %412 : vector<8x128xf32>
    %cst_176 = arith.constant 1.000000e+00 : f32
    %414 = vector.broadcast %cst_176 : f32 to vector<8x128xf32>
    %415 = arith.addf %414, %413 : vector<8x128xf32>
    %416 = arith.divf %414, %415 : vector<8x128xf32>
    %417 = vector.extract_strided_slice %416 {offsets = [0, 0], sizes = [8, 32], strides = [1, 1]} : vector<8x128xf32> to vector<8x32xf32>
    %418 = vector.extract_strided_slice %416 {offsets = [0, 32], sizes = [8, 32], strides = [1, 1]} : vector<8x128xf32> to vector<8x32xf32>
    %419 = vector.extract_strided_slice %416 {offsets = [0, 96], sizes = [8, 32], strides = [1, 1]} : vector<8x128xf32> to vector<8x32xf32>
    %420 = vector.extract_strided_slice %411 {offsets = [0, 64], sizes = [8, 32], strides = [1, 1]} : vector<8x128xf32> to vector<8x32xf32>
    %421 = math.tanh %420 : vector<8x32xf32>
    %422 = arith.mulf %418, %404 : vector<8x32xf32>
    %423 = arith.mulf %417, %421 : vector<8x32xf32>
    %424 = arith.addf %422, %423 : vector<8x32xf32>
    %425 = math.tanh %424 : vector<8x32xf32>
    %426 = arith.mulf %419, %425 : vector<8x32xf32>
    %cst_177 = arith.constant 0.000000e+00 : f32
    %427 = vector.broadcast %cst_177 : f32 to vector<8x32xf32>
    %428 = arith.cmpf ogt, %406, %427 : vector<8x32xf32>
    %429 = arith.select %428, %426, %403 : vector<8x32xi1>, vector<8x32xf32>
    %430 = arith.select %428, %424, %404 : vector<8x32xi1>, vector<8x32xf32>
    %c16_178 = arith.constant 16 : index
    %c0_179 = arith.constant 0 : index
    %431 = vector.load %arg16[%c16_178, %c0_179] : memref<64x128xf32, #tpu.memory_space<vmem>>, vector<8x128xf32>
    %c16_180 = arith.constant 16 : index
    %c0_181 = arith.constant 0 : index
    %432 = vector.load %arg18[%c16_180, %c0_181] : memref<64x32xf32, #tpu.memory_space<vmem>>, vector<8x32xf32>
    %cst_182 = arith.constant dense<0.000000e+00> : vector<8x256xf32>
    %433 = tpu.matmul %429, %91, %cst_182 {dimension_numbers = #tpu.dot_dimension_numbers<[1], [0], [0], [1], [0, 0, 1, 1], [], []>} : vector<8x32xf32>, vector<32x256xf32>, vector<8x256xf32> -> vector<8x256xf32>
    %434 = vector.extract_strided_slice %433 {offsets = [0, 0], sizes = [8, 128], strides = [1, 1]} : vector<8x256xf32> to vector<8x128xf32>
    %435 = vector.extract_strided_slice %433 {offsets = [0, 128], sizes = [8, 128], strides = [1, 1]} : vector<8x256xf32> to vector<8x128xf32>
    %436 = arith.select %94, %434, %435 : vector<8x128xi1>, vector<8x128xf32>
    %437 = arith.addf %431, %436 : vector<8x128xf32>
    %438 = arith.negf %437 : vector<8x128xf32>
    %439 = math.exp %438 : vector<8x128xf32>
    %cst_183 = arith.constant 1.000000e+00 : f32
    %440 = vector.broadcast %cst_183 : f32 to vector<8x128xf32>
    %441 = arith.addf %440, %439 : vector<8x128xf32>
    %442 = arith.divf %440, %441 : vector<8x128xf32>
    %443 = vector.extract_strided_slice %442 {offsets = [0, 0], sizes = [8, 32], strides = [1, 1]} : vector<8x128xf32> to vector<8x32xf32>
    %444 = vector.extract_strided_slice %442 {offsets = [0, 32], sizes = [8, 32], strides = [1, 1]} : vector<8x128xf32> to vector<8x32xf32>
    %445 = vector.extract_strided_slice %442 {offsets = [0, 96], sizes = [8, 32], strides = [1, 1]} : vector<8x128xf32> to vector<8x32xf32>
    %446 = vector.extract_strided_slice %437 {offsets = [0, 64], sizes = [8, 32], strides = [1, 1]} : vector<8x128xf32> to vector<8x32xf32>
    %447 = math.tanh %446 : vector<8x32xf32>
    %448 = arith.mulf %444, %430 : vector<8x32xf32>
    %449 = arith.mulf %443, %447 : vector<8x32xf32>
    %450 = arith.addf %448, %449 : vector<8x32xf32>
    %451 = math.tanh %450 : vector<8x32xf32>
    %452 = arith.mulf %445, %451 : vector<8x32xf32>
    %cst_184 = arith.constant 0.000000e+00 : f32
    %453 = vector.broadcast %cst_184 : f32 to vector<8x32xf32>
    %454 = arith.cmpf ogt, %432, %453 : vector<8x32xf32>
    %455 = arith.select %454, %452, %429 : vector<8x32xi1>, vector<8x32xf32>
    %456 = arith.select %454, %450, %430 : vector<8x32xi1>, vector<8x32xf32>
    %c24_185 = arith.constant 24 : index
    %c0_186 = arith.constant 0 : index
    %457 = vector.load %arg16[%c24_185, %c0_186] : memref<64x128xf32, #tpu.memory_space<vmem>>, vector<8x128xf32>
    %c24_187 = arith.constant 24 : index
    %c0_188 = arith.constant 0 : index
    %458 = vector.load %arg18[%c24_187, %c0_188] : memref<64x32xf32, #tpu.memory_space<vmem>>, vector<8x32xf32>
    %cst_189 = arith.constant dense<0.000000e+00> : vector<8x256xf32>
    %459 = tpu.matmul %455, %91, %cst_189 {dimension_numbers = #tpu.dot_dimension_numbers<[1], [0], [0], [1], [0, 0, 1, 1], [], []>} : vector<8x32xf32>, vector<32x256xf32>, vector<8x256xf32> -> vector<8x256xf32>
    %460 = vector.extract_strided_slice %459 {offsets = [0, 0], sizes = [8, 128], strides = [1, 1]} : vector<8x256xf32> to vector<8x128xf32>
    %461 = vector.extract_strided_slice %459 {offsets = [0, 128], sizes = [8, 128], strides = [1, 1]} : vector<8x256xf32> to vector<8x128xf32>
    %462 = arith.select %94, %460, %461 : vector<8x128xi1>, vector<8x128xf32>
    %463 = arith.addf %457, %462 : vector<8x128xf32>
    %464 = arith.negf %463 : vector<8x128xf32>
    %465 = math.exp %464 : vector<8x128xf32>
    %cst_190 = arith.constant 1.000000e+00 : f32
    %466 = vector.broadcast %cst_190 : f32 to vector<8x128xf32>
    %467 = arith.addf %466, %465 : vector<8x128xf32>
    %468 = arith.divf %466, %467 : vector<8x128xf32>
    %469 = vector.extract_strided_slice %468 {offsets = [0, 0], sizes = [8, 32], strides = [1, 1]} : vector<8x128xf32> to vector<8x32xf32>
    %470 = vector.extract_strided_slice %468 {offsets = [0, 32], sizes = [8, 32], strides = [1, 1]} : vector<8x128xf32> to vector<8x32xf32>
    %471 = vector.extract_strided_slice %468 {offsets = [0, 96], sizes = [8, 32], strides = [1, 1]} : vector<8x128xf32> to vector<8x32xf32>
    %472 = vector.extract_strided_slice %463 {offsets = [0, 64], sizes = [8, 32], strides = [1, 1]} : vector<8x128xf32> to vector<8x32xf32>
    %473 = math.tanh %472 : vector<8x32xf32>
    %474 = arith.mulf %470, %456 : vector<8x32xf32>
    %475 = arith.mulf %469, %473 : vector<8x32xf32>
    %476 = arith.addf %474, %475 : vector<8x32xf32>
    %477 = math.tanh %476 : vector<8x32xf32>
    %478 = arith.mulf %471, %477 : vector<8x32xf32>
    %cst_191 = arith.constant 0.000000e+00 : f32
    %479 = vector.broadcast %cst_191 : f32 to vector<8x32xf32>
    %480 = arith.cmpf ogt, %458, %479 : vector<8x32xf32>
    %481 = arith.select %480, %478, %455 : vector<8x32xi1>, vector<8x32xf32>
    %482 = arith.select %480, %476, %456 : vector<8x32xi1>, vector<8x32xf32>
    %c32_192 = arith.constant 32 : index
    %c0_193 = arith.constant 0 : index
    %483 = vector.load %arg16[%c32_192, %c0_193] : memref<64x128xf32, #tpu.memory_space<vmem>>, vector<8x128xf32>
    %c32_194 = arith.constant 32 : index
    %c0_195 = arith.constant 0 : index
    %484 = vector.load %arg18[%c32_194, %c0_195] : memref<64x32xf32, #tpu.memory_space<vmem>>, vector<8x32xf32>
    %cst_196 = arith.constant dense<0.000000e+00> : vector<8x256xf32>
    %485 = tpu.matmul %481, %91, %cst_196 {dimension_numbers = #tpu.dot_dimension_numbers<[1], [0], [0], [1], [0, 0, 1, 1], [], []>} : vector<8x32xf32>, vector<32x256xf32>, vector<8x256xf32> -> vector<8x256xf32>
    %486 = vector.extract_strided_slice %485 {offsets = [0, 0], sizes = [8, 128], strides = [1, 1]} : vector<8x256xf32> to vector<8x128xf32>
    %487 = vector.extract_strided_slice %485 {offsets = [0, 128], sizes = [8, 128], strides = [1, 1]} : vector<8x256xf32> to vector<8x128xf32>
    %488 = arith.select %94, %486, %487 : vector<8x128xi1>, vector<8x128xf32>
    %489 = arith.addf %483, %488 : vector<8x128xf32>
    %490 = arith.negf %489 : vector<8x128xf32>
    %491 = math.exp %490 : vector<8x128xf32>
    %cst_197 = arith.constant 1.000000e+00 : f32
    %492 = vector.broadcast %cst_197 : f32 to vector<8x128xf32>
    %493 = arith.addf %492, %491 : vector<8x128xf32>
    %494 = arith.divf %492, %493 : vector<8x128xf32>
    %495 = vector.extract_strided_slice %494 {offsets = [0, 0], sizes = [8, 32], strides = [1, 1]} : vector<8x128xf32> to vector<8x32xf32>
    %496 = vector.extract_strided_slice %494 {offsets = [0, 32], sizes = [8, 32], strides = [1, 1]} : vector<8x128xf32> to vector<8x32xf32>
    %497 = vector.extract_strided_slice %494 {offsets = [0, 96], sizes = [8, 32], strides = [1, 1]} : vector<8x128xf32> to vector<8x32xf32>
    %498 = vector.extract_strided_slice %489 {offsets = [0, 64], sizes = [8, 32], strides = [1, 1]} : vector<8x128xf32> to vector<8x32xf32>
    %499 = math.tanh %498 : vector<8x32xf32>
    %500 = arith.mulf %496, %482 : vector<8x32xf32>
    %501 = arith.mulf %495, %499 : vector<8x32xf32>
    %502 = arith.addf %500, %501 : vector<8x32xf32>
    %503 = math.tanh %502 : vector<8x32xf32>
    %504 = arith.mulf %497, %503 : vector<8x32xf32>
    %cst_198 = arith.constant 0.000000e+00 : f32
    %505 = vector.broadcast %cst_198 : f32 to vector<8x32xf32>
    %506 = arith.cmpf ogt, %484, %505 : vector<8x32xf32>
    %507 = arith.select %506, %504, %481 : vector<8x32xi1>, vector<8x32xf32>
    %508 = arith.select %506, %502, %482 : vector<8x32xi1>, vector<8x32xf32>
    %c40_199 = arith.constant 40 : index
    %c0_200 = arith.constant 0 : index
    %509 = vector.load %arg16[%c40_199, %c0_200] : memref<64x128xf32, #tpu.memory_space<vmem>>, vector<8x128xf32>
    %c40_201 = arith.constant 40 : index
    %c0_202 = arith.constant 0 : index
    %510 = vector.load %arg18[%c40_201, %c0_202] : memref<64x32xf32, #tpu.memory_space<vmem>>, vector<8x32xf32>
    %cst_203 = arith.constant dense<0.000000e+00> : vector<8x256xf32>
    %511 = tpu.matmul %507, %91, %cst_203 {dimension_numbers = #tpu.dot_dimension_numbers<[1], [0], [0], [1], [0, 0, 1, 1], [], []>} : vector<8x32xf32>, vector<32x256xf32>, vector<8x256xf32> -> vector<8x256xf32>
    %512 = vector.extract_strided_slice %511 {offsets = [0, 0], sizes = [8, 128], strides = [1, 1]} : vector<8x256xf32> to vector<8x128xf32>
    %513 = vector.extract_strided_slice %511 {offsets = [0, 128], sizes = [8, 128], strides = [1, 1]} : vector<8x256xf32> to vector<8x128xf32>
    %514 = arith.select %94, %512, %513 : vector<8x128xi1>, vector<8x128xf32>
    %515 = arith.addf %509, %514 : vector<8x128xf32>
    %516 = arith.negf %515 : vector<8x128xf32>
    %517 = math.exp %516 : vector<8x128xf32>
    %cst_204 = arith.constant 1.000000e+00 : f32
    %518 = vector.broadcast %cst_204 : f32 to vector<8x128xf32>
    %519 = arith.addf %518, %517 : vector<8x128xf32>
    %520 = arith.divf %518, %519 : vector<8x128xf32>
    %521 = vector.extract_strided_slice %520 {offsets = [0, 0], sizes = [8, 32], strides = [1, 1]} : vector<8x128xf32> to vector<8x32xf32>
    %522 = vector.extract_strided_slice %520 {offsets = [0, 32], sizes = [8, 32], strides = [1, 1]} : vector<8x128xf32> to vector<8x32xf32>
    %523 = vector.extract_strided_slice %520 {offsets = [0, 96], sizes = [8, 32], strides = [1, 1]} : vector<8x128xf32> to vector<8x32xf32>
    %524 = vector.extract_strided_slice %515 {offsets = [0, 64], sizes = [8, 32], strides = [1, 1]} : vector<8x128xf32> to vector<8x32xf32>
    %525 = math.tanh %524 : vector<8x32xf32>
    %526 = arith.mulf %522, %508 : vector<8x32xf32>
    %527 = arith.mulf %521, %525 : vector<8x32xf32>
    %528 = arith.addf %526, %527 : vector<8x32xf32>
    %529 = math.tanh %528 : vector<8x32xf32>
    %530 = arith.mulf %523, %529 : vector<8x32xf32>
    %cst_205 = arith.constant 0.000000e+00 : f32
    %531 = vector.broadcast %cst_205 : f32 to vector<8x32xf32>
    %532 = arith.cmpf ogt, %510, %531 : vector<8x32xf32>
    %533 = arith.select %532, %530, %507 : vector<8x32xi1>, vector<8x32xf32>
    %534 = arith.select %532, %528, %508 : vector<8x32xi1>, vector<8x32xf32>
    %c48_206 = arith.constant 48 : index
    %c0_207 = arith.constant 0 : index
    %535 = vector.load %arg16[%c48_206, %c0_207] : memref<64x128xf32, #tpu.memory_space<vmem>>, vector<8x128xf32>
    %c48_208 = arith.constant 48 : index
    %c0_209 = arith.constant 0 : index
    %536 = vector.load %arg18[%c48_208, %c0_209] : memref<64x32xf32, #tpu.memory_space<vmem>>, vector<8x32xf32>
    %cst_210 = arith.constant dense<0.000000e+00> : vector<8x256xf32>
    %537 = tpu.matmul %533, %91, %cst_210 {dimension_numbers = #tpu.dot_dimension_numbers<[1], [0], [0], [1], [0, 0, 1, 1], [], []>} : vector<8x32xf32>, vector<32x256xf32>, vector<8x256xf32> -> vector<8x256xf32>
    %538 = vector.extract_strided_slice %537 {offsets = [0, 0], sizes = [8, 128], strides = [1, 1]} : vector<8x256xf32> to vector<8x128xf32>
    %539 = vector.extract_strided_slice %537 {offsets = [0, 128], sizes = [8, 128], strides = [1, 1]} : vector<8x256xf32> to vector<8x128xf32>
    %540 = arith.select %94, %538, %539 : vector<8x128xi1>, vector<8x128xf32>
    %541 = arith.addf %535, %540 : vector<8x128xf32>
    %542 = arith.negf %541 : vector<8x128xf32>
    %543 = math.exp %542 : vector<8x128xf32>
    %cst_211 = arith.constant 1.000000e+00 : f32
    %544 = vector.broadcast %cst_211 : f32 to vector<8x128xf32>
    %545 = arith.addf %544, %543 : vector<8x128xf32>
    %546 = arith.divf %544, %545 : vector<8x128xf32>
    %547 = vector.extract_strided_slice %546 {offsets = [0, 0], sizes = [8, 32], strides = [1, 1]} : vector<8x128xf32> to vector<8x32xf32>
    %548 = vector.extract_strided_slice %546 {offsets = [0, 32], sizes = [8, 32], strides = [1, 1]} : vector<8x128xf32> to vector<8x32xf32>
    %549 = vector.extract_strided_slice %546 {offsets = [0, 96], sizes = [8, 32], strides = [1, 1]} : vector<8x128xf32> to vector<8x32xf32>
    %550 = vector.extract_strided_slice %541 {offsets = [0, 64], sizes = [8, 32], strides = [1, 1]} : vector<8x128xf32> to vector<8x32xf32>
    %551 = math.tanh %550 : vector<8x32xf32>
    %552 = arith.mulf %548, %534 : vector<8x32xf32>
    %553 = arith.mulf %547, %551 : vector<8x32xf32>
    %554 = arith.addf %552, %553 : vector<8x32xf32>
    %555 = math.tanh %554 : vector<8x32xf32>
    %556 = arith.mulf %549, %555 : vector<8x32xf32>
    %cst_212 = arith.constant 0.000000e+00 : f32
    %557 = vector.broadcast %cst_212 : f32 to vector<8x32xf32>
    %558 = arith.cmpf ogt, %536, %557 : vector<8x32xf32>
    %559 = arith.select %558, %556, %533 : vector<8x32xi1>, vector<8x32xf32>
    %560 = arith.select %558, %554, %534 : vector<8x32xi1>, vector<8x32xf32>
    %c56_213 = arith.constant 56 : index
    %c0_214 = arith.constant 0 : index
    %561 = vector.load %arg16[%c56_213, %c0_214] : memref<64x128xf32, #tpu.memory_space<vmem>>, vector<8x128xf32>
    %c56_215 = arith.constant 56 : index
    %c0_216 = arith.constant 0 : index
    %562 = vector.load %arg18[%c56_215, %c0_216] : memref<64x32xf32, #tpu.memory_space<vmem>>, vector<8x32xf32>
    %cst_217 = arith.constant dense<0.000000e+00> : vector<8x256xf32>
    %563 = tpu.matmul %559, %91, %cst_217 {dimension_numbers = #tpu.dot_dimension_numbers<[1], [0], [0], [1], [0, 0, 1, 1], [], []>} : vector<8x32xf32>, vector<32x256xf32>, vector<8x256xf32> -> vector<8x256xf32>
    %564 = vector.extract_strided_slice %563 {offsets = [0, 0], sizes = [8, 128], strides = [1, 1]} : vector<8x256xf32> to vector<8x128xf32>
    %565 = vector.extract_strided_slice %563 {offsets = [0, 128], sizes = [8, 128], strides = [1, 1]} : vector<8x256xf32> to vector<8x128xf32>
    %566 = arith.select %94, %564, %565 : vector<8x128xi1>, vector<8x128xf32>
    %567 = arith.addf %561, %566 : vector<8x128xf32>
    %568 = arith.negf %567 : vector<8x128xf32>
    %569 = math.exp %568 : vector<8x128xf32>
    %cst_218 = arith.constant 1.000000e+00 : f32
    %570 = vector.broadcast %cst_218 : f32 to vector<8x128xf32>
    %571 = arith.addf %570, %569 : vector<8x128xf32>
    %572 = arith.divf %570, %571 : vector<8x128xf32>
    %573 = vector.extract_strided_slice %572 {offsets = [0, 0], sizes = [8, 32], strides = [1, 1]} : vector<8x128xf32> to vector<8x32xf32>
    %574 = vector.extract_strided_slice %572 {offsets = [0, 32], sizes = [8, 32], strides = [1, 1]} : vector<8x128xf32> to vector<8x32xf32>
    %575 = vector.extract_strided_slice %572 {offsets = [0, 96], sizes = [8, 32], strides = [1, 1]} : vector<8x128xf32> to vector<8x32xf32>
    %576 = vector.extract_strided_slice %567 {offsets = [0, 64], sizes = [8, 32], strides = [1, 1]} : vector<8x128xf32> to vector<8x32xf32>
    %577 = math.tanh %576 : vector<8x32xf32>
    %578 = arith.mulf %574, %560 : vector<8x32xf32>
    %579 = arith.mulf %573, %577 : vector<8x32xf32>
    %580 = arith.addf %578, %579 : vector<8x32xf32>
    %581 = math.tanh %580 : vector<8x32xf32>
    %582 = arith.mulf %575, %581 : vector<8x32xf32>
    %cst_219 = arith.constant 0.000000e+00 : f32
    %583 = vector.broadcast %cst_219 : f32 to vector<8x32xf32>
    %584 = arith.cmpf ogt, %562, %583 : vector<8x32xf32>
    %585 = arith.select %584, %582, %559 : vector<8x32xi1>, vector<8x32xf32>
    %586 = vector.extract_strided_slice %585 {offsets = [4, 0], sizes = [4, 32], strides = [1, 1]} : vector<8x32xf32> to vector<4x32xf32>
    %587 = vector.extract_strided_slice %585 {offsets = [0, 0], sizes = [4, 32], strides = [1, 1]} : vector<8x32xf32> to vector<4x32xf32>
    %588 = tpu.concatenate %586, %587 in 0 : vector<4x32xf32>, vector<4x32xf32> -> vector<8x32xf32>
    %589 = tpu.concatenate %585, %588 in 1 : vector<8x32xf32>, vector<8x32xf32> -> vector<8x64xf32>
    %c0_220 = arith.constant 0 : index
    %c0_221 = arith.constant 0 : index
    %590 = vector.load %arg8[%c0_220, %c0_221] : memref<64x128xf32, #tpu.memory_space<vmem>>, vector<64x128xf32>
    %cst_222 = arith.constant dense<0.000000e+00> : vector<8x128xf32>
    %591 = tpu.matmul %589, %590, %cst_222 {dimension_numbers = #tpu.dot_dimension_numbers<[1], [0], [0], [1], [0, 0, 1, 1], [], []>} : vector<8x64xf32>, vector<64x128xf32>, vector<8x128xf32> -> vector<8x128xf32>
    %c0_223 = arith.constant 0 : index
    %c0_224 = arith.constant 0 : index
    %592 = vector.load %arg9[%c0_223, %c0_224] : memref<1x128xf32, #tpu.memory_space<vmem>>, vector<1x128xf32>
    %593 = vector.broadcast %592 : vector<1x128xf32> to vector<8x128xf32>
    %594 = arith.addf %591, %593 : vector<8x128xf32>
    %cst_225 = arith.constant 0.000000e+00 : f32
    %595 = vector.broadcast %cst_225 : f32 to vector<8x128xf32>
    %596 = arith.maximumf %594, %595 : vector<8x128xf32>
    %c0_226 = arith.constant 0 : index
    %c0_227 = arith.constant 0 : index
    %597 = vector.load %arg10[%c0_226, %c0_227] : memref<128x64xf32, #tpu.memory_space<vmem>>, vector<128x64xf32>
    %cst_228 = arith.constant dense<0.000000e+00> : vector<8x64xf32>
    %598 = tpu.matmul %596, %597, %cst_228 {dimension_numbers = #tpu.dot_dimension_numbers<[1], [0], [0], [1], [0, 0, 1, 1], [], []>} : vector<8x128xf32>, vector<128x64xf32>, vector<8x64xf32> -> vector<8x64xf32>
    %c0_229 = arith.constant 0 : index
    %c0_230 = arith.constant 0 : index
    %599 = vector.load %arg11[%c0_229, %c0_230] : memref<1x64xf32, #tpu.memory_space<vmem>>, vector<1x64xf32>
    %600 = vector.broadcast %599 : vector<1x64xf32> to vector<8x64xf32>
    %601 = arith.addf %598, %600 : vector<8x64xf32>
    %cst_231 = arith.constant 0.000000e+00 : f32
    %602 = vector.broadcast %cst_231 : f32 to vector<8x64xf32>
    %603 = arith.maximumf %601, %602 : vector<8x64xf32>
    %c0_232 = arith.constant 0 : index
    %c0_233 = arith.constant 0 : index
    %604 = vector.load %arg12[%c0_232, %c0_233] : memref<64x128xf32, #tpu.memory_space<vmem>>, vector<64x128xf32>
    %cst_234 = arith.constant dense<0.000000e+00> : vector<8x128xf32>
    %605 = tpu.matmul %603, %604, %cst_234 {dimension_numbers = #tpu.dot_dimension_numbers<[1], [0], [0], [1], [0, 0, 1, 1], [], []>} : vector<8x64xf32>, vector<64x128xf32>, vector<8x128xf32> -> vector<8x128xf32>
    %c0_235 = arith.constant 0 : index
    %c0_236 = arith.constant 0 : index
    %606 = vector.load %arg13[%c0_235, %c0_236] : memref<1x128xf32, #tpu.memory_space<vmem>>, vector<1x128xf32>
    %607 = vector.broadcast %606 : vector<1x128xf32> to vector<8x128xf32>
    %608 = arith.addf %605, %607 : vector<8x128xf32>
    %c0_237 = arith.constant 0 : index
    %c0_238 = arith.constant 0 : index
    %609 = vector.load %arg14[%c0_237, %c0_238] : memref<8x128xf32, #tpu.memory_space<vmem>>, vector<8x128xf32>
    tpu.vector_store %arg14[%c0_237, %c0_238], %608 {strides = array<i32>} : memref<8x128xf32, #tpu.memory_space<vmem>>, vector<8x128xf32>,
    return
  }
}

</mosaic_0001>

<bundles_post_ra>
// kernel: tpu_custom_call.1
= control target key start
LH: loop header
LB: loop body
LE: loop exit
PB: predicated region body
PF: predicated region fallthrough
CT: control target
= control target key end

     0   :  { %19 = vsyncpa [#allocation7], 0  ;;  %s4261_s0 = inlined_call_operand.vmem [shape: f32[64,32], index: 0, kind: input, shape index: {}]   ;;  %s4262_s1 = inlined_call_operand.vmem [shape: s32[8,1], index: 1, kind: input, shape index: {}]   ;;  %s4263_s2 = inlined_call_operand.hbm [shape: f32[32,128], index: 2, kind: input, shape index: {}]   ;;  %s4264_s3 = inlined_call_operand.hbm [shape: f32[8,128], index: 3, kind: input, shape index: {}]   ;;  %s4265_s4 = inlined_call_operand.vmem [shape: f32[32,256], index: 4, kind: input, shape index: {}]   ;;  %s4266_s5 = inlined_call_operand.vmem [shape: f32[64,256], index: 5, kind: input, shape index: {}]   ;;  %s4267_s6 = inlined_call_operand.hbm [shape: f32[8,128], index: 6, kind: input, shape index: {}]   ;;  %s4268_s7 = inlined_call_operand.vmem [shape: f32[32,256], index: 7, kind: input, shape index: {}]   ;;  %s4269_s8 = inlined_call_operand.hbm [shape: f32[64,128], index: 8, kind: input, shape index: {}]   ;;  %s4270_s9 = inlined_call_operand.vmem [shape: f32[1,128], index: 9, kind: input, shape index: {}]   ;;  %s4271_s10 = inlined_call_operand.vmem [shape: f32[128,64], index: 10, kind: input, shape index: {}]   ;;  %s4272_s11 = inlined_call_operand.vmem [shape: f32[1,64], index: 11, kind: input, shape index: {}]   ;;  %s4273_s12 = inlined_call_operand.hbm [shape: f32[64,128], index: 12, kind: input, shape index: {}]   ;;  %s4274_s13 = inlined_call_operand.vmem [shape: f32[1,128], index: 13, kind: input, shape index: {}]   ;;  %s4275_s14 = inlined_call_operand.hbm [shape: f32[8,128], index: 14, kind: output, shape index: {}]  }
   0x1   :  { %20 = vsyncpa [#allocation10], 0 }
   0x2   :  { %21 = vsyncpa [#allocation13], 0 }
   0x3   :  { %22 = vsyncpa [#allocation8], 0  ;;  %s3418_s29 = smov [#allocation9]   ;;  %s3278_s17 = scalar_lea.hbm %s4264_s3, 128 }
   0x4   :  { %s45_s30 = sshll.u32 %s3418_s29, 4  ;;  %p3279_p0 = scmp.ne.s32.totalorder %s4264_s3, %s3278_s17  ;;  %s46_s30 = int_to_ptr.vmem [resolvable:$true] %s45_s30 }
   0x5   :  { %p3282_p1 = scmp.lt.u32.totalorder %s3278_s17, %s4264_s3 }
   0x7   :  { %p3284_p2 = pnand %p3282_p1, %p3279_p0 }
   0x9   :  { %3287 = shalt.err (!%p3284_p2)
}
   0xa   :  { %s3288_s22 = scalar_lea.vmem %s46_s30, 128  ;;  %p3293_p4 = scmp.lt.s32.totalorder %s46_s30, %s46_s30 }
   0xb   :  { %p3289_p3 = scmp.ne.s32.totalorder %s46_s30, %s3288_s22  ;;  %p3294_p5 = scmp.lt.s32.totalorder %s3288_s22, %s3288_s22 }
   0xd   :  { %p3295_p6 = por %p3294_p5, %p3293_p4 }
   0xf   :  { %p3296_p7 = pnand %p3295_p6, %p3289_p3 }
  0x11   :  { %3299 = shalt.err (!%p3296_p7)
}
  0x12   :  { %48 = dma.hbm_to_vmem [thread:$0]  %s4264_s3, 128, %s46_s30, [#allocation10]  }
  0x13   :  { %s3419_s25 = smov [#allocation12]   ;;  %s3420_s27 = smov [#allocation6]  }
  0x14   :  { %s70_s26 = sshll.u32 %s3419_s25, 4  ;;  %s32_s28 = sshll.u32 %s3420_s27, 4  ;;  %s71_s26 = int_to_ptr.vmem [resolvable:$true] %s70_s26  ;;  %s33_s28 = int_to_ptr.vmem [resolvable:$true] %s32_s28 }
  0x15   :  { %s3300_s16 = scalar_lea.hbm %s4269_s8, 1024 }
  0x16   :  { %p3301_p8 = scmp.ne.s32.totalorder %s4269_s8, %s3300_s16  ;;  %p3304_p9 = scmp.lt.u32.totalorder %s3300_s16, %s4269_s8 }
  0x18   :  { %p3306_p10 = pnand %p3304_p9, %p3301_p8 }
  0x1a   :  { %3309 = shalt.err (!%p3306_p10)
}
  0x1b   :  { %s3310_s3 = scalar_lea.vmem %s71_s26, 1024  ;;  %p3315_p12 = scmp.lt.s32.totalorder %s71_s26, %s71_s26 }
  0x1c   :  { %p3311_p11 = scmp.ne.s32.totalorder %s71_s26, %s3310_s3  ;;  %p3316_p13 = scmp.lt.s32.totalorder %s3310_s3, %s3310_s3 }
  0x1e   :  { %p3317_p0 = por %p3316_p13, %p3315_p12 }
  0x20   :  { %p3318_p1 = pnand %p3317_p0, %p3311_p11 }
  0x22   :  { %3321 = shalt.err (!%p3318_p1)
}
  0x23   :  { %s3421_s30 = smov 128   ;;  %s3422_s21 = smov 8  }
  0x24   :  { %76 = dma.hbm_to_vmem [thread:$0]  %s4269_s8, 1024, %s71_s26, [#allocation13], %s3421_s30, %s3421_s30, %s3422_s21  }
  0x25   :  { %s3322_s27 = scalar_lea.hbm %s4263_s2, 512 }
  0x26   :  { %p3323_p2 = scmp.ne.s32.totalorder %s4263_s2, %s3322_s27  ;;  %p3326_p3 = scmp.lt.u32.totalorder %s3322_s27, %s4263_s2 }
  0x28   :  { %p3328_p4 = pnand %p3326_p3, %p3323_p2 }
  0x2a   :  { %3331 = shalt.err (!%p3328_p4)
}
  0x2b   :  { %s3332_s18 = scalar_lea.vmem %s33_s28, 512  ;;  %p3337_p6 = scmp.lt.s32.totalorder %s33_s28, %s33_s28 }
  0x2c   :  { %p3333_p5 = scmp.ne.s32.totalorder %s33_s28, %s3332_s18  ;;  %p3338_p7 = scmp.lt.s32.totalorder %s3332_s18, %s3332_s18 }
  0x2e   :  { %p3339_p8 = por %p3338_p7, %p3337_p6 }
  0x30   :  { %p3340_p9 = pnand %p3339_p8, %p3333_p5 }
  0x32   :  { %3343 = shalt.err (!%p3340_p9)
}
  0x33   :  { %38 = dma.hbm_to_vmem [thread:$0]  %s4263_s2, 512, %s33_s28, [#allocation7], %s3421_s30, %s3421_s30, %s3422_s21  }
  0x34   :  { %s3423_s19 = smov [#allocation11]   ;;  %s3424_s3 = smov [#allocation14]  }
  0x35   :  { %s59_s20 = sshll.u32 %s3423_s19, 4  ;;  %s88_s22 = sshll.u32 %s3424_s3, 4  ;;  %s60_s20 = int_to_ptr.vmem [resolvable:$true] %s59_s20  ;;  %s89_s22 = int_to_ptr.vmem [resolvable:$true] %s88_s22 }
  0x36   :  { %s3344_s25 = scalar_lea.hbm %s4267_s6, 128 }
  0x37   :  { %p3345_p10 = scmp.ne.s32.totalorder %s4267_s6, %s3344_s25  ;;  %p3348_p11 = scmp.lt.u32.totalorder %s3344_s25, %s4267_s6 }
  0x39   :  { %p3350_p12 = pnand %p3348_p11, %p3345_p10 }
  0x3b   :  { %3353 = shalt.err (!%p3350_p12)
}
  0x3c   :  { %s3354_s2 = scalar_lea.vmem %s60_s20, 128  ;;  %p3359_p0 = scmp.lt.s32.totalorder %s60_s20, %s60_s20 }
  0x3d   :  { %p3355_p13 = scmp.ne.s32.totalorder %s60_s20, %s3354_s2  ;;  %p3360_p1 = scmp.lt.s32.totalorder %s3354_s2, %s3354_s2 }
  0x3f   :  { %p3361_p2 = por %p3360_p1, %p3359_p0 }
  0x41   :  { %p3362_p3 = pnand %p3361_p2, %p3355_p13 }
  0x43   :  { %3365 = shalt.err (!%p3362_p3)
}
  0x44   :  { %62 = dma.hbm_to_vmem [thread:$0]  %s4267_s6, 128, %s60_s20, [#allocation10]  }
  0x45   :  { %s3366_s26 = scalar_lea.hbm %s4273_s12, 1024 }
  0x46   :  { %p3367_p4 = scmp.ne.s32.totalorder %s4273_s12, %s3366_s26  ;;  %p3370_p5 = scmp.lt.u32.totalorder %s3366_s26, %s4273_s12 }
  0x48   :  { %p3372_p6 = pnand %p3370_p5, %p3367_p4 }
  0x4a   :  { %3375 = shalt.err (!%p3372_p6)
}
  0x4b   :  { %s3376_s25 = scalar_lea.vmem %s89_s22, 1024  ;;  %p3381_p8 = scmp.lt.s32.totalorder %s89_s22, %s89_s22 }
  0x4c   :  { %p3377_p7 = scmp.ne.s32.totalorder %s89_s22, %s3376_s25  ;;  %p3382_p9 = scmp.lt.s32.totalorder %s3376_s25, %s3376_s25 }
  0x4e   :  { %p3383_p10 = por %p3382_p9, %p3381_p8 }
  0x50   :  { %p3384_p11 = pnand %p3383_p10, %p3377_p7 }
  0x52   :  { %3387 = shalt.err (!%p3384_p11)
}
  0x53   :  { %94 = dma.hbm_to_vmem [thread:$0]  %s4273_s12, 1024, %s89_s22, [#allocation13], %s3421_s30, %s3421_s30, %s3422_s21  }
  0x54   :  { %3410 = dma.done.wait [#allocation7], 512  }
  0x55   :  { %3411 = vsyncadd [#allocation7], 4294966784 }
  0x56   :  { %3412 = dma.done.wait [#allocation10], 256  }
  0x57   :  { %3413 = vsyncadd [#allocation10], 4294967040 }
  0x58   :  { %3414 = dma.done.wait [#allocation13], 2048  }
  0x59   :  { %3415 = vsyncadd [#allocation13], 4294965248  ;;  %v3425_v0 = vmov 0.0   ;;  %v168_v1 = vld [vmem:[#allocation6] sm:$0xff]  ;;  %v169_v2 = vld [vmem:[#allocation6 + $0x8] sm:$0xff]  ;;  %vm123_vm0 = vcmask 261120   ;;  %v116_v21 = vlaneseq }
  0x5a   :  { %403 = vmatprep.mubr.f32.mxu1 %v3425_v0  ;;  %v319_v3 = vld [vmem:[%s4265_s4 + $0x8] sm:$0xff]  ;;  %v2926_v4 = vpack.c.bf16 %v169_v2, %v168_v1  ;;  %v321_v5 = vld [vmem:[%s4265_s4 + $0x18] sm:$0xff]  ;;  %v318_v6 = vld [vmem:[%s4265_s4] sm:$0xff]  ;;  %s3426_s6 = smov 64   ;;  %s3427_s20 = smov 32   ;;  %v3428_v38 = vmov 0  }
  0x5b   :  { %v320_v7 = vld [vmem:[%s4265_s4 + $0x10] sm:$0xff]  ;;  %v3597_v8 = vpack.c.bf16 %v321_v5, %v319_v3  ;;  %v171_v11 = vld [vmem:[#allocation6 + $0x18] sm:$0xff]  ;;  %v323_v12 = vld [vmem:[%s4265_s4 + $0x28] sm:$0xff]  ;;  %v3641_v22 = vshrl.u32 %v116_v21, 7  ;;  %3148 = vset.pattern.permute.xlu1 %v3428_v38  ;;  %3149 = vset.pattern.permute.xlu0 %v3428_v38  ;;  %s3429_s15 = smov 96   ;;  %v3430_v46 = vmov 7  }
  0x5c   :  { %v3599_v9 = vpack.c.bf16 %v320_v7, %v318_v6  ;;  %v170_v10 = vld [vmem:[#allocation6 + $0x10] sm:$0xff]  ;;  %2927 = vmatprep.subr.bf16.mxu0 %v2926_v4  ;;  %v325_v14 = vld [vmem:[%s4265_s4 + $0x38] sm:$0xff]  ;;  %v322_v15 = vld [vmem:[%s4265_s4 + $0x20] sm:$0xff]  ;;  %v3431_v48 = vmov 6   ;;  %v3432_v50 = vmov 5   ;;  %v3433_v52 = vmov 4  }
  0x5d   :  { %v2930_v13 = vpack.c.bf16 %v171_v11, %v170_v10  ;;  %v324_v16 = vld [vmem:[%s4265_s4 + $0x30] sm:$0xff]  ;;  %2935 = vmatprep.subr.bf16.mxu1 %v3597_v8  ;;  %2929 = vmatpush3.bf16.msra.mxu0 %v2926_v4  ;;  %v3614_v17 = vpack.c.bf16 %v325_v14, %v323_v12  ;;  %v160_v18 = vld [vmem:[%s4261_s0] sm:$0xff]  ;;  %v161_v20 = vld [vmem:[%s4261_s0 + $0x8] sm:$0xff]  ;;  %vm118_vm1 = vcmp.lt.s32.totalorder %v3641_v22, 4  ;;  %v3434_v55 = vmov 3   ;;  %s3439_s30 = smov [#allocation15]  }
  0x5e   :  { %2937 = vmatpush1.bf16.msra.mxu1 %v3599_v9  ;;  %v3620_v19 = vpack.c.bf16 %v324_v16, %v322_v15  ;;  %2841 = vmatprep.mubr.msk.f32.mxu0 %vm123_vm0, %v160_v18  ;;  %v3643_v23 = vld [vmem:[#allocation9] sm:$0xff]  ;;  %v119_v47 = vsel %vm118_vm1, 0, %v3430_v46  ;;  %v125_v49 = vsel %vm118_vm1, 1, %v3431_v48  ;;  %v130_v51 = vsel %vm118_vm1, 2, %v3432_v50 }
  0x5f   :  { %2931 = vmatprep.subr.bf16.mxu0 %v2930_v13  ;;  %2939 = vmatprep.subr.bf16.mxu1 %v3614_v17  ;;  %v112_v43 = vld [vmem:[%s4262_s1] sm:$0xff]  ;;  %v135_v53 = vsel %vm118_vm1, 3, %v3433_v52  ;;  %v155_v54 = vsel %vm118_vm1, 7, %v3428_v38  ;;  %v140_v56 = vsel %vm118_vm1, 4, %v3434_v55  ;;  %v3435_v57 = vmov 2   ;;  %v166_v38 = vld [vmem:[%s4261_s0 + $0x30] sm:$0xff] }
  0x60   :  { %v145_v58 = vsel %vm118_vm1, 5, %v3435_v57  ;;  %v3436_v59 = vmov 1  }
  0x61   :  { %2933 = vmatpush3.bf16.msra.mxu0 %v2930_v13  ;;  %v150_v60 = vsel %vm118_vm1, 6, %v3436_v59 }
  0x62   :  { %2941 = vmatpush1.bf16.msra.mxu1 %v3620_v19  ;;  %2951 = vmatprep.subr.bf16.mxu0 %v3597_v8 }
  0x63   :  { %2943 = vmatprep.subr.bf16.mxu1 %v3597_v8 }
  0x64   :  { %2842 = vmatmul.mubr.msk.f32.vlgmr.msra.gmra.mrb[0].mxu0 %vm123_vm0, %v161_v20 }
  0x65   :  { %404 = vmatmul.mubr.f32.vlgmr.msra.gmra.mrb[0].mxu1 %v3425_v0  ;;  %2953 = vmatpush1.bf16.msra.mxu0 %v3599_v9 }
  0x66   :  { %2945 = vmatpush1.bf16.msra.mxu1 %v3599_v9  ;;  %517 = vmatprep.mubr.f32.mxu1 %v3425_v0 }
  0x67   :  { %2947 = vmatprep.subr.bf16.mxu1 %v3614_v17  ;;  %2955 = vmatprep.subr.bf16.mxu0 %v3614_v17 }
  0x69   :  { %2957 = vmatpush1.bf16.msra.mxu0 %v3620_v19 }
  0x6a   :  { %2949 = vmatpush1.bf16.msra.mxu1 %v3620_v19  ;;  %2967 = vmatprep.subr.bf16.mxu0 %v3597_v8 }
  0x6b   :  { %2959 = vmatprep.subr.bf16.mxu1 %v3597_v8 }
 0x137   :  { %v3645_v24 = vpop.f32.mrb[0].mxu0 }
 0x138   :  { %v405_v25 = vpop.f32.mrb[0].mxu1  ;;  %v262_v26 = vpop.f32.mrb[1].mxu0  ;;  %v304_v15 = vadd.f32 %v3645_v24, %v3643_v23 }
 0x139   :  { %v302_v27 = vadd.f32 %v3643_v23, %v262_v26  ;;  %v407_v28 = vpop.f32.mrb[1].mxu1 }
 0x13a   :  { %v410_v29 = vsel %vm118_vm1, %v405_v25, %v407_v28 }
 0x13b   :  { %v411_v30 = vadd.f32 %v410_v29, %v302_v27 }
 0x13d   :  { %3150 = vtanh.f32 %v411_v30  ;;  %v2747_v32 = vmul.f32 -1.442695, %v411_v30 }
 0x13f   :  { %3152 = vpow2.f32 %v2747_v32 }
 0x147   :  { %v3151_v31 = vpop.eup %3150 }
 0x148   :  { %421 = vrot.lane.b32.xlu0 %v3151_v31, %s3426_s6 }
 0x149   :  { %v3153_v33 = vpop.eup %3152 }
 0x14a   :  { %v415_v34 = vadd.f32 1.0, %v3153_v33 }
 0x14c   :  { %3154 = vrcp.f32 %v415_v34  ;;  %v162_v34 = vld [vmem:[%s4261_s0 + $0x10] sm:$0xff] }
 0x14d   :  { %2844 = vmatprep.mubr.msk.f32.mxu0 %vm123_vm0, %v162_v34 }
 0x156   :  { %v3155_v35 = vpop.eup %3154 }
 0x157   :  { %v419_v39 = vmul.f32 0.0, %v3155_v35 }
 0x1ba   :  { %v422_v36 = vpop.permute.xlu0 %421 }
 0x1bb   :  { %v424_v37 = vmul.f32 %v3155_v35, %v422_v36  ;;  %v164_v36 = vld [vmem:[%s4261_s0 + $0x20] sm:$0xff] }
 0x1bd   :  { %426 = vrot.lane.b32.xlu0 %v424_v37, %s3427_s20  ;;  %v165_v37 = vld [vmem:[%s4261_s0 + $0x28] sm:$0xff] }
 0x22f   :  { %v427_v40 = vpop.permute.xlu0 %426 }
 0x230   :  { %v429_v41 = vadd.f32 %v427_v40, %v419_v39  ;;  %v167_v40 = vld [vmem:[%s4261_s0 + $0x38] sm:$0xff] }
 0x232   :  { %3156 = vtanh.f32 %v429_v41 }
 0x23c   :  { %v3157_v42 = vpop.eup %3156 }
 0x23d   :  { %432 = vrot.lane.b32.xlu1 %v3157_v42, %s3426_s6 }
 0x241   :  { %114 = vperm.xlu1 %3148, %v112_v43  }
 0x245   :  { %443 = vrot.lane.b32.xlu1 %v429_v41, %s3429_s15 }
 0x2af   :  { %v433_v44 = vpop.permute.xlu1 %432 }
 0x2b0   :  { %v435_v45 = vmul.f32 %v3155_v35, %v433_v44  ;;  %v163_v35 = vld [vmem:[%s4261_s0 + $0x18] sm:$0xff] }
 0x2b1   :  { %2845 = vmatmul.mubr.msk.f32.gmra.mrb[2].mxu0 %vm123_vm0, %v163_v35 }
 0x2b2   :  { %438 = vrot.lane.b32.xlu0 %v435_v45, %s3427_s20  ;;  %2847 = vmatprep.mubr.msk.f32.mxu0 %vm123_vm0, %v164_v36 }
 0x2b5   :  { %2848 = vmatmul.mubr.msk.f32.gmra.mrb[4].mxu0 %vm123_vm0, %v165_v37 }
 0x2b6   :  { %2850 = vmatprep.mubr.msk.f32.mxu0 %vm123_vm0, %v166_v38 }
 0x2b9   :  { %2851 = vmatmul.mubr.msk.f32.gmra.mrb[6].mxu0 %vm123_vm0, %v167_v40 }
 0x2ba   :  { %635 = vmatprep.mubr.f32.mxu0 %v3425_v0 }
 0x2c0   :  { %v115_v61 = vpop.permute.xlu1 %114 }
 0x2c1   :  { %vm120_vm2 = vcmp.lt.s32.totalorder %v119_v47, %v115_v61  ;;  %vm126_vm3 = vcmp.lt.s32.totalorder %v125_v49, %v115_v61  ;;  %vm131_vm4 = vcmp.lt.s32.totalorder %v130_v51, %v115_v61  ;;  %vm136_vm5 = vcmp.lt.s32.totalorder %v135_v53, %v115_v61 }
 0x2c2   :  { %v2731_v62 = vsel %vm120_vm2, 1.0, %v3425_v0  ;;  %v2732_v63 = vsel %vm126_vm3, 1.0, %v3425_v0  ;;  %v2733_v1 = vsel %vm131_vm4, 1.0, %v3425_v0  ;;  %v2734_v2 = vsel %vm136_vm5, 1.0, %v3425_v0 }
 0x2c3   :  { %124 = vst.msk [vmem:[#allocation5] sm:$0xff] %vm123_vm0, %v2731_v62  ;;  %129 = vst.msk [vmem:[#allocation5 + $0x8] sm:$0xff] %vm123_vm0, %v2732_v63  ;;  %vm141_vm6 = vcmp.lt.s32.totalorder %v140_v56, %v115_v61  ;;  %vm146_vm7 = vcmp.lt.s32.totalorder %v145_v58, %v115_v61  ;;  %vm151_vm8 = vcmp.lt.s32.totalorder %v150_v60, %v115_v61  ;;  %vm1337_vm4 = vcmask 1043456  }
 0x2c4   :  { %134 = vst.msk [vmem:[#allocation5 + $0x10] sm:$0xff] %vm123_vm0, %v2733_v1  ;;  %139 = vst.msk [vmem:[#allocation5 + $0x18] sm:$0xff] %vm123_vm0, %v2734_v2  ;;  %vm156_vm9 = vcmp.lt.s32.totalorder %v155_v54, %v115_v61  ;;  %v2735_v3 = vsel %vm141_vm6, 1.0, %v3425_v0  ;;  %v2736_v4 = vsel %vm146_vm7, 1.0, %v3425_v0  ;;  %v2737_v5 = vsel %vm151_vm8, 1.0, %v3425_v0  ;;  %v444_v10 = vpop.permute.xlu1 %443 }
 0x2c5   :  { %v2738_v6 = vsel %vm156_vm9, 1.0, %v3425_v0  ;;  %144 = vst.msk [vmem:[#allocation5 + $0x20] sm:$0xff] %vm123_vm0, %v2735_v3  ;;  %149 = vst.msk [vmem:[#allocation5 + $0x28] sm:$0xff] %vm123_vm0, %v2736_v4  ;;  %vm1358_vm5 = vcmask 523264  }
 0x2c6   :  { %154 = vst.msk [vmem:[#allocation5 + $0x30] sm:$0xff] %vm123_vm0, %v2737_v5  ;;  %159 = vst.msk [vmem:[#allocation5 + $0x38] sm:$0xff] %vm123_vm0, %v2738_v6 }
 0x2ca   :  { %v3691_v7 = vld [vmem:[#allocation5] sm:$0xff]  ;;  %v3739_v43 = vld [vmem:[#allocation5 + $0x8] sm:$0xff] }
 0x2cb   :  { %vm436_vm10 = vcmp.gt.f32.partialorder %v3691_v7, 0.0  ;;  %vm554_vm11 = vcmp.gt.f32.partialorder %v3739_v43, 0.0  ;;  %v3793_v40 = vld [vmem:[#allocation5 + $0x18] sm:$0xff] }
 0x2cc   :  { %v446_v11 = vsel %vm436_vm10, %v444_v10, 0.0  ;;  %vm790_vm13 = vcmp.gt.f32.partialorder %v3793_v40, 0.0 }
 0x2cd   :  { %534 = vrot.lane.b32.xlu1 %v446_v11, %s3427_s20 }
 0x324   :  { %v439_v12 = vpop.permute.xlu0 %438 }
 0x325   :  { %v441_v13 = vsel %vm436_vm10, %v439_v12, 0.0 }
 0x326   :  { %447 = vst.msk [vmem:[#allocation4] sm:$0xff] %vm123_vm0, %v441_v13  ;;  %2748 = vmatmul.mubr.msk.f32.vlgmr.msra.gmra.mrb[2].mxu1 %vm123_vm0, %v441_v13 }
 0x327   :  { %2961 = vmatpush1.bf16.msra.mxu1 %v3599_v9  ;;  %753 = vmatprep.mubr.f32.mxu1 %v3425_v0 }
 0x328   :  { %2963 = vmatprep.subr.bf16.mxu1 %v3614_v17 }
 0x32b   :  { %2965 = vmatpush1.bf16.msra.mxu1 %v3620_v19 }
 0x32c   :  { %2975 = vmatprep.subr.bf16.mxu1 %v3597_v8 }
 0x33f   :  { %v535_v24 = vpop.permute.xlu1 %534 }
 0x384   :  { %v2846_v46 = vpop.f32.mrb[2].mxu0 }
 0x385   :  { %v272_v47 = vpop.f32.mrb[3].mxu0 }
 0x386   :  { %v306_v55 = vadd.f32 %v3643_v23, %v272_v47 }
 0x388   :  { %v3746_v48 = vpop.f32.mrb[4].mxu0 }
 0x389   :  { %v3748_v49 = vpop.f32.mrb[5].mxu0 }
 0x38a   :  { %v310_v47 = vadd.f32 %v3643_v23, %v3748_v49 }
 0x38c   :  { %v3750_v50 = vpop.f32.mrb[6].mxu0 }
 0x38d   :  { %v3752_v51 = vpop.f32.mrb[7].mxu0 }
 0x3f9   :  { %v519_v14 = vpop.f32.mrb[2].mxu1 }
 0x3fa   :  { %v521_v16 = vpop.f32.mrb[3].mxu1 }
 0x3fb   :  { %v524_v18 = vsel %vm118_vm1, %v519_v14, %v521_v16 }
 0x3fc   :  { %v525_v20 = vadd.f32 %v524_v18, %v304_v15 }
 0x3fe   :  { %3158 = vtanh.f32 %v525_v20  ;;  %v2749_v25 = vmul.f32 -1.442695, %v525_v20 }
 0x400   :  { %3160 = vpow2.f32 %v2749_v25 }
 0x408   :  { %v3159_v21 = vpop.eup %3158 }
 0x409   :  { %539 = vrot.lane.b32.xlu0 %v3159_v21, %s3426_s6  ;;  %v308_v21 = vadd.f32 %v2846_v46, %v3643_v23 }
 0x40a   :  { %v3161_v26 = vpop.eup %3160 }
 0x40b   :  { %v529_v27 = vadd.f32 1.0, %v3161_v26 }
 0x40d   :  { %3162 = vrcp.f32 %v529_v27 }
 0x417   :  { %v3163_v28 = vpop.eup %3162 }
 0x418   :  { %v537_v31 = vmul.f32 %v3163_v28, %v535_v24 }
 0x47b   :  { %v540_v29 = vpop.permute.xlu0 %539 }
 0x47c   :  { %v542_v30 = vmul.f32 %v3163_v28, %v540_v29 }
 0x47e   :  { %544 = vrot.lane.b32.xlu0 %v542_v30, %s3427_s20 }
 0x4f0   :  { %v545_v32 = vpop.permute.xlu0 %544 }
 0x4f1   :  { %v547_v33 = vadd.f32 %v545_v32, %v537_v31 }
 0x4f3   :  { %3164 = vtanh.f32 %v547_v33 }
 0x4fd   :  { %v3165_v39 = vpop.eup %3164 }
 0x4fe   :  { %550 = vrot.lane.b32.xlu1 %v3165_v39, %s3426_s6 }
 0x502   :  { %561 = vrot.lane.b32.xlu1 %v547_v33, %s3429_s15 }
 0x570   :  { %v551_v41 = vpop.permute.xlu1 %550 }
 0x571   :  { %v553_v42 = vmul.f32 %v3163_v28, %v551_v41 }
 0x573   :  { %556 = vrot.lane.b32.xlu0 %v553_v42, %s3427_s20 }
 0x574   :  { %v562_v44 = vpop.permute.xlu1 %561 }
 0x575   :  { %v564_v45 = vsel %vm554_vm11, %v562_v44, %v446_v11 }
 0x576   :  { %652 = vrot.lane.b32.xlu1 %v564_v45, %s3427_s20 }
 0x5e5   :  { %v557_v52 = vpop.permute.xlu0 %556 }
 0x5e6   :  { %v559_v53 = vsel %vm554_vm11, %v557_v52, %v441_v13  ;;  %v3770_v13 = vld [vmem:[#allocation5 + $0x10] sm:$0xff] }
 0x5e7   :  { %565 = vst.msk [vmem:[#allocation4 + $0x8] sm:$0xff] %vm123_vm0, %v559_v53  ;;  %2750 = vmatmul.mubr.msk.f32.vlgmr.msra.gmra.mrb[8].mxu0 %vm123_vm0, %v559_v53  ;;  %vm672_vm12 = vcmp.gt.f32.partialorder %v3770_v13, 0.0 }
 0x5e8   :  { %2969 = vmatpush1.bf16.msra.mxu0 %v3599_v9  ;;  %871 = vmatprep.mubr.f32.mxu0 %v3425_v0  ;;  %v653_v3 = vpop.permute.xlu1 %652 }
 0x5e9   :  { %2971 = vmatprep.subr.bf16.mxu0 %v3614_v17 }
 0x5ec   :  { %2973 = vmatpush1.bf16.msra.mxu0 %v3620_v19 }
 0x5ed   :  { %2983 = vmatprep.subr.bf16.mxu0 %v3597_v8 }
 0x6ba   :  { %v637_v54 = vpop.f32.mrb[8].mxu0 }
 0x6bb   :  { %v639_v56 = vpop.f32.mrb[9].mxu0 }
 0x6bc   :  { %v642_v57 = vsel %vm118_vm1, %v637_v54, %v639_v56 }
 0x6bd   :  { %v643_v58 = vadd.f32 %v642_v57, %v306_v55 }
 0x6bf   :  { %3166 = vtanh.f32 %v643_v58  ;;  %v2751_v60 = vmul.f32 -1.442695, %v643_v58 }
 0x6c1   :  { %3168 = vpow2.f32 %v2751_v60 }
 0x6c9   :  { %v3167_v59 = vpop.eup %3166 }
 0x6ca   :  { %657 = vrot.lane.b32.xlu0 %v3167_v59, %s3426_s6 }
 0x6cb   :  { %v3169_v61 = vpop.eup %3168 }
 0x6cc   :  { %v647_v62 = vadd.f32 1.0, %v3169_v61 }
 0x6ce   :  { %3170 = vrcp.f32 %v647_v62 }
 0x6d8   :  { %v3171_v63 = vpop.eup %3170 }
 0x6d9   :  { %v655_v4 = vmul.f32 %v3171_v63, %v653_v3 }
 0x73c   :  { %v658_v1 = vpop.permute.xlu0 %657 }
 0x73d   :  { %v660_v2 = vmul.f32 %v3171_v63, %v658_v1 }
 0x73f   :  { %662 = vrot.lane.b32.xlu0 %v660_v2, %s3427_s20 }
 0x7b1   :  { %v663_v5 = vpop.permute.xlu0 %662 }
 0x7b2   :  { %v665_v6 = vadd.f32 %v663_v5, %v655_v4  ;;  %v3816_v5 = vld [vmem:[#allocation5 + $0x20] sm:$0xff] }
 0x7b3   :  { %vm908_vm14 = vcmp.gt.f32.partialorder %v3816_v5, 0.0 }
 0x7b4   :  { %3172 = vtanh.f32 %v665_v6 }
 0x7be   :  { %v3173_v10 = vpop.eup %3172 }
 0x7bf   :  { %668 = vrot.lane.b32.xlu1 %v3173_v10, %s3426_s6 }
 0x7c3   :  { %679 = vrot.lane.b32.xlu1 %v665_v6, %s3429_s15 }
 0x831   :  { %v669_v11 = vpop.permute.xlu1 %668 }
 0x832   :  { %v671_v12 = vmul.f32 %v3171_v63, %v669_v11 }
 0x834   :  { %674 = vrot.lane.b32.xlu0 %v671_v12, %s3427_s20 }
 0x835   :  { %v680_v14 = vpop.permute.xlu1 %679 }
 0x836   :  { %v682_v15 = vsel %vm672_vm12, %v680_v14, %v564_v45 }
 0x837   :  { %770 = vrot.lane.b32.xlu1 %v682_v15, %s3427_s20 }
 0x8a6   :  { %v675_v16 = vpop.permute.xlu0 %674 }
 0x8a7   :  { %v677_v18 = vsel %vm672_vm12, %v675_v16, %v559_v53 }
 0x8a8   :  { %683 = vst.msk [vmem:[#allocation4 + $0x10] sm:$0xff] %vm123_vm0, %v677_v18  ;;  %2752 = vmatmul.mubr.msk.f32.vlgmr.msra.gmra.mrb[4].mxu1 %vm123_vm0, %v677_v18 }
 0x8a9   :  { %2977 = vmatpush1.bf16.msra.mxu1 %v3599_v9  ;;  %989 = vmatprep.mubr.f32.mxu1 %v3425_v0  ;;  %v771_v33 = vpop.permute.xlu1 %770 }
 0x8aa   :  { %2979 = vmatprep.subr.bf16.mxu1 %v3614_v17 }
 0x8ad   :  { %2981 = vmatpush1.bf16.msra.mxu1 %v3620_v19 }
 0x8ae   :  { %2991 = vmatprep.subr.bf16.mxu1 %v3597_v8 }
 0x97b   :  { %v755_v20 = vpop.f32.mrb[4].mxu1 }
 0x97c   :  { %v757_v25 = vpop.f32.mrb[5].mxu1 }
 0x97d   :  { %v760_v26 = vsel %vm118_vm1, %v755_v20, %v757_v25 }
 0x97e   :  { %v761_v27 = vadd.f32 %v760_v26, %v308_v21 }
 0x980   :  { %3174 = vtanh.f32 %v761_v27  ;;  %v2753_v29 = vmul.f32 -1.442695, %v761_v27 }
 0x982   :  { %3176 = vpow2.f32 %v2753_v29 }
 0x98a   :  { %v3175_v28 = vpop.eup %3174 }
 0x98b   :  { %775 = vrot.lane.b32.xlu0 %v3175_v28, %s3426_s6 }
 0x98c   :  { %v3177_v30 = vpop.eup %3176 }
 0x98d   :  { %v765_v24 = vadd.f32 1.0, %v3177_v30 }
 0x98f   :  { %3178 = vrcp.f32 %v765_v24 }
 0x999   :  { %v3179_v31 = vpop.eup %3178 }
 0x99a   :  { %v773_v34 = vmul.f32 %v3179_v31, %v771_v33 }
 0x9fd   :  { %v776_v32 = vpop.permute.xlu0 %775 }
 0x9fe   :  { %v778_v8 = vmul.f32 %v3179_v31, %v776_v32 }
 0xa00   :  { %780 = vrot.lane.b32.xlu0 %v778_v8, %s3427_s20  ;;  %v3839_v8 = vld [vmem:[#allocation5 + $0x28] sm:$0xff] }
 0xa01   :  { %vm1026_vm15 = vcmp.gt.f32.partialorder %v3839_v8, 0.0 }
 0xa72   :  { %v781_v35 = vpop.permute.xlu0 %780 }
 0xa73   :  { %v783_v36 = vadd.f32 %v781_v35, %v773_v34 }
 0xa75   :  { %3180 = vtanh.f32 %v783_v36 }
 0xa7f   :  { %v3181_v37 = vpop.eup %3180 }
 0xa80   :  { %786 = vrot.lane.b32.xlu1 %v3181_v37, %s3426_s6 }
 0xa84   :  { %797 = vrot.lane.b32.xlu1 %v783_v36, %s3429_s15 }
 0xaf2   :  { %v787_v38 = vpop.permute.xlu1 %786 }
 0xaf3   :  { %v789_v39 = vmul.f32 %v3179_v31, %v787_v38  ;;  %v314_v38 = vadd.f32 %v3643_v23, %v3752_v51 }
 0xaf5   :  { %792 = vrot.lane.b32.xlu0 %v789_v39, %s3427_s20 }
 0xaf6   :  { %v798_v41 = vpop.permute.xlu1 %797 }
 0xaf7   :  { %v800_v42 = vsel %vm790_vm13, %v798_v41, %v682_v15  ;;  %v312_v15 = vadd.f32 %v3746_v48, %v3643_v23 }
 0xaf8   :  { %888 = vrot.lane.b32.xlu1 %v800_v42, %s3427_s20 }
 0xb67   :  { %v793_v44 = vpop.permute.xlu0 %792 }
 0xb68   :  { %v795_v45 = vsel %vm790_vm13, %v793_v44, %v677_v18 }
 0xb69   :  { %801 = vst.msk [vmem:[#allocation4 + $0x18] sm:$0xff] %vm123_vm0, %v795_v45  ;;  %2754 = vmatmul.mubr.msk.f32.vlgmr.msra.gmra.mrb[10].mxu0 %vm123_vm0, %v795_v45 }
 0xb6a   :  { %2985 = vmatpush1.bf16.msra.mxu0 %v3599_v9  ;;  %1107 = vmatprep.mubr.f32.mxu0 %v3425_v0  ;;  %v889_v49 = vpop.permute.xlu1 %888 }
 0xb6b   :  { %2987 = vmatprep.subr.bf16.mxu0 %v3614_v17 }
 0xb6e   :  { %2989 = vmatpush1.bf16.msra.mxu0 %v3620_v19 }
 0xc3c   :  { %v873_v46 = vpop.f32.mrb[10].mxu0 }
 0xc3d   :  { %v875_v52 = vpop.f32.mrb[11].mxu0 }
 0xc3e   :  { %v878_v53 = vsel %vm118_vm1, %v873_v46, %v875_v52 }
 0xc3f   :  { %v879_v54 = vadd.f32 %v878_v53, %v310_v47 }
 0xc41   :  { %3182 = vtanh.f32 %v879_v54  ;;  %v2755_v56 = vmul.f32 -1.442695, %v879_v54 }
 0xc43   :  { %3184 = vpow2.f32 %v2755_v56 }
 0xc4b   :  { %v3183_v55 = vpop.eup %3182 }
 0xc4c   :  { %893 = vrot.lane.b32.xlu0 %v3183_v55, %s3426_s6 }
 0xc4d   :  { %v3185_v57 = vpop.eup %3184 }
 0xc4e   :  { %v883_v58 = vadd.f32 1.0, %v3185_v57 }
 0xc50   :  { %3186 = vrcp.f32 %v883_v58 }
 0xc5a   :  { %v3187_v59 = vpop.eup %3186 }
 0xc5b   :  { %v891_v62 = vmul.f32 %v3187_v59, %v889_v49 }
 0xcbe   :  { %v894_v60 = vpop.permute.xlu0 %893 }
 0xcbf   :  { %v896_v61 = vmul.f32 %v3187_v59, %v894_v60 }
 0xcc1   :  { %898 = vrot.lane.b32.xlu0 %v896_v61, %s3427_s20  ;;  %v3859_v61 = vld [vmem:[#allocation5 + $0x30] sm:$0xff] }
 0xcc2   :  { %vm1144_vm2 = vcmp.gt.f32.partialorder %v3859_v61, 0.0 }
 0xd33   :  { %v899_v63 = vpop.permute.xlu0 %898 }
 0xd34   :  { %v901_v1 = vadd.f32 %v899_v63, %v891_v62 }
 0xd36   :  { %3188 = vtanh.f32 %v901_v1 }
 0xd40   :  { %v3189_v2 = vpop.eup %3188 }
 0xd41   :  { %904 = vrot.lane.b32.xlu1 %v3189_v2, %s3426_s6 }
 0xd45   :  { %915 = vrot.lane.b32.xlu1 %v901_v1, %s3429_s15 }
 0xdb3   :  { %v905_v3 = vpop.permute.xlu1 %904 }
 0xdb4   :  { %v907_v4 = vmul.f32 %v3187_v59, %v905_v3  ;;  %v316_v3 = vadd.f32 %v3750_v50, %v3643_v23 }
 0xdb6   :  { %910 = vrot.lane.b32.xlu0 %v907_v4, %s3427_s20 }
 0xdb7   :  { %v916_v6 = vpop.permute.xlu1 %915 }
 0xdb8   :  { %v918_v10 = vsel %vm908_vm14, %v916_v6, %v800_v42 }
 0xdb9   :  { %1006 = vrot.lane.b32.xlu1 %v918_v10, %s3427_s20 }
 0xe28   :  { %v911_v11 = vpop.permute.xlu0 %910 }
 0xe29   :  { %v913_v12 = vsel %vm908_vm14, %v911_v11, %v795_v45 }
 0xe2a   :  { %919 = vst.msk [vmem:[#allocation4 + $0x20] sm:$0xff] %vm123_vm0, %v913_v12  ;;  %2756 = vmatmul.mubr.msk.f32.vlgmr.msra.gmra.mrb[6].mxu1 %vm123_vm0, %v913_v12 }
 0xe2b   :  { %2993 = vmatpush1.bf16.msra.mxu1 %v3599_v9  ;;  %1225 = vmatprep.mubr.f32.mxu1 %v3425_v0  ;;  %v1007_v48 = vpop.permute.xlu1 %1006 }
 0xe2c   :  { %2995 = vmatprep.subr.bf16.mxu1 %v3614_v17 }
 0xe2f   :  { %2997 = vmatpush1.bf16.msra.mxu1 %v3620_v19 }
 0xefd   :  { %v991_v14 = vpop.f32.mrb[6].mxu1 }
 0xefe   :  { %v993_v16 = vpop.f32.mrb[7].mxu1 }
 0xeff   :  { %v996_v18 = vsel %vm118_vm1, %v991_v14, %v993_v16 }
 0xf00   :  { %v997_v20 = vadd.f32 %v996_v18, %v312_v15 }
 0xf02   :  { %3190 = vtanh.f32 %v997_v20  ;;  %v2757_v9 = vmul.f32 -1.442695, %v997_v20 }
 0xf04   :  { %3192 = vpow2.f32 %v2757_v9 }
 0xf0c   :  { %v3191_v21 = vpop.eup %3190 }
 0xf0d   :  { %1011 = vrot.lane.b32.xlu0 %v3191_v21, %s3426_s6 }
 0xf0e   :  { %v3193_v25 = vpop.eup %3192 }
 0xf0f   :  { %v1001_v26 = vadd.f32 1.0, %v3193_v25 }
 0xf11   :  { %3194 = vrcp.f32 %v1001_v26 }
 0xf1b   :  { %v3195_v17 = vpop.eup %3194 }
 0xf1c   :  { %v1009_v28 = vmul.f32 %v3195_v17, %v1007_v48 }
 0xf7f   :  { %v1012_v19 = vpop.permute.xlu0 %1011 }
 0xf80   :  { %v1014_v27 = vmul.f32 %v3195_v17, %v1012_v19  ;;  %v1305_v19 = vld [vmem:[#allocation4 + $0x14] sm:$0xf] }
 0xf82   :  { %1016 = vrot.lane.b32.xlu0 %v1014_v27, %s3427_s20  ;;  %v1319_v27 = vld [vmem:[#allocation4 + $0x4] sm:$0xf] }
 0xff4   :  { %v1017_v29 = vpop.permute.xlu0 %1016 }
 0xff5   :  { %v1019_v30 = vadd.f32 %v1017_v29, %v1009_v28  ;;  %v1343_v29 = vld [vmem:[%s4266_s5 + $0x8] sm:$0xff] }
 0xff7   :  { %3196 = vtanh.f32 %v1019_v30 }
0x1001   :  { %v3197_v24 = vpop.eup %3196 }
0x1002   :  { %1022 = vrot.lane.b32.xlu1 %v3197_v24, %s3426_s6  ;;  %v1342_v24 = vld [vmem:[%s4266_s5] sm:$0xff] }
0x1006   :  { %1033 = vrot.lane.b32.xlu1 %v1019_v30, %s3429_s15  ;;  %v1345_v30 = vld [vmem:[%s4266_s5 + $0x18] sm:$0xff] }
0x1074   :  { %v1023_v31 = vpop.permute.xlu1 %1022 }
0x1075   :  { %v1025_v32 = vmul.f32 %v3195_v17, %v1023_v31  ;;  %v1291_v17 = vld [vmem:[#allocation4 + $0x24] sm:$0xf]  ;;  %v2998_v31 = vpack.c.bf16 %v1345_v30, %v1343_v29 }
0x1077   :  { %1028 = vrot.lane.b32.xlu0 %v1025_v32, %s3427_s20  ;;  %v1344_v32 = vld [vmem:[%s4266_s5 + $0x10] sm:$0xff]  ;;  %2999 = vmatprep.subr.bf16.mxu0 %v2998_v31 }
0x1078   :  { %v1034_v33 = vpop.permute.xlu1 %1033 }
0x1079   :  { %v1036_v34 = vsel %vm1026_vm15, %v1034_v33, %v918_v10  ;;  %v1347_v33 = vld [vmem:[%s4266_s5 + $0x28] sm:$0xff] }
0x107a   :  { %1124 = vrot.lane.b32.xlu1 %v1036_v34, %s3427_s20 }
0x10e9   :  { %v1029_v35 = vpop.permute.xlu0 %1028 }
0x10ea   :  { %v1031_v36 = vsel %vm1026_vm15, %v1029_v35, %v913_v12  ;;  %v3000_v35 = vpack.c.bf16 %v1344_v32, %v1342_v24  ;;  %v1283_v24 = vld [vmem:[#allocation4 + $0x10] sm:$0xf] }
0x10eb   :  { %1037 = vst.msk [vmem:[#allocation4 + $0x28] sm:$0xff] %vm123_vm0, %v1031_v36  ;;  %2758 = vmatmul.mubr.msk.f32.vlgmr.msra.gmra.mrb[12].mxu0 %vm123_vm0, %v1031_v36 }
0x10ec   :  { %1435 = vmatprep.mubr.f32.mxu0 %v3425_v0  ;;  %v1125_v51 = vpop.permute.xlu1 %1124  ;;  %3001 = vmatpush1.bf16.msra.mxu0 %v3000_v35 }
0x10f2   :  { %v1304_v30 = vld [vmem:[#allocation4 + $0x28] sm:$0xf] }
0x11be   :  { %v1109_v37 = vpop.f32.mrb[12].mxu0 }
0x11bf   :  { %v1111_v39 = vpop.f32.mrb[13].mxu0 }
0x11c0   :  { %v1114_v41 = vsel %vm118_vm1, %v1109_v37, %v1111_v39  ;;  %v1346_v37 = vld [vmem:[%s4266_s5 + $0x20] sm:$0xff]  ;;  %v1351_v39 = vld [vmem:[%s4266_s5 + $0x48] sm:$0xff] }
0x11c1   :  { %v1115_v42 = vadd.f32 %v1114_v41, %v314_v38  ;;  %v1348_v38 = vld [vmem:[%s4266_s5 + $0x30] sm:$0xff]  ;;  %v1353_v41 = vld [vmem:[%s4266_s5 + $0x58] sm:$0xff] }
0x11c3   :  { %3198 = vtanh.f32 %v1115_v42  ;;  %v2759_v45 = vmul.f32 -1.442695, %v1115_v42  ;;  %v3004_v42 = vpack.c.bf16 %v1348_v38, %v1346_v37  ;;  %v1297_v38 = vld [vmem:[#allocation4 + $0x20] sm:$0xf] }
0x11c5   :  { %3200 = vpow2.f32 %v2759_v45  ;;  %v1350_v45 = vld [vmem:[%s4266_s5 + $0x40] sm:$0xff] }
0x11cd   :  { %v3199_v44 = vpop.eup %3198 }
0x11ce   :  { %1129 = vrot.lane.b32.xlu0 %v3199_v44, %s3426_s6  ;;  %v3006_v44 = vpack.c.bf16 %v1353_v41, %v1351_v39 }
0x11cf   :  { %v3201_v46 = vpop.eup %3200 }
0x11d0   :  { %v1119_v47 = vadd.f32 1.0, %v3201_v46  ;;  %v1352_v46 = vld [vmem:[%s4266_s5 + $0x50] sm:$0xff] }
0x11d2   :  { %3202 = vrcp.f32 %v1119_v47  ;;  %v1355_v47 = vld [vmem:[%s4266_s5 + $0x68] sm:$0xff] }
0x11dc   :  { %v3203_v52 = vpop.eup %3202 }
0x11dd   :  { %v1127_v55 = vmul.f32 %v3203_v52, %v1125_v51  ;;  %v1354_v51 = vld [vmem:[%s4266_s5 + $0x60] sm:$0xff] }
0x1240   :  { %v1130_v53 = vpop.permute.xlu0 %1129 }
0x1241   :  { %v1132_v54 = vmul.f32 %v3203_v52, %v1130_v53  ;;  %v3008_v53 = vpack.c.bf16 %v1352_v46, %v1350_v45 }
0x1243   :  { %1134 = vrot.lane.b32.xlu0 %v1132_v54, %s3427_s20 }
0x12b5   :  { %v1135_v56 = vpop.permute.xlu0 %1134 }
0x12b6   :  { %v1137_v57 = vadd.f32 %v1135_v56, %v1127_v55  ;;  %v1356_v55 = vld [vmem:[%s4266_s5 + $0x70] sm:$0xff] }
0x12b7   :  { %v3012_v56 = vpack.c.bf16 %v1356_v55, %v1354_v51 }
0x12b8   :  { %3204 = vtanh.f32 %v1137_v57 }
0x12c2   :  { %v3205_v58 = vpop.eup %3204 }
0x12c3   :  { %1140 = vrot.lane.b32.xlu1 %v3205_v58, %s3426_s6 }
0x12c7   :  { %1151 = vrot.lane.b32.xlu1 %v1137_v57, %s3429_s15  ;;  %v3935_v57 = vld [vmem:[#allocation5 + $0x38] sm:$0xff] }
0x12c8   :  { %vm1262_vm3 = vcmp.gt.f32.partialorder %v3935_v57, 0.0  ;;  %v2541_v57 = vld [vmem:[%s4271_s10 + $0x50] sm:$0xff] }
0x1335   :  { %v1141_v59 = vpop.permute.xlu1 %1140 }
0x1336   :  { %v1143_v60 = vmul.f32 %v3203_v52, %v1141_v59  ;;  %v1357_v52 = vld [vmem:[%s4266_s5 + $0x78] sm:$0xff] }
0x1337   :  { %v3010_v54 = vpack.c.bf16 %v1357_v52, %v1355_v47 }
0x1338   :  { %1146 = vrot.lane.b32.xlu0 %v1143_v60, %s3427_s20  ;;  %v327_v60 = vld [vmem:[%s4268_s7 + $0x8] sm:$0xff] }
0x1339   :  { %v1152_v49 = vpop.permute.xlu1 %1151 }
0x133a   :  { %v1154_v62 = vsel %vm1144_vm2, %v1152_v49, %v1036_v34  ;;  %v1349_v34 = vld [vmem:[%s4266_s5 + $0x38] sm:$0xff]  ;;  %s2720_s5 = sshll.u32 %s3439_s30, 4  ;;  %s2721_s5 = int_to_ptr.vmem [resolvable:$true] %s2720_s5 }
0x133b   :  { %1242 = vrot.lane.b32.xlu1 %v1154_v62, %s3427_s20  ;;  %v329_v49 = vld [vmem:[%s4268_s7 + $0x18] sm:$0xff]  ;;  %s3388_s21 = scalar_lea.vmem %s2721_s5, 128  ;;  %p3393_p13 = scmp.lt.s32.totalorder %s2721_s5, %s2721_s5 }
0x133c   :  { %v3948_v62 = vpack.c.bf16 %v329_v49, %v327_v60  ;;  %v1460_v49 = vld [vmem:[#allocation11] sm:$0xff]  ;;  %p3389_p12 = scmp.ne.s32.totalorder %s2721_s5, %s3388_s21  ;;  %p3394_p0 = scmp.lt.s32.totalorder %s3388_s21, %s3388_s21 }
0x133e   :  { %3015 = vmatprep.subr.bf16.mxu1 %v3948_v62  ;;  %p3395_p1 = por %p3394_p0, %p3393_p13 }
0x1340   :  { %p3396_p2 = pnand %p3395_p1, %p3389_p12 }
0x13aa   :  { %v1147_v63 = vpop.permute.xlu0 %1146 }
0x13ab   :  { %v3868_v1 = vsel %vm1144_vm2, %v1147_v63, %v1031_v36  ;;  %v3002_v36 = vpack.c.bf16 %v1349_v34, %v1347_v33  ;;  %v326_v63 = vld [vmem:[%s4268_s7] sm:$0xff] }
0x13ac   :  { %1155 = vst.msk [vmem:[#allocation4 + $0x30] sm:$0xff] %vm123_vm0, %v3868_v1  ;;  %2760 = vmatmul.mubr.msk.f32.vlgmr.msra.gmra.mrb[8].mxu1 %vm123_vm0, %v3868_v1 }
0x13ad   :  { %1575 = vmatprep.mubr.f32.mxu1 %v3425_v0  ;;  %v1243_v23 = vpop.permute.xlu1 %1242  ;;  %3003 = vmatprep.subr.bf16.mxu0 %v3002_v36 }
0x13ae   :  { %3005 = vmatpush1.bf16.msra.mxu0 %v3004_v42 }
0x13af   :  { %3007 = vmatprep.subr.bf16.mxu0 %v3006_v44 }
0x13b2   :  { %3009 = vmatpush1.bf16.msra.mxu0 %v3008_v53 }
0x13b3   :  { %v1277_v26 = vld [vmem:[#allocation4 + $0x34] sm:$0xf]  ;;  %3011 = vmatprep.subr.bf16.mxu0 %v3010_v54  ;;  %v1311_v45 = vld [vmem:[#allocation4 + $0x30] sm:$0xf] }
0x13b6   :  { %3013 = vmatpush1.bf16.msra.mxu0 %v3012_v56 }
0x13b7   :  { %3039 = vmatprep.subr.bf16.mxu0 %v3948_v62 }
0x147f   :  { %v1227_v2 = vpop.f32.mrb[8].mxu1 }
0x1480   :  { %v1229_v4 = vpop.f32.mrb[9].mxu1 }
0x1481   :  { %v1232_v6 = vsel %vm118_vm1, %v1227_v2, %v1229_v4  ;;  %v333_v4 = vld [vmem:[%s4268_s7 + $0x38] sm:$0xff] }
0x1482   :  { %v1233_v10 = vadd.f32 %v1232_v6, %v316_v3  ;;  %v331_v3 = vld [vmem:[%s4268_s7 + $0x28] sm:$0xff] }
0x1483   :  { %v3967_v6 = vpack.c.bf16 %v333_v4, %v331_v3 }
0x1484   :  { %3206 = vtanh.f32 %v1233_v10  ;;  %v2761_v12 = vmul.f32 -1.442695, %v1233_v10  ;;  %v330_v10 = vld [vmem:[%s4268_s7 + $0x20] sm:$0xff] }
0x1486   :  { %3208 = vpow2.f32 %v2761_v12 }
0x148e   :  { %v3207_v11 = vpop.eup %3206 }
0x148f   :  { %1247 = vrot.lane.b32.xlu0 %v3207_v11, %s3426_s6  ;;  %v332_v11 = vld [vmem:[%s4268_s7 + $0x30] sm:$0xff] }
0x1490   :  { %v3209_v14 = vpop.eup %3208  ;;  %v3975_v12 = vpack.c.bf16 %v332_v11, %v330_v10 }
0x1491   :  { %v1237_v15 = vadd.f32 1.0, %v3209_v14 }
0x1493   :  { %3210 = vrcp.f32 %v1237_v15  ;;  %v1284_v15 = vld [vmem:[#allocation4 + $0x2c] sm:$0xf] }
0x149d   :  { %v3211_v16 = vpop.eup %3210 }
0x149e   :  { %v1245_v50 = vmul.f32 %v3211_v16, %v1243_v23  ;;  %v1276_v23 = vld [vmem:[#allocation4 + $0x8] sm:$0xf] }
0x1501   :  { %v1248_v18 = vpop.permute.xlu0 %1247 }
0x1502   :  { %v1250_v20 = vmul.f32 %v3211_v16, %v1248_v18  ;;  %v1312_v18 = vld [vmem:[#allocation4 + $0xc] sm:$0xf] }
0x1504   :  { %1252 = vrot.lane.b32.xlu0 %v1250_v20, %s3427_s20 }
0x1576   :  { %v1253_v21 = vpop.permute.xlu0 %1252 }
0x1577   :  { %v1255_v9 = vadd.f32 %v1253_v21, %v1245_v50 }
0x1579   :  { %3212 = vtanh.f32 %v1255_v9 }
0x1583   :  { %v3213_v25 = vpop.eup %3212 }
0x1584   :  { %1258 = vrot.lane.b32.xlu1 %v3213_v25, %s3426_s6  ;;  %v1290_v25 = vld [vmem:[#allocation4 + $0x18] sm:$0xf] }
0x1588   :  { %1279 = vrot.lane.b32.xlu1 %v1277_v26, %s3427_s20  ;;  %v1269_v26 = vld [vmem:[#allocation4] sm:$0xf] }
0x158c   :  { %1293 = vrot.lane.b32.xlu1 %v1291_v17, %s3427_s20 }
0x1590   :  { %1307 = vrot.lane.b32.xlu1 %v1305_v19, %s3427_s20 }
0x1594   :  { %1321 = vrot.lane.b32.xlu1 %v1319_v27, %s3427_s20 }
0x15f6   :  { %v1259_v48 = vpop.permute.xlu1 %1258 }
0x15f7   :  { %v1261_v28 = vmul.f32 %v3211_v16, %v1259_v48  ;;  %v1298_v16 = vld [vmem:[#allocation4 + $0x1c] sm:$0xf] }
0x15f9   :  { %1264 = vrot.lane.b32.xlu0 %v1261_v28, %s3427_s20 }
0x15fa   :  { %v1280_v20 = vpop.permute.xlu1 %1279 }
0x15fb   :  { %v1282_v21 = vsel %vm123_vm0, %v1276_v23, %v1280_v20 }
0x15fc   :  { %v1326_v9 = vrot.slane %v1282_v21, 4 }
0x15fe   :  { %v1294_v50 = vpop.permute.xlu1 %1293 }
0x15ff   :  { %v1296_v19 = vsel %vm123_vm0, %v1290_v25, %v1294_v50 }
0x1600   :  { %v1329_v29 = vrot.slane %v1296_v19, 4 }
0x1602   :  { %v1308_v48 = vpop.permute.xlu1 %1307 }
0x1603   :  { %v1310_v32 = vsel %vm123_vm0, %v1304_v30, %v1308_v48 }
0x1604   :  { %v1332_v36 = vrot.slane %v1310_v32, 4 }
0x1606   :  { %v1322_v37 = vpop.permute.xlu1 %1321 }
0x166b   :  { %v1265_v58 = vpop.permute.xlu0 %1264 }
0x166c   :  { %v1267_v59 = vsel %vm1262_vm3, %v1265_v58, %v3868_v1  ;;  %v328_v1 = vld [vmem:[%s4268_s7 + $0x10] sm:$0xff] }
0x166d   :  { %1268 = vst.msk [vmem:[#allocation4 + $0x38] sm:$0xff] %vm123_vm0, %v1267_v59  ;;  %v3956_v2 = vpack.c.bf16 %v328_v1, %v326_v63 }
0x166f   :  { %3017 = vmatpush1.bf16.msra.mxu1 %v3956_v2 }
0x1670   :  { %3019 = vmatprep.subr.bf16.mxu1 %v3967_v6 }
0x1673   :  { %3021 = vmatpush1.bf16.msra.mxu1 %v3975_v12 }
0x1674   :  { %v1270_v14 = vld [vmem:[#allocation4 + $0x3c] sm:$0xf]  ;;  %3023 = vmatprep.subr.bf16.mxu1 %v3948_v62  ;;  %v1318_v35 = vld [vmem:[#allocation4 + $0x38] sm:$0xf] }
0x1675   :  { %1272 = vrot.lane.b32.xlu0 %v1270_v14, %s3427_s20  ;;  %v1324_v42 = vsel %vm123_vm0, %v1318_v35, %v1322_v37 }
0x1676   :  { %1576 = vmatmul.mubr.f32.vlgmr.msra.gmra.mrb[10].mxu1 %v3425_v0  ;;  %v1335_v47 = vrot.slane %v1324_v42, 4 }
0x1677   :  { %3025 = vmatpush1.bf16.msra.mxu1 %v3956_v2  ;;  %1688 = vmatprep.mubr.f32.mxu1 %v3425_v0 }
0x1678   :  { %3027 = vmatprep.subr.bf16.mxu1 %v3967_v6 }
0x1679   :  { %1286 = vrot.lane.b32.xlu0 %v1284_v15, %s3427_s20 }
0x167b   :  { %3029 = vmatpush1.bf16.msra.mxu1 %v3975_v12 }
0x167c   :  { %3031 = vmatprep.subr.bf16.mxu1 %v3948_v62 }
0x167d   :  { %1300 = vrot.lane.b32.xlu0 %v1298_v16, %s3427_s20 }
0x1681   :  { %1314 = vrot.lane.b32.xlu0 %v1312_v18, %s3427_s20 }
0x16e7   :  { %v1273_v17 = vpop.permute.xlu0 %1272 }
0x16e8   :  { %v1275_v27 = vsel %vm123_vm0, %v1269_v26, %v1273_v17 }
0x16e9   :  { %v1338_v28 = vsel %vm1337_vm4, %v1275_v27, %v1326_v9 }
0x16ea   :  { %2762 = vmatmul.mubr.msk.f32.vlgmr.msra.gmra.mrb[14].mxu0 %vm1358_vm5, %v1338_v28 }
0x16eb   :  { %v1287_v31 = vpop.permute.xlu0 %1286  ;;  %1441 = vmatprep.mubr.f32.mxu0 %v3425_v0  ;;  %3041 = vmatpush1.bf16.msra.mxu0 %v3956_v2 }
0x16ec   :  { %v1289_v33 = vsel %vm123_vm0, %v1283_v24, %v1287_v31  ;;  %3043 = vmatprep.subr.bf16.mxu0 %v3967_v6 }
0x16ed   :  { %v1339_v34 = vsel %vm1337_vm4, %v1289_v33, %v1329_v29 }
0x16ee   :  { %2763 = vmatmul.mubr.msk.f32.gmra.mrb[16].mxu0 %vm1358_vm5, %v1339_v34 }
0x16ef   :  { %v1301_v39 = vpop.permute.xlu0 %1300  ;;  %1447 = vmatprep.mubr.f32.mxu0 %v3425_v0  ;;  %3045 = vmatpush1.bf16.msra.mxu0 %v3975_v12 }
0x16f0   :  { %v1303_v41 = vsel %vm123_vm0, %v1297_v38, %v1301_v39  ;;  %3055 = vmatprep.subr.bf16.mxu0 %v3948_v62 }
0x16f1   :  { %v1340_v44 = vsel %vm1337_vm4, %v1303_v41, %v1332_v36 }
0x16f2   :  { %2764 = vmatmul.mubr.msk.f32.gmra.mrb[18].mxu0 %vm1358_vm5, %v1340_v44 }
0x16f3   :  { %v1315_v46 = vpop.permute.xlu0 %1314  ;;  %1453 = vmatprep.mubr.f32.mxu0 %v3425_v0 }
0x16f4   :  { %v1317_v52 = vsel %vm123_vm0, %v1311_v45, %v1315_v46 }
0x16f5   :  { %v1341_v53 = vsel %vm1337_vm4, %v1317_v52, %v1335_v47 }
0x16f6   :  { %2765 = vmatmul.mubr.msk.f32.gmra.mrb[20].mxu0 %vm1358_vm5, %v1341_v53 }
0x16f7   :  { %1922 = vmatprep.mubr.f32.mxu0 %v3425_v0 }
0x1749   :  { %v1577_v54 = vpop.f32.mrb[10].mxu1 }
0x174a   :  { %v1579_v51 = vpop.f32.mrb[11].mxu1 }
0x174b   :  { %v1582_v55 = vsel %vm118_vm1, %v1577_v54, %v1579_v51 }
0x17bd   :  { %v1437_v56 = vpop.f32.mrb[14].mxu0 }
0x17be   :  { %v1439_v58 = vpop.f32.mrb[15].mxu0  ;;  %v1465_v27 = vrot.slane %v1437_v56, 4 }
0x17bf   :  { %v1504_v9 = vrot.slane %v1439_v58, 4 }
0x17c1   :  { %v1443_v59 = vpop.f32.mrb[16].mxu0 }
0x17c2   :  { %v1445_v60 = vpop.f32.mrb[17].mxu0  ;;  %v1477_v11 = vrot.slane %v1443_v59, 4 }
0x17c3   :  { %v1492_v1 = vrot.slane %v1445_v60, 4 }
0x17c5   :  { %v1449_v63 = vpop.f32.mrb[18].mxu0 }
0x17c6   :  { %v1485_v3 = vsel %vm1337_vm4, %v1449_v63, %v1445_v60  ;;  %v1489_v4 = vrot.slane %v1449_v63, 4  ;;  %v1451_v10 = vpop.f32.mrb[19].mxu0 }
0x17c7   :  { %v4017_v14 = vadd.f32 %v1485_v3, %v1460_v49  ;;  %v1473_v15 = vsel %vm1337_vm4, %v1443_v59, %v1451_v10  ;;  %v1480_v16 = vrot.slane %v1451_v10, 4 }
0x17c8   :  { %v4020_v18 = vadd.f32 %v1473_v15, %v1460_v49  ;;  %v1494_v20 = vsel %vm1337_vm4, %v1489_v4, %v1492_v1 }
0x17c9   :  { %v1455_v23 = vpop.f32.mrb[20].mxu0  ;;  %v1482_v50 = vsel %vm1337_vm4, %v1477_v11, %v1480_v16  ;;  %v4024_v21 = vadd.f32 %v1494_v20, %v1460_v49 }
0x17ca   :  { %v1497_v25 = vsel %vm1337_vm4, %v1455_v23, %v1439_v58  ;;  %v1501_v26 = vrot.slane %v1455_v23, 4  ;;  %v1457_v17 = vpop.f32.mrb[21].mxu0  ;;  %v4027_v19 = vadd.f32 %v1482_v50, %v1460_v49 }
0x17cb   :  { %v4029_v48 = vadd.f32 %v1497_v25, %v1460_v49  ;;  %v1461_v28 = vsel %vm1337_vm4, %v1437_v56, %v1457_v17  ;;  %v1468_v29 = vrot.slane %v1457_v17, 4 }
0x17cc   :  { %v1462_v30 = vadd.f32 %v1461_v28, %v1460_v49  ;;  %v1506_v24 = vsel %vm1337_vm4, %v1501_v26, %v1504_v9 }
0x17cd   :  { %v1470_v31 = vsel %vm1337_vm4, %v1465_v27, %v1468_v29  ;;  %v4034_v32 = vadd.f32 %v1506_v24, %v1460_v49 }
0x17ce   :  { %v1583_v33 = vadd.f32 %v1582_v55, %v1462_v30  ;;  %v1471_v34 = vadd.f32 %v1470_v31, %v1460_v49 }
0x17d0   :  { %3214 = vtanh.f32 %v1583_v33  ;;  %v2766_v36 = vmul.f32 -1.442695, %v1583_v33 }
0x17d2   :  { %3216 = vpow2.f32 %v2766_v36 }
0x17da   :  { %v3215_v35 = vpop.eup %3214 }
0x17db   :  { %1593 = vrot.lane.b32.xlu1 %v3215_v35, %s3426_s6 }
0x17dc   :  { %v3217_v37 = vpop.eup %3216 }
0x17dd   :  { %v1587_v38 = vadd.f32 1.0, %v3217_v37 }
0x17df   :  { %3218 = vrcp.f32 %v1587_v38 }
0x17e9   :  { %v3219_v39 = vpop.eup %3218 }
0x17ea   :  { %v1591_v44 = vmul.f32 0.0, %v3219_v39 }
0x184d   :  { %v1594_v41 = vpop.permute.xlu1 %1593 }
0x184e   :  { %v1596_v42 = vmul.f32 %v3219_v39, %v1594_v41 }
0x1850   :  { %1598 = vrot.lane.b32.xlu0 %v1596_v42, %s3427_s20 }
0x18c2   :  { %v1599_v45 = vpop.permute.xlu0 %1598 }
0x18c3   :  { %v1601_v46 = vadd.f32 %v1599_v45, %v1591_v44 }
0x18c5   :  { %3220 = vtanh.f32 %v1601_v46 }
0x18cf   :  { %v3221_v47 = vpop.eup %3220 }
0x18d0   :  { %1604 = vrot.lane.b32.xlu1 %v3221_v47, %s3426_s6 }
0x18d4   :  { %1615 = vrot.lane.b32.xlu1 %v1601_v46, %s3429_s15 }
0x1942   :  { %v1605_v52 = vpop.permute.xlu1 %1604 }
0x1943   :  { %v1607_v53 = vmul.f32 %v3219_v39, %v1605_v52 }
0x1945   :  { %1610 = vrot.lane.b32.xlu0 %v1607_v53, %s3427_s20 }
0x1946   :  { %v1616_v54 = vpop.permute.xlu1 %1615 }
0x1947   :  { %v1618_v51 = vsel %vm436_vm10, %v1616_v54, 0.0 }
0x1948   :  { %1705 = vrot.lane.b32.xlu1 %v1618_v51, %s3427_s20 }
0x19b7   :  { %v1611_v55 = vpop.permute.xlu0 %1610 }
0x19b8   :  { %v1613_v56 = vsel %vm436_vm10, %v1611_v55, 0.0 }
0x19b9   :  { %2767 = vmatmul.mubr.msk.f32.vlgmr.msra.gmra.mrb[12].mxu1 %vm123_vm0, %v1613_v56 }
0x19ba   :  { %3033 = vmatpush1.bf16.msra.mxu1 %v3956_v2  ;;  %1805 = vmatprep.mubr.f32.mxu1 %v3425_v0  ;;  %v1706_v15 = vpop.permute.xlu1 %1705 }
0x19bb   :  { %3035 = vmatprep.subr.bf16.mxu1 %v3967_v6 }
0x19be   :  { %3037 = vmatpush1.bf16.msra.mxu1 %v3975_v12 }
0x19bf   :  { %3047 = vmatprep.subr.bf16.mxu1 %v3948_v62 }
0x1a8c   :  { %v1690_v58 = vpop.f32.mrb[12].mxu1 }
0x1a8d   :  { %v1692_v59 = vpop.f32.mrb[13].mxu1 }
0x1a8e   :  { %v1695_v60 = vsel %vm118_vm1, %v1690_v58, %v1692_v59 }
0x1a8f   :  { %v1696_v49 = vadd.f32 %v1695_v60, %v1471_v34 }
0x1a91   :  { %3222 = vtanh.f32 %v1696_v49  ;;  %v2768_v63 = vmul.f32 -1.442695, %v1696_v49 }
0x1a93   :  { %3224 = vpow2.f32 %v2768_v63 }
0x1a9b   :  { %v3223_v7 = vpop.eup %3222 }
0x1a9c   :  { %1710 = vrot.lane.b32.xlu0 %v3223_v7, %s3426_s6 }
0x1a9d   :  { %v3225_v1 = vpop.eup %3224 }
0x1a9e   :  { %v1700_v3 = vadd.f32 1.0, %v3225_v1 }
0x1aa0   :  { %3226 = vrcp.f32 %v1700_v3 }
0x1aaa   :  { %v3227_v4 = vpop.eup %3226 }
0x1aab   :  { %v1708_v16 = vmul.f32 %v3227_v4, %v1706_v15 }
0x1b0e   :  { %v1711_v10 = vpop.permute.xlu0 %1710 }
0x1b0f   :  { %v1713_v11 = vmul.f32 %v3227_v4, %v1711_v10 }
0x1b11   :  { %1715 = vrot.lane.b32.xlu0 %v1713_v11, %s3427_s20 }
0x1b83   :  { %v1716_v20 = vpop.permute.xlu0 %1715 }
0x1b84   :  { %v1718_v23 = vadd.f32 %v1716_v20, %v1708_v16 }
0x1b86   :  { %3228 = vtanh.f32 %v1718_v23 }
0x1b90   :  { %v3229_v50 = vpop.eup %3228 }
0x1b91   :  { %1721 = vrot.lane.b32.xlu1 %v3229_v50, %s3426_s6 }
0x1b95   :  { %1732 = vrot.lane.b32.xlu1 %v1718_v23, %s3429_s15 }
0x1c03   :  { %v1722_v9 = vpop.permute.xlu1 %1721 }
0x1c04   :  { %v1724_v25 = vmul.f32 %v3227_v4, %v1722_v9 }
0x1c06   :  { %1727 = vrot.lane.b32.xlu0 %v1724_v25, %s3427_s20 }
0x1c07   :  { %v1733_v26 = vpop.permute.xlu1 %1732 }
0x1c08   :  { %v1735_v17 = vsel %vm554_vm11, %v1733_v26, %v1618_v51 }
0x1c09   :  { %1822 = vrot.lane.b32.xlu1 %v1735_v17, %s3427_s20 }
0x1c78   :  { %v1728_v27 = vpop.permute.xlu0 %1727 }
0x1c79   :  { %v1730_v28 = vsel %vm554_vm11, %v1728_v27, %v1613_v56 }
0x1c7a   :  { %2769 = vmatmul.mubr.msk.f32.vlgmr.msra.gmra.mrb[14].mxu1 %vm123_vm0, %v1730_v28 }
0x1c7b   :  { %3049 = vmatpush1.bf16.msra.mxu1 %v3956_v2  ;;  %2039 = vmatprep.mubr.f32.mxu1 %v3425_v0  ;;  %v1823_v39 = vpop.permute.xlu1 %1822 }
0x1c7c   :  { %3051 = vmatprep.subr.bf16.mxu1 %v3967_v6 }
0x1c7f   :  { %3053 = vmatpush1.bf16.msra.mxu1 %v3975_v12 }
0x1c80   :  { %3063 = vmatprep.subr.bf16.mxu1 %v3948_v62 }
0x1d4d   :  { %v1807_v29 = vpop.f32.mrb[14].mxu1 }
0x1d4e   :  { %v1809_v30 = vpop.f32.mrb[15].mxu1 }
0x1d4f   :  { %v1812_v24 = vsel %vm118_vm1, %v1807_v29, %v1809_v30 }
0x1d50   :  { %v1813_v43 = vadd.f32 %v1812_v24, %v4020_v18 }
0x1d52   :  { %3230 = vtanh.f32 %v1813_v43  ;;  %v2770_v33 = vmul.f32 -1.442695, %v1813_v43 }
0x1d54   :  { %3232 = vpow2.f32 %v2770_v33 }
0x1d5c   :  { %v3231_v31 = vpop.eup %3230 }
0x1d5d   :  { %1827 = vrot.lane.b32.xlu0 %v3231_v31, %s3426_s6 }
0x1d5e   :  { %v3233_v34 = vpop.eup %3232 }
0x1d5f   :  { %v1817_v35 = vadd.f32 1.0, %v3233_v34 }
0x1d61   :  { %3234 = vrcp.f32 %v1817_v35 }
0x1d6b   :  { %v3235_v36 = vpop.eup %3234 }
0x1d6c   :  { %v1825_v41 = vmul.f32 %v3235_v36, %v1823_v39 }
0x1dcf   :  { %v1828_v37 = vpop.permute.xlu0 %1827 }
0x1dd0   :  { %v1830_v38 = vmul.f32 %v3235_v36, %v1828_v37 }
0x1dd2   :  { %1832 = vrot.lane.b32.xlu0 %v1830_v38, %s3427_s20 }
0x1e44   :  { %v1833_v42 = vpop.permute.xlu0 %1832 }
0x1e45   :  { %v1835_v44 = vadd.f32 %v1833_v42, %v1825_v41 }
0x1e47   :  { %3236 = vtanh.f32 %v1835_v44 }
0x1e51   :  { %v3237_v18 = vpop.eup %3236 }
0x1e52   :  { %1838 = vrot.lane.b32.xlu1 %v3237_v18, %s3426_s6 }
0x1e56   :  { %1849 = vrot.lane.b32.xlu1 %v1835_v44, %s3429_s15 }
0x1ec4   :  { %v1839_v45 = vpop.permute.xlu1 %1838 }
0x1ec5   :  { %v1841_v46 = vmul.f32 %v3235_v36, %v1839_v45 }
0x1ec7   :  { %1844 = vrot.lane.b32.xlu0 %v1841_v46, %s3427_s20 }
0x1ec8   :  { %v1850_v47 = vpop.permute.xlu1 %1849 }
0x1ec9   :  { %v1852_v52 = vsel %vm672_vm12, %v1850_v47, %v1735_v17 }
0x1eca   :  { %1939 = vrot.lane.b32.xlu1 %v1852_v52, %s3427_s20 }
0x1f39   :  { %v1845_v53 = vpop.permute.xlu0 %1844 }
0x1f3a   :  { %v1847_v54 = vsel %vm672_vm12, %v1845_v53, %v1730_v28 }
0x1f3b   :  { %2771 = vmatmul.mubr.msk.f32.vlgmr.msra.gmra.mrb[22].mxu0 %vm123_vm0, %v1847_v54 }
0x1f3c   :  { %3057 = vmatpush1.bf16.msra.mxu0 %v3956_v2  ;;  %2156 = vmatprep.mubr.f32.mxu0 %v3425_v0 }
0x1f3d   :  { %3059 = vmatprep.subr.bf16.mxu0 %v3967_v6 }
0x1f40   :  { %3061 = vmatpush1.bf16.msra.mxu0 %v3975_v12 }
0x1f41   :  { %3071 = vmatprep.subr.bf16.mxu0 %v3948_v62  ;;  %v1940_v62 = vpop.permute.xlu1 %1939 }
0x200e   :  { %v1924_v51 = vpop.f32.mrb[22].mxu0 }
0x200f   :  { %v1926_v55 = vpop.f32.mrb[23].mxu0 }
0x2010   :  { %v1929_v56 = vsel %vm118_vm1, %v1924_v51, %v1926_v55 }
0x2011   :  { %v1930_v13 = vadd.f32 %v1929_v56, %v4027_v19 }
0x2013   :  { %3238 = vtanh.f32 %v1930_v13  ;;  %v2772_v59 = vmul.f32 -1.442695, %v1930_v13 }
0x2015   :  { %3240 = vpow2.f32 %v2772_v59 }
0x201d   :  { %v3239_v58 = vpop.eup %3238 }
0x201e   :  { %1944 = vrot.lane.b32.xlu0 %v3239_v58, %s3426_s6 }
0x201f   :  { %v3241_v60 = vpop.eup %3240 }
0x2020   :  { %v1934_v49 = vadd.f32 1.0, %v3241_v60 }
0x2022   :  { %3242 = vrcp.f32 %v1934_v49 }
0x202c   :  { %v3243_v7 = vpop.eup %3242 }
0x202d   :  { %v1942_v3 = vmul.f32 %v3243_v7, %v1940_v62 }
0x2090   :  { %v1945_v63 = vpop.permute.xlu0 %1944 }
0x2091   :  { %v1947_v1 = vmul.f32 %v3243_v7, %v1945_v63 }
0x2093   :  { %1949 = vrot.lane.b32.xlu0 %v1947_v1, %s3427_s20 }
0x2105   :  { %v1950_v4 = vpop.permute.xlu0 %1949 }
0x2106   :  { %v1952_v10 = vadd.f32 %v1950_v4, %v1942_v3 }
0x2108   :  { %3244 = vtanh.f32 %v1952_v10 }
0x2112   :  { %v3245_v19 = vpop.eup %3244 }
0x2113   :  { %1955 = vrot.lane.b32.xlu1 %v3245_v19, %s3426_s6 }
0x2117   :  { %1966 = vrot.lane.b32.xlu1 %v1952_v10, %s3429_s15 }
0x2185   :  { %v1956_v11 = vpop.permute.xlu1 %1955 }
0x2186   :  { %v1958_v15 = vmul.f32 %v3243_v7, %v1956_v11 }
0x2188   :  { %1961 = vrot.lane.b32.xlu0 %v1958_v15, %s3427_s20 }
0x2189   :  { %v1967_v16 = vpop.permute.xlu1 %1966 }
0x218a   :  { %v1969_v20 = vsel %vm790_vm13, %v1967_v16, %v1852_v52 }
0x218b   :  { %2056 = vrot.lane.b32.xlu1 %v1969_v20, %s3427_s20 }
0x21fa   :  { %v1962_v23 = vpop.permute.xlu0 %1961 }
0x21fb   :  { %v1964_v50 = vsel %vm790_vm13, %v1962_v23, %v1847_v54 }
0x21fc   :  { %2773 = vmatmul.mubr.msk.f32.vlgmr.msra.gmra.mrb[16].mxu1 %vm123_vm0, %v1964_v50 }
0x21fd   :  { %3065 = vmatpush1.bf16.msra.mxu1 %v3956_v2  ;;  %2273 = vmatprep.mubr.f32.mxu1 %v3425_v0  ;;  %v2057_v31 = vpop.permute.xlu1 %2056 }
0x21fe   :  { %3067 = vmatprep.subr.bf16.mxu1 %v3967_v6 }
0x2201   :  { %3069 = vmatpush1.bf16.msra.mxu1 %v3975_v12 }
0x22cf   :  { %v2041_v9 = vpop.f32.mrb[16].mxu1 }
0x22d0   :  { %v2043_v25 = vpop.f32.mrb[17].mxu1 }
0x22d1   :  { %v2046_v26 = vsel %vm118_vm1, %v2041_v9, %v2043_v25 }
0x22d2   :  { %v2047_v17 = vadd.f32 %v2046_v26, %v4017_v14 }
0x22d4   :  { %3246 = vtanh.f32 %v2047_v17  ;;  %v2774_v27 = vmul.f32 -1.442695, %v2047_v17 }
0x22d6   :  { %3248 = vpow2.f32 %v2774_v27 }
0x22de   :  { %v3247_v40 = vpop.eup %3246 }
0x22df   :  { %2061 = vrot.lane.b32.xlu0 %v3247_v40, %s3426_s6 }
0x22e0   :  { %v3249_v28 = vpop.eup %3248 }
0x22e1   :  { %v2051_v29 = vadd.f32 1.0, %v3249_v28 }
0x22e3   :  { %3250 = vrcp.f32 %v2051_v29 }
0x22ed   :  { %v3251_v30 = vpop.eup %3250 }
0x22ee   :  { %v2059_v33 = vmul.f32 %v3251_v30, %v2057_v31 }
0x2351   :  { %v2062_v24 = vpop.permute.xlu0 %2061 }
0x2352   :  { %v2064_v43 = vmul.f32 %v3251_v30, %v2062_v24 }
0x2354   :  { %2066 = vrot.lane.b32.xlu0 %v2064_v43, %s3427_s20 }
0x23c6   :  { %v2067_v34 = vpop.permute.xlu0 %2066 }
0x23c7   :  { %v2069_v35 = vadd.f32 %v2067_v34, %v2059_v33 }
0x23c9   :  { %3252 = vtanh.f32 %v2069_v35 }
0x23d3   :  { %v3253_v14 = vpop.eup %3252 }
0x23d4   :  { %2072 = vrot.lane.b32.xlu1 %v3253_v14, %s3426_s6 }
0x23d8   :  { %2083 = vrot.lane.b32.xlu1 %v2069_v35, %s3429_s15 }
0x2446   :  { %v2073_v36 = vpop.permute.xlu1 %2072 }
0x2447   :  { %v2075_v37 = vmul.f32 %v3251_v30, %v2073_v36 }
0x2449   :  { %2078 = vrot.lane.b32.xlu0 %v2075_v37, %s3427_s20 }
0x244a   :  { %v2084_v38 = vpop.permute.xlu1 %2083 }
0x244b   :  { %v2086_v39 = vsel %vm908_vm14, %v2084_v38, %v1969_v20 }
0x244c   :  { %2173 = vrot.lane.b32.xlu1 %v2086_v39, %s3427_s20 }
0x24bb   :  { %v2079_v41 = vpop.permute.xlu0 %2078 }
0x24bc   :  { %v2081_v42 = vsel %vm908_vm14, %v2079_v41, %v1964_v50  ;;  %v2442_v41 = vld [vmem:[#allocation12] sm:$0xff] }
0x24bd   :  { %2775 = vmatmul.mubr.msk.f32.vlgmr.msra.gmra.mrb[24].mxu0 %vm123_vm0, %v2081_v42 }
0x24be   :  { %3073 = vmatpush1.bf16.msra.mxu0 %v3956_v2  ;;  %2390 = vmatprep.mubr.f32.mxu0 %v3425_v0 }
0x24bf   :  { %3075 = vmatprep.subr.bf16.mxu0 %v3967_v6 }
0x24c2   :  { %3077 = vmatpush1.bf16.msra.mxu0 %v3975_v12  ;;  %v2174_v12 = vpop.permute.xlu1 %2173 }
0x2590   :  { %v2158_v44 = vpop.f32.mrb[24].mxu0 }
0x2591   :  { %v2160_v18 = vpop.f32.mrb[25].mxu0 }
0x2592   :  { %v2163_v45 = vsel %vm118_vm1, %v2158_v44, %v2160_v18  ;;  %v2444_v44 = vld [vmem:[#allocation12 + $0x10] sm:$0xff]  ;;  %v3437_v18 = vmov 0.0|0.0  }
0x2593   :  { %v2164_v46 = vadd.f32 %v2163_v45, %v4024_v21  ;;  %3078 = vmatprep.subr.bf16.mxu1 %v3437_v18  ;;  %3090 = vmatprep.subr.bf16.mxu0 %v3437_v18 }
0x2595   :  { %3254 = vtanh.f32 %v2164_v46  ;;  %v2776_v47 = vmul.f32 -1.442695, %v2164_v46  ;;  %v2445_v46 = vld [vmem:[#allocation12 + $0x18] sm:$0xff] }
0x2597   :  { %3256 = vpow2.f32 %v2776_v47  ;;  %v2446_v47 = vld [vmem:[#allocation12 + $0x20] sm:$0xff] }
0x259f   :  { %v3255_v5 = vpop.eup %3254 }
0x25a0   :  { %2178 = vrot.lane.b32.xlu0 %v3255_v5, %s3426_s6  ;;  %v3082_v5 = vpack.c.bf16 %v2445_v46, %v2444_v44  ;;  %v2784_v44 = vld [vmem:[%s4274_s13] ss:$0 sm:$0xff] }
0x25a1   :  { %v3257_v2 = vpop.eup %3256 }
0x25a2   :  { %v2168_v52 = vadd.f32 1.0, %v3257_v2  ;;  %v2447_v2 = vld [vmem:[#allocation12 + $0x28] sm:$0xff] }
0x25a4   :  { %3258 = vrcp.f32 %v2168_v52 }
0x25ae   :  { %v3259_v53 = vpop.eup %3258 }
0x25af   :  { %v2176_v51 = vmul.f32 %v3259_v53, %v2174_v12  ;;  %v2449_v12 = vld [vmem:[#allocation12 + $0x38] sm:$0xff] }
0x2612   :  { %v2179_v6 = vpop.permute.xlu0 %2178 }
0x2613   :  { %v2181_v54 = vmul.f32 %v3259_v53, %v2179_v6 }
0x2615   :  { %2183 = vrot.lane.b32.xlu0 %v2181_v54, %s3427_s20  ;;  %v2448_v54 = vld [vmem:[#allocation12 + $0x30] sm:$0xff] }
0x2687   :  { %v2184_v55 = vpop.permute.xlu0 %2183 }
0x2688   :  { %v2186_v56 = vadd.f32 %v2184_v55, %v2176_v51  ;;  %v3088_v51 = vpack.c.bf16 %v2449_v12, %v2448_v54  ;;  %v2531_v55 = vld [vmem:[%s4271_s10] sm:$0xff] }
0x268a   :  { %3260 = vtanh.f32 %v2186_v56 }
0x2694   :  { %v3261_v21 = vpop.eup %3260 }
0x2695   :  { %2189 = vrot.lane.b32.xlu1 %v3261_v21, %s3426_s6  ;;  %v2533_v21 = vld [vmem:[%s4271_s10 + $0x10] sm:$0xff] }
0x2699   :  { %2200 = vrot.lane.b32.xlu1 %v2186_v56, %s3429_s15  ;;  %v2532_v56 = vld [vmem:[%s4271_s10 + $0x8] sm:$0xff] }
0x2707   :  { %v2190_v13 = vpop.permute.xlu1 %2189 }
0x2708   :  { %v2192_v58 = vmul.f32 %v3259_v53, %v2190_v13  ;;  %v3085_v53 = vpack.c.bf16 %v2447_v2, %v2446_v47  ;;  %v3091_v13 = vpack.c.bf16 %v2532_v56, %v2531_v55 }
0x270a   :  { %2195 = vrot.lane.b32.xlu0 %v2192_v58, %s3427_s20  ;;  %v2534_v58 = vld [vmem:[%s4271_s10 + $0x18] sm:$0xff] }
0x270b   :  { %v2201_v59 = vpop.permute.xlu1 %2200 }
0x270c   :  { %v2203_v60 = vsel %vm1026_vm15, %v2201_v59, %v2086_v39  ;;  %v3094_v59 = vpack.c.bf16 %v2534_v58, %v2533_v21 }
0x270d   :  { %2290 = vrot.lane.b32.xlu1 %v2203_v60, %s3427_s20 }
0x277c   :  { %v2196_v49 = vpop.permute.xlu0 %2195 }
0x277d   :  { %v2198_v7 = vsel %vm1026_vm15, %v2196_v49, %v2081_v42  ;;  %v2443_v42 = vld [vmem:[#allocation12 + $0x8] sm:$0xff]  ;;  %v2536_v49 = vld [vmem:[%s4271_s10 + $0x28] sm:$0xff] }
0x277e   :  { %2777 = vmatmul.mubr.msk.f32.vlgmr.msra.gmra.mrb[18].mxu1 %vm123_vm0, %v2198_v7  ;;  %v3079_v45 = vpack.c.bf16 %v2443_v42, %v2442_v41 }
0x277f   :  { %v2291_v20 = vpop.permute.xlu1 %2290 }
0x2780   :  { %3080 = vmatpush3.bf16.msra.mxu1 %v3079_v45 }
0x2781   :  { %3081 = vmatprep.subr.bf16.mxu1 %v3437_v18 }
0x2784   :  { %3083 = vmatpush3.bf16.msra.mxu1 %v3082_v5 }
0x2785   :  { %3084 = vmatprep.subr.bf16.mxu1 %v3437_v18 }
0x2788   :  { %3086 = vmatpush3.bf16.msra.mxu1 %v3085_v53 }
0x2789   :  { %3087 = vmatprep.subr.bf16.mxu1 %v3437_v18 }
0x278c   :  { %3089 = vmatpush3.bf16.msra.mxu1 %v3088_v51 }
0x278d   :  { %3114 = vmatprep.subr.bf16.mxu1 %v3437_v18 }
0x2851   :  { %v2275_v63 = vpop.f32.mrb[18].mxu1 }
0x2852   :  { %v2277_v1 = vpop.f32.mrb[19].mxu1 }
0x2853   :  { %v2280_v62 = vsel %vm118_vm1, %v2275_v63, %v2277_v1  ;;  %v2537_v1 = vld [vmem:[%s4271_s10 + $0x30] sm:$0xff] }
0x2854   :  { %v2281_v3 = vadd.f32 %v2280_v62, %v4029_v48  ;;  %v2538_v62 = vld [vmem:[%s4271_s10 + $0x38] sm:$0xff] }
0x2856   :  { %3262 = vtanh.f32 %v2281_v3  ;;  %v2778_v10 = vmul.f32 -1.442695, %v2281_v3 }
0x2858   :  { %3264 = vpow2.f32 %v2778_v10  ;;  %v3100_v10 = vpack.c.bf16 %v2538_v62, %v2537_v1 }
0x2860   :  { %v3263_v4 = vpop.eup %3262 }
0x2861   :  { %2295 = vrot.lane.b32.xlu0 %v3263_v4, %s3426_s6 }
0x2862   :  { %v3265_v19 = vpop.eup %3264 }
0x2863   :  { %v2285_v11 = vadd.f32 1.0, %v3265_v19  ;;  %v2539_v19 = vld [vmem:[%s4271_s10 + $0x40] sm:$0xff] }
0x2865   :  { %3266 = vrcp.f32 %v2285_v11  ;;  %v2540_v11 = vld [vmem:[%s4271_s10 + $0x48] sm:$0xff] }
0x286f   :  { %v3267_v8 = vpop.eup %3266 }
0x2870   :  { %v2293_v23 = vmul.f32 %v3267_v8, %v2291_v20  ;;  %v2543_v20 = vld [vmem:[%s4271_s10 + $0x60] sm:$0xff] }
0x28d3   :  { %v2296_v15 = vpop.permute.xlu0 %2295 }
0x28d4   :  { %v2298_v16 = vmul.f32 %v3267_v8, %v2296_v15  ;;  %v2542_v15 = vld [vmem:[%s4271_s10 + $0x58] sm:$0xff] }
0x28d6   :  { %2300 = vrot.lane.b32.xlu0 %v2298_v16, %s3427_s20  ;;  %v3106_v16 = vpack.c.bf16 %v2542_v15, %v2541_v57 }
0x2948   :  { %v2301_v50 = vpop.permute.xlu0 %2300 }
0x2949   :  { %v2303_v9 = vadd.f32 %v2301_v50, %v2293_v23  ;;  %v2544_v23 = vld [vmem:[%s4271_s10 + $0x68] sm:$0xff] }
0x294a   :  { %v3109_v50 = vpack.c.bf16 %v2544_v23, %v2543_v20 }
0x294b   :  { %3268 = vtanh.f32 %v2303_v9 }
0x2955   :  { %v3269_v48 = vpop.eup %3268 }
0x2956   :  { %2306 = vrot.lane.b32.xlu1 %v3269_v48, %s3426_s6 }
0x295a   :  { %2317 = vrot.lane.b32.xlu1 %v2303_v9, %s3429_s15 }
0x29c8   :  { %v2307_v25 = vpop.permute.xlu1 %2306 }
0x29c9   :  { %v2309_v26 = vmul.f32 %v3267_v8, %v2307_v25  ;;  %v3103_v8 = vpack.c.bf16 %v2540_v11, %v2539_v19  ;;  %v2545_v25 = vld [vmem:[%s4271_s10 + $0x70] sm:$0xff] }
0x29cb   :  { %2312 = vrot.lane.b32.xlu0 %v2309_v26, %s3427_s20  ;;  %v2546_v26 = vld [vmem:[%s4271_s10 + $0x78] sm:$0xff] }
0x29cc   :  { %v2318_v17 = vpop.permute.xlu1 %2317 }
0x29cd   :  { %v2320_v40 = vsel %vm1144_vm2, %v2318_v17, %v2203_v60  ;;  %v2535_v60 = vld [vmem:[%s4271_s10 + $0x20] sm:$0xff]  ;;  %v3112_v17 = vpack.c.bf16 %v2546_v26, %v2545_v25 }
0x29ce   :  { %2407 = vrot.lane.b32.xlu1 %v2320_v40, %s3427_s20  ;;  %v2625_v40 = vld [vmem:[#allocation14] sm:$0xff] }
0x2a3d   :  { %v2313_v27 = vpop.permute.xlu0 %2312 }
0x2a3e   :  { %v4152_v28 = vsel %vm1144_vm2, %v2313_v27, %v2198_v7  ;;  %v3097_v7 = vpack.c.bf16 %v2536_v49, %v2535_v60  ;;  %v2626_v27 = vld [vmem:[#allocation14 + $0x8] sm:$0xff] }
0x2a3f   :  { %2779 = vmatmul.mubr.msk.f32.vlgmr.msra.gmra.mrb[26].mxu0 %vm123_vm0, %v4152_v28 }
0x2a40   :  { %v2408_v37 = vpop.permute.xlu1 %2407  ;;  %3092 = vmatpush3.bf16.msra.mxu0 %v3091_v13 }
0x2a41   :  { %3093 = vmatprep.subr.bf16.mxu0 %v3437_v18 }
0x2a44   :  { %3095 = vmatpush3.bf16.msra.mxu0 %v3094_v59 }
0x2a45   :  { %3096 = vmatprep.subr.bf16.mxu0 %v3437_v18 }
0x2a48   :  { %3098 = vmatpush3.bf16.msra.mxu0 %v3097_v7 }
0x2a49   :  { %3099 = vmatprep.subr.bf16.mxu0 %v3437_v18 }
0x2a4c   :  { %3101 = vmatpush3.bf16.msra.mxu0 %v3100_v10 }
0x2a4d   :  { %3102 = vmatprep.subr.bf16.mxu0 %v3437_v18 }
0x2a50   :  { %3104 = vmatpush3.bf16.msra.mxu0 %v3103_v8 }
0x2a51   :  { %3105 = vmatprep.subr.bf16.mxu0 %v3437_v18 }
0x2a54   :  { %3107 = vmatpush3.bf16.msra.mxu0 %v3106_v16 }
0x2a55   :  { %3108 = vmatprep.subr.bf16.mxu0 %v3437_v18 }
0x2a58   :  { %3110 = vmatpush3.bf16.msra.mxu0 %v3109_v50 }
0x2a59   :  { %3111 = vmatprep.subr.bf16.mxu0 %v3437_v18 }
0x2a5c   :  { %3113 = vmatpush3.bf16.msra.mxu0 %v3112_v17 }
0x2b12   :  { %v2392_v29 = vpop.f32.mrb[26].mxu0 }
0x2b13   :  { %v2394_v30 = vpop.f32.mrb[27].mxu0 }
0x2b14   :  { %v2397_v24 = vsel %vm118_vm1, %v2392_v29, %v2394_v30  ;;  %vm3438_vm1 = vmmov 0   ;;  %v3115_v29 = vpack.c.bf16 %v2626_v27, %v2625_v40  ;;  %v2628_v30 = vld [vmem:[#allocation14 + $0x18] sm:$0xff] }
0x2b15   :  { %v2398_v43 = vadd.f32 %v2397_v24, %v4034_v32  ;;  %2869 = vmatprep.mubr.msk.f32.mxu1 %vm3438_vm1, %v3425_v0  ;;  %2904 = vmatprep.mubr.msk.f32.mxu0 %vm3438_vm1, %v3425_v0 }
0x2b17   :  { %3270 = vtanh.f32 %v2398_v43  ;;  %v2780_v33 = vmul.f32 -1.442695, %v2398_v43  ;;  %v2630_v43 = vld [vmem:[#allocation14 + $0x28] sm:$0xff] }
0x2b19   :  { %3272 = vpow2.f32 %v2780_v33  ;;  %v2781_v33 = vld [vmem:[%s4270_s9] ss:$0 sm:$0xff] }
0x2b21   :  { %v3271_v31 = vpop.eup %3270 }
0x2b22   :  { %2412 = vrot.lane.b32.xlu0 %v3271_v31, %s3426_s6 }
0x2b23   :  { %v3273_v34 = vpop.eup %3272 }
0x2b24   :  { %v2402_v61 = vadd.f32 1.0, %v3273_v34 }
0x2b26   :  { %3274 = vrcp.f32 %v2402_v61 }
0x2b30   :  { %v3275_v35 = vpop.eup %3274 }
0x2b31   :  { %v2410_v38 = vmul.f32 %v3275_v35, %v2408_v37  ;;  %v2632_v37 = vld [vmem:[#allocation14 + $0x38] sm:$0xff] }
0x2b94   :  { %v2413_v14 = vpop.permute.xlu0 %2412 }
0x2b95   :  { %v2415_v36 = vmul.f32 %v3275_v35, %v2413_v14 }
0x2b97   :  { %2417 = vrot.lane.b32.xlu0 %v2415_v36, %s3427_s20  ;;  %v2631_v36 = vld [vmem:[#allocation14 + $0x30] sm:$0xff] }
0x2c09   :  { %v2418_v22 = vpop.permute.xlu0 %2417 }
0x2c0a   :  { %v2420_v39 = vadd.f32 %v2418_v22, %v2410_v38  ;;  %v3124_v38 = vpack.c.bf16 %v2632_v37, %v2631_v36  ;;  %v2783_v22 = vld [vmem:[%s4272_s11] ss:$0 sm:$0xff] }
0x2c0c   :  { %3276 = vtanh.f32 %v2420_v39 }
0x2c16   :  { %v3277_v32 = vpop.eup %3276 }
0x2c17   :  { %2423 = vrot.lane.b32.xlu1 %v3277_v32, %s3426_s6 }
0x2c89   :  { %v2424_v52 = vpop.permute.xlu1 %2423 }
0x2c8a   :  { %v2426_v6 = vmul.f32 %v3275_v35, %v2424_v52 }
0x2c8c   :  { %2429 = vrot.lane.b32.xlu0 %v2426_v6, %s3427_s20 }
0x2cfe   :  { %v2430_v63 = vpop.permute.xlu0 %2429 }
0x2cff   :  { %v2432_v3 = vsel %vm1262_vm3, %v2430_v63, %v4152_v28  ;;  %v2627_v28 = vld [vmem:[#allocation14 + $0x10] sm:$0xff] }
0x2d00   :  { %v2434_v4 = vrot.slane %v2432_v3, 4  ;;  %v3118_v24 = vpack.c.bf16 %v2628_v30, %v2627_v28 }
0x2d02   :  { %2438 = vrot.lane.b32.xlu1 %v2434_v4, %s3427_s20 }
0x2d74   :  { %v2439_v9 = vpop.permute.xlu1 %2438 }
0x2d75   :  { %v2441_v48 = vsel %vm123_vm0, %v2432_v3, %v2439_v9 }
0x2d76   :  { %2870 = vmatmul.mubr.msk.f32.vlgmr.msra.gmra.mrb[20].mxu1 %vm1358_vm5, %v2441_v48 }
0x2d77   :  { %2923 = vmatprep.mubr.msk.f32.mxu1 %vm3438_vm1, %v3425_v0  ;;  %3116 = vmatpush3.bf16.msra.mxu1 %v3115_v29  ;;  %v2629_v0 = vld [vmem:[#allocation14 + $0x20] sm:$0xff] }
0x2d78   :  { %3117 = vmatprep.subr.bf16.mxu1 %v3437_v18  ;;  %v3121_v31 = vpack.c.bf16 %v2630_v43, %v2629_v0 }
0x2d7b   :  { %3119 = vmatpush3.bf16.msra.mxu1 %v3118_v24 }
0x2d7c   :  { %3120 = vmatprep.subr.bf16.mxu1 %v3437_v18 }
0x2d7f   :  { %3122 = vmatpush3.bf16.msra.mxu1 %v3121_v31 }
0x2d80   :  { %3123 = vmatprep.subr.bf16.mxu1 %v3437_v18 }
0x2d83   :  { %3125 = vmatpush3.bf16.msra.mxu1 %v3124_v38 }
0x2e49   :  { %v2526_v34 = vpop.f32.mrb[20].mxu1 }
0x2e4a   :  { %v2527_v61 = vadd.f32 %v2781_v33, %v2526_v34  ;;  %v2871_v35 = vpop.f32.mrb[21].mxu1 }
0x2e4c   :  { %v2530_v14 = vmax.f32 %v2527_v61, 0.0 }
0x2e4e   :  { %2905 = vmatmul.mubr.f32.vlgmr.msra.gmra.mrb[28].mxu0 %v2530_v14 }
0x2f21   :  { %v2620_v39 = vpop.f32.mrb[28].mxu0 }
0x2f22   :  { %v2621_v32 = vadd.f32 %v2783_v22, %v2620_v39  ;;  %v2906_v41 = vpop.f32.mrb[29].mxu0 }
0x2f24   :  { %v2624_v42 = vmax.f32 %v2621_v32, 0.0 }
0x2f26   :  { %2924 = vmatmul.mubr.msk.f32.vlgmr.msra.gmra.mrb[22].mxu1 %vm1358_vm5, %v2624_v42 }
0x2ff9   :  { %v2709_v18 = vpop.f32.mrb[22].mxu1 }
0x2ffa   :  { %v2710_v45 = vadd.f32 %v2784_v44, %v2709_v18  ;;  %v2925_v46 = vpop.f32.mrb[23].mxu1 }
0x2ffc   :  { %2713 = vst [vmem:[#allocation15] sm:$0xff] %v2710_v45 }
0x2ffd   :  { %3399 = shalt.err (!%p3396_p2)
}
0x2ffe   :  { %s3400_s2 = scalar_lea.hbm %s4275_s14, 128 }
0x2fff   :  { %p3401_p3 = scmp.ne.s32.totalorder %s4275_s14, %s3400_s2  ;;  %p3404_p4 = scmp.lt.u32.totalorder %s3400_s2, %s4275_s14 }
0x3001   :  { %p3406_p5 = pnand %p3404_p4, %p3401_p3 }
0x3003   :  { %3409 = shalt.err (!%p3406_p5)
}
0x3004   :  { %2723 = dma.vmem_to_hbm [thread:$0]  %s2721_s5, 128, %s4275_s14, [#allocation8]  }
0x3005   :  { %3416 = dma.done.wait [#allocation8], 128  }
0x3006   :  { %3417 = vsyncadd [#allocation8], 4294967168 }
0x3007   :  { %2727 = vsyncpa [#allocation7], 1 }
0x3008   :  { %2728 = vsyncpa [#allocation10], 1 }
0x3009   :  { %2729 = vsyncpa [#allocation13], 1 }
0x300a   :  { %2730 = vsyncpa [#allocation8], 1 }

</bundles_post_ra>
